<compile_context>
chip_gen: v6e
topology: v6e:2x2x1
jax: 0.10.0
libtpu: 0.0.40
codegen_flags: <defaults>
</compile_context>

<pallas_src>
import numpy as np
import jax
import jax.numpy as jnp
from jax.experimental import pallas as pl
from jax.experimental.pallas import tpu as pltpu


# ------------------------------ fused kernel -------------------------------

def _net_kernel(x_ref, w1_ref, b1_ref, w2_ref, b2_ref,
                fc1_ref, fc1b_ref, fc2_ref, fc2b_ref, o_ref):
    bt = x_ref.shape[1]                      # images per batch tile (multiple of 8)
    f32 = jnp.float32
    bf16 = jnp.bfloat16

    # Rows of every 2-D slab below are ordered (spatial_row, image), so conv row
    # windows and 2x2 pooling row-pairs are contiguous, 8-aligned row blocks.
    xf = x_ref[...].reshape(28 * bt, 28)                       # bf16, row = h*bt + n

    # ---- conv1 (5x5, 1 -> 10): banded bf16 matmuls; lane = out_col*10 + chan ----
    y1 = b1_ref[...].astype(f32)                               # (1, 240), broadcasts
    for di in range(5):
        y1 = y1 + jnp.dot(xf[di * bt:(di + 24) * bt, :], w1_ref[di],
                          preferred_element_type=f32)          # (24*bt, 240) f32

    # ---- 2x2 max-pool + ReLU (row pairs via reshape+max, column pairs via
    #      lane shift; odd column groups are zeroed by w2big) ----
    mh = y1.reshape(12, 2, bt, 240).max(axis=1).reshape(12 * bt, 240)
    mh_s = jnp.concatenate([mh[:, 10:], mh[:, :10]], axis=-1)  # pairs col j with j+1
    p1 = jnp.maximum(jnp.maximum(mh, mh_s), 0.0).astype(bf16)  # (12*bt, 240)

    # ---- conv2 (5x5, 10 -> 20): banded bf16 matmuls ----
    # TODO(synk): Dropout2d(p=0.5) training-mode channel dropout not implemented;
    # it is the identity in eval mode, which is what this kernel reproduces.
    y2 = b2_ref[...].astype(f32)                               # (1, 160)
    for di in range(5):
        y2 = y2 + jnp.dot(p1[di * bt:(di + 8) * bt, :], w2_ref[di],
                          preferred_element_type=f32)          # (8*bt, 160) f32

    # ---- 2x2 max-pool + ReLU, then one K=640 fc1 matmul (flatten folded) ----
    y2_s = jnp.concatenate([y2[:, 20:], y2[:, :20]], axis=-1)  # pairs col j2 with j2+1
    m2 = jnp.maximum(y2, y2_s)                                 # (8*bt, 160)
    m2p = jnp.maximum(m2.reshape(4, 2, bt, 160).max(axis=1), 0.0)   # (4, bt, 160)
    p4 = jnp.concatenate([m2p[0], m2p[1], m2p[2], m2p[3]],
                         axis=-1).astype(bf16)                 # (bt, 640)
    h1 = jnp.maximum(jnp.dot(p4, fc1_ref[...], preferred_element_type=f32)
                     + fc1b_ref[...], 0.0).astype(bf16)        # (bt, 50) = relu(fc1)

    # ---- fc2 (lane-padded to 128) + masked log_softmax over first 10 lanes ----
    z = jnp.dot(h1, fc2_ref[...], preferred_element_type=f32) + fc2b_ref[...]  # (bt,128)
    lane = jax.lax.broadcasted_iota(jnp.int32, z.shape, 1)
    zm = jnp.where(lane < 10, z, jnp.float32(-1e30))
    m = jnp.max(zm, axis=-1, keepdims=True)
    lse = jnp.log(jnp.sum(jnp.exp(zm - m), axis=-1, keepdims=True)) + m
    o_ref[...] = (z - lse).astype(o_ref.dtype)                 # lanes >=10 are garbage


# --------------------------- wrapper / pallas_call --------------------------

def _pick_block_n(n: int) -> int:
    """Batch tile: big (<=128) but keeping a >=2-step grid when the batch allows."""
    if n <= 8:
        return 8
    half = (((n + 1) // 2) + 7) // 8 * 8
    return max(8, min(128, half))


def net_forward(prepared, x_nchw, *, block_n=None):
    """x_nchw: (N, 1, 28, 28) float32 -> (N, 10) log-probabilities."""
    (w1big, b1t, w2big, b2t, fc1w, fc1b, fc2w, fc2b) = prepared

    n = x_nchw.shape[0]
    if block_n is None:
        block_n = _pick_block_n(n)
    assert block_n % 8 == 0

    x = x_nchw.astype(jnp.bfloat16).reshape(n, 28, 28)
    n_pad = ((n + block_n - 1) // block_n) * block_n
    if n_pad != n:
        x = jnp.pad(x, ((0, n_pad - n), (0, 0), (0, 0)))
    x_t = jnp.transpose(x, (1, 0, 2))                          # (28, n_pad, 28)

    out = pl.pallas_call(
        _net_kernel,
        out_shape=jax.ShapeDtypeStruct((n_pad, 128), jnp.float32),
        grid=(n_pad // block_n,),
        in_specs=[
            pl.BlockSpec((28, block_n, 28), lambda i: (0, i, 0)),   # image tile (bf16)
            pl.BlockSpec((5, 28, 240), lambda i: (0, 0, 0)),        # conv1 lowered
            pl.BlockSpec((1, 240), lambda i: (0, 0)),
            pl.BlockSpec((5, 240, 160), lambda i: (0, 0, 0)),       # conv2 lowered
            pl.BlockSpec((1, 160), lambda i: (0, 0)),
            pl.BlockSpec((640, 50), lambda i: (0, 0)),              # fc1 merged K=640
            pl.BlockSpec((1, 50), lambda i: (0, 0)),
            pl.BlockSpec((50, 128), lambda i: (0, 0)),              # fc2 lane-padded
            pl.BlockSpec((1, 128), lambda i: (0, 0)),
        ],
        out_specs=pl.BlockSpec((block_n, 128), lambda i: (i, 0)),   # lane-dense stores
        compiler_params=pltpu.CompilerParams(
            dimension_semantics=("parallel",),                      # v7x: 2 TCs/chip
            vmem_limit_bytes=32 * 1024 * 1024),
    )(x_t, w1big, b1t, w2big, b2t, fc1w, fc1b, fc2w, fc2b)
    return out[:n, :10]


# --------------------------- parameter preparation --------------------------

def init_params(key):
    """PyTorch-default-like init, in the original PyTorch layouts."""
    ks = jax.random.split(key, 8)

    def u(k, shape, fan_in):
        bound = 1.0 / np.sqrt(float(fan_in))
        return jax.random.uniform(k, shape, jnp.float32, -bound, bound)

    return {
        "conv1_w": u(ks[0], (10, 1, 5, 5), 1 * 5 * 5),
        "conv1_b": u(ks[1], (10,), 1 * 5 * 5),
        "conv2_w": u(ks[2], (20, 10, 5, 5), 10 * 5 * 5),
        "conv2_b": u(ks[3], (20,), 10 * 5 * 5),
        "fc1_w": u(ks[4], (50, 320), 320),
        "fc1_b": u(ks[5], (50,), 320),
        "fc2_w": u(ks[6], (10, 50), 50),
        "fc2_b": u(ks[7], (10,), 50),
    }


def prepare_params(params):
    """One-time lowering of PyTorch-layout weights into the kernel's layouts."""
    w1 = np.asarray(params["conv1_w"], np.float32)   # (10, 1, 5, 5)
    b1 = np.asarray(params["conv1_b"], np.float32)
    w2 = np.asarray(params["conv2_w"], np.float32)   # (20, 10, 5, 5)
    b2 = np.asarray(params["conv2_b"], np.float32)
    fc1w = np.asarray(params["fc1_w"], np.float32)   # (50, 320)
    fc1b = np.asarray(params["fc1_b"], np.float32)
    fc2w = np.asarray(params["fc2_w"], np.float32)   # (10, 50)
    fc2b = np.asarray(params["fc2_b"], np.float32)

    # conv1: (5, 28, 240); output lane = j*10 + co, j in [0, 24).
    w1big = np.zeros((5, 28, 24 * 10), np.float32)
    for di in range(5):
        for j in range(24):
            for dj in range(5):
                w1big[di, j + dj, j * 10:(j + 1) * 10] = w1[:, 0, di, dj]
    b1t = np.tile(b1, 24)[None, :]                                   # (1, 240)

    # conv2: (5, 240, 160); input lane = j*10 + ci (only even j carry pooled
    # data -> odd-j rows stay 0); output lane = j2*20 + co, j2 in [0, 8).
    w2big = np.zeros((5, 240, 8 * 20), np.float32)
    for di in range(5):
        for j2 in range(8):
            for dj in range(5):
                j = 2 * (j2 + dj)
                for ci in range(10):
                    w2big[di, j * 10 + ci, j2 * 20:(j2 + 1) * 20] = w2[:, ci, di, dj]
    b2t = np.tile(b2, 8)[None, :]                                    # (1, 160)

    # fc1: single (640, 50); input lane = p2*160 + j2*20 + co (odd j2 -> 0).
    # PyTorch x.view(-1, 320) index = co*16 + h*4 + w.
    fc1w_eff = np.zeros((640, 50), np.float32)
    for p2 in range(4):
        for j2 in range(0, 8, 2):
            q2 = j2 // 2
            for co in range(20):
                fc1w_eff[p2 * 160 + j2 * 20 + co, :] = fc1w[:, co * 16 + p2 * 4 + q2]
    fc1b_eff = fc1b[None, :]                                         # (1, 50)

    # fc2: lane-padded to 128 output lanes (lanes >= 10 are zero).
    fc2w_eff = np.zeros((50, 128), np.float32)
    fc2w_eff[:, :10] = fc2w.T
    fc2b_eff = np.zeros((1, 128), np.float32)
    fc2b_eff[0, :10] = fc2b

    def _bf(a):
        return jnp.asarray(a, jnp.bfloat16)

    def _f(a):
        return jnp.asarray(a, jnp.float32)

    return (_bf(w1big), _f(b1t), _bf(w2big), _f(b2t),
            _bf(fc1w_eff), _f(fc1b_eff), _bf(fc2w_eff), _f(fc2b_eff))


# ------------------------------ pure-JAX reference ---------------------------

def net_reference(params, x_nchw):
    x = x_nchw.astype(jnp.float32)
    hi = jax.lax.Precision.HIGHEST

    def conv(z, w, b):
        z = jax.lax.conv_general_dilated(
            z, w, window_strides=(1, 1), padding="VALID",
            dimension_numbers=("NCHW", "OIHW", "NCHW"), precision=hi)
        return z + b[None, :, None, None]

    def pool_relu(z):
        n, c, h, w = z.shape
        z = z.reshape(n, c, h // 2, 2, w // 2, 2).max(axis=(3, 5))
        return jnp.maximum(z, 0.0)

    y = pool_relu(conv(x, params["conv1_w"], params["conv1_b"]))
    y = pool_relu(conv(y, params["conv2_w"], params["conv2_b"]))  # Dropout2d = id (eval)
    y = y.reshape(y.shape[0], -1)
    y = jnp.maximum(jnp.dot(y, params["fc1_w"].T, precision=hi) + params["fc1_b"], 0.0)
    y = jnp.dot(y, params["fc2_w"].T, precision=hi) + params["fc2_b"]
    return jax.nn.log_softmax(y, axis=-1)


# ----------------------------------- main ------------------------------------

if __name__ == "__main__":
    key = jax.random.PRNGKey(0)
    pkey, xkey = jax.random.split(key)
    params = init_params(pkey)
    prepared = prepare_params(params)

    x = jax.random.normal(xkey, (2, 1, 28, 28), jnp.float32)

    out = jax.block_until_ready(jax.jit(net_forward)(prepared, x))
    assert out.shape == (2, 10)

    ref = jax.block_until_ready(jax.jit(net_reference)(params, x))
    np.testing.assert_allclose(np.asarray(out), np.asarray(ref), atol=3e-2, rtol=3e-2)

    print("KERNEL_OK")
</pallas_src>

<mosaic_0001>
module attributes {stable_mosaic.version = 11 : i64} {
  func.func @_net_kernel(%arg0: i32, %arg1: memref<28x8x28xbf16, #tpu.memory_space<vmem>>, %arg2: memref<5x28x240xbf16, #tpu.memory_space<vmem>>, %arg3: memref<1x240xf32, #tpu.memory_space<vmem>>, %arg4: memref<5x240x160xbf16, #tpu.memory_space<vmem>>, %arg5: memref<1x160xf32, #tpu.memory_space<vmem>>, %arg6: memref<640x50xbf16, #tpu.memory_space<vmem>>, %arg7: memref<1x50xf32, #tpu.memory_space<vmem>>, %arg8: memref<50x128xbf16, #tpu.memory_space<vmem>>, %arg9: memref<1x128xf32, #tpu.memory_space<vmem>>, %arg10: memref<8x128xf32, #tpu.memory_space<vmem>>) attributes {dimension_semantics = [#tpu.dimension_semantics<parallel>], iteration_bounds = array<i64: 1>, scalar_prefetch = 0 : i64, scratch_operands = 0 : i64, tpu.core_type = #tpu.core_type<tc>, window_params = [{transform_indices = @transform_0, window_bounds = array<i64: 28, 8, 28>}, {pipeline_mode = #tpu.pipeline_mode<synchronous>, transform_indices = @transform_1, window_bounds = array<i64: 5, 28, 240>}, {pipeline_mode = #tpu.pipeline_mode<synchronous>, transform_indices = @transform_2, window_bounds = array<i64: 1, 240>}, {pipeline_mode = #tpu.pipeline_mode<synchronous>, transform_indices = @transform_3, window_bounds = array<i64: 5, 240, 160>}, {pipeline_mode = #tpu.pipeline_mode<synchronous>, transform_indices = @transform_4, window_bounds = array<i64: 1, 160>}, {pipeline_mode = #tpu.pipeline_mode<synchronous>, transform_indices = @transform_5, window_bounds = array<i64: 640, 50>}, {pipeline_mode = #tpu.pipeline_mode<synchronous>, transform_indices = @transform_6, window_bounds = array<i64: 1, 50>}, {pipeline_mode = #tpu.pipeline_mode<synchronous>, transform_indices = @transform_7, window_bounds = array<i64: 50, 128>}, {pipeline_mode = #tpu.pipeline_mode<synchronous>, transform_indices = @transform_8, window_bounds = array<i64: 1, 128>}, {transform_indices = @transform_9, window_bounds = array<i64: 8, 128>}]} {
    %c0 = arith.constant 0 : index
    %c0_0 = arith.constant 0 : index
    %c0_1 = arith.constant 0 : index
    %0 = vector.load %arg1[%c0, %c0_0, %c0_1] : memref<28x8x28xbf16, #tpu.memory_space<vmem>>, vector<28x8x28xbf16>
    %1 = vector.shape_cast %0 : vector<28x8x28xbf16> to vector<224x28xbf16>
    %c0_2 = arith.constant 0 : index
    %c0_3 = arith.constant 0 : index
    %2 = vector.load %arg3[%c0_2, %c0_3] : memref<1x240xf32, #tpu.memory_space<vmem>>, vector<1x240xf32>
    %3 = vector.extract_strided_slice %1 {offsets = [0, 0], sizes = [192, 28], strides = [1, 1]} : vector<224x28xbf16> to vector<192x28xbf16>
    %c0_4 = arith.constant 0 : index
    %c0_5 = arith.constant 0 : index
    %c0_6 = arith.constant 0 : index
    %4 = vector.load %arg2[%c0_4, %c0_5, %c0_6] : memref<5x28x240xbf16, #tpu.memory_space<vmem>>, vector<1x28x240xbf16>
    %5 = vector.shape_cast %4 : vector<1x28x240xbf16> to vector<28x240xbf16>
    %cst = arith.constant dense<0.000000e+00> : vector<192x240xf32>
    %6 = tpu.matmul %3, %5, %cst {dimension_numbers = #tpu.dot_dimension_numbers<[1], [0], [0], [1], [0, 0, 1, 1], [], []>} : vector<192x28xbf16>, vector<28x240xbf16>, vector<192x240xf32> -> vector<192x240xf32>
    %7 = vector.broadcast %2 : vector<1x240xf32> to vector<192x240xf32>
    %8 = arith.addf %7, %6 : vector<192x240xf32>
    %9 = vector.extract_strided_slice %1 {offsets = [8, 0], sizes = [192, 28], strides = [1, 1]} : vector<224x28xbf16> to vector<192x28xbf16>
    %c1 = arith.constant 1 : index
    %c0_7 = arith.constant 0 : index
    %c0_8 = arith.constant 0 : index
    %10 = vector.load %arg2[%c1, %c0_7, %c0_8] : memref<5x28x240xbf16, #tpu.memory_space<vmem>>, vector<1x28x240xbf16>
    %11 = vector.shape_cast %10 : vector<1x28x240xbf16> to vector<28x240xbf16>
    %cst_9 = arith.constant dense<0.000000e+00> : vector<192x240xf32>
    %12 = tpu.matmul %9, %11, %cst_9 {dimension_numbers = #tpu.dot_dimension_numbers<[1], [0], [0], [1], [0, 0, 1, 1], [], []>} : vector<192x28xbf16>, vector<28x240xbf16>, vector<192x240xf32> -> vector<192x240xf32>
    %13 = arith.addf %8, %12 : vector<192x240xf32>
    %14 = vector.extract_strided_slice %1 {offsets = [16, 0], sizes = [192, 28], strides = [1, 1]} : vector<224x28xbf16> to vector<192x28xbf16>
    %c2 = arith.constant 2 : index
    %c0_10 = arith.constant 0 : index
    %c0_11 = arith.constant 0 : index
    %15 = vector.load %arg2[%c2, %c0_10, %c0_11] : memref<5x28x240xbf16, #tpu.memory_space<vmem>>, vector<1x28x240xbf16>
    %16 = vector.shape_cast %15 : vector<1x28x240xbf16> to vector<28x240xbf16>
    %cst_12 = arith.constant dense<0.000000e+00> : vector<192x240xf32>
    %17 = tpu.matmul %14, %16, %cst_12 {dimension_numbers = #tpu.dot_dimension_numbers<[1], [0], [0], [1], [0, 0, 1, 1], [], []>} : vector<192x28xbf16>, vector<28x240xbf16>, vector<192x240xf32> -> vector<192x240xf32>
    %18 = arith.addf %13, %17 : vector<192x240xf32>
    %19 = vector.extract_strided_slice %1 {offsets = [24, 0], sizes = [192, 28], strides = [1, 1]} : vector<224x28xbf16> to vector<192x28xbf16>
    %c3 = arith.constant 3 : index
    %c0_13 = arith.constant 0 : index
    %c0_14 = arith.constant 0 : index
    %20 = vector.load %arg2[%c3, %c0_13, %c0_14] : memref<5x28x240xbf16, #tpu.memory_space<vmem>>, vector<1x28x240xbf16>
    %21 = vector.shape_cast %20 : vector<1x28x240xbf16> to vector<28x240xbf16>
    %cst_15 = arith.constant dense<0.000000e+00> : vector<192x240xf32>
    %22 = tpu.matmul %19, %21, %cst_15 {dimension_numbers = #tpu.dot_dimension_numbers<[1], [0], [0], [1], [0, 0, 1, 1], [], []>} : vector<192x28xbf16>, vector<28x240xbf16>, vector<192x240xf32> -> vector<192x240xf32>
    %23 = arith.addf %18, %22 : vector<192x240xf32>
    %24 = vector.extract_strided_slice %1 {offsets = [32, 0], sizes = [192, 28], strides = [1, 1]} : vector<224x28xbf16> to vector<192x28xbf16>
    %c4 = arith.constant 4 : index
    %c0_16 = arith.constant 0 : index
    %c0_17 = arith.constant 0 : index
    %25 = vector.load %arg2[%c4, %c0_16, %c0_17] : memref<5x28x240xbf16, #tpu.memory_space<vmem>>, vector<1x28x240xbf16>
    %26 = vector.shape_cast %25 : vector<1x28x240xbf16> to vector<28x240xbf16>
    %cst_18 = arith.constant dense<0.000000e+00> : vector<192x240xf32>
    %27 = tpu.matmul %24, %26, %cst_18 {dimension_numbers = #tpu.dot_dimension_numbers<[1], [0], [0], [1], [0, 0, 1, 1], [], []>} : vector<192x28xbf16>, vector<28x240xbf16>, vector<192x240xf32> -> vector<192x240xf32>
    %28 = arith.addf %23, %27 : vector<192x240xf32>
    %29 = vector.shape_cast %28 : vector<192x240xf32> to vector<12x2x8x240xf32>
    %cst_19 = arith.constant dense<0xFF800000> : vector<12x8x240xf32>
    %30 = vector.multi_reduction <maximumf>, %29, %cst_19 [1] : vector<12x2x8x240xf32> to vector<12x8x240xf32>
    %31 = vector.shape_cast %30 : vector<12x8x240xf32> to vector<96x240xf32>
    %32 = vector.extract_strided_slice %31 {offsets = [0, 10], sizes = [96, 230], strides = [1, 1]} : vector<96x240xf32> to vector<96x230xf32>
    %33 = vector.extract_strided_slice %31 {offsets = [0, 0], sizes = [96, 10], strides = [1, 1]} : vector<96x240xf32> to vector<96x10xf32>
    %34 = tpu.concatenate %32, %33 in 1 : vector<96x230xf32>, vector<96x10xf32> -> vector<96x240xf32>
    %35 = arith.maximumf %31, %34 : vector<96x240xf32>
    %cst_20 = arith.constant 0.000000e+00 : f32
    %36 = vector.broadcast %cst_20 : f32 to vector<96x240xf32>
    %37 = arith.maximumf %35, %36 : vector<96x240xf32>
    %38 = arith.truncf %37 : vector<96x240xf32> to vector<96x240xbf16>
    %c0_21 = arith.constant 0 : index
    %c0_22 = arith.constant 0 : index
    %39 = vector.load %arg5[%c0_21, %c0_22] : memref<1x160xf32, #tpu.memory_space<vmem>>, vector<1x160xf32>
    %40 = vector.extract_strided_slice %38 {offsets = [0, 0], sizes = [64, 240], strides = [1, 1]} : vector<96x240xbf16> to vector<64x240xbf16>
    %c0_23 = arith.constant 0 : index
    %c0_24 = arith.constant 0 : index
    %c0_25 = arith.constant 0 : index
    %41 = vector.load %arg4[%c0_23, %c0_24, %c0_25] : memref<5x240x160xbf16, #tpu.memory_space<vmem>>, vector<1x240x160xbf16>
    %42 = vector.shape_cast %41 : vector<1x240x160xbf16> to vector<240x160xbf16>
    %cst_26 = arith.constant dense<0.000000e+00> : vector<64x160xf32>
    %43 = tpu.matmul %40, %42, %cst_26 {dimension_numbers = #tpu.dot_dimension_numbers<[1], [0], [0], [1], [0, 0, 1, 1], [], []>} : vector<64x240xbf16>, vector<240x160xbf16>, vector<64x160xf32> -> vector<64x160xf32>
    %44 = vector.broadcast %39 : vector<1x160xf32> to vector<64x160xf32>
    %45 = arith.addf %44, %43 : vector<64x160xf32>
    %46 = vector.extract_strided_slice %38 {offsets = [8, 0], sizes = [64, 240], strides = [1, 1]} : vector<96x240xbf16> to vector<64x240xbf16>
    %c1_27 = arith.constant 1 : index
    %c0_28 = arith.constant 0 : index
    %c0_29 = arith.constant 0 : index
    %47 = vector.load %arg4[%c1_27, %c0_28, %c0_29] : memref<5x240x160xbf16, #tpu.memory_space<vmem>>, vector<1x240x160xbf16>
    %48 = vector.shape_cast %47 : vector<1x240x160xbf16> to vector<240x160xbf16>
    %cst_30 = arith.constant dense<0.000000e+00> : vector<64x160xf32>
    %49 = tpu.matmul %46, %48, %cst_30 {dimension_numbers = #tpu.dot_dimension_numbers<[1], [0], [0], [1], [0, 0, 1, 1], [], []>} : vector<64x240xbf16>, vector<240x160xbf16>, vector<64x160xf32> -> vector<64x160xf32>
    %50 = arith.addf %45, %49 : vector<64x160xf32>
    %51 = vector.extract_strided_slice %38 {offsets = [16, 0], sizes = [64, 240], strides = [1, 1]} : vector<96x240xbf16> to vector<64x240xbf16>
    %c2_31 = arith.constant 2 : index
    %c0_32 = arith.constant 0 : index
    %c0_33 = arith.constant 0 : index
    %52 = vector.load %arg4[%c2_31, %c0_32, %c0_33] : memref<5x240x160xbf16, #tpu.memory_space<vmem>>, vector<1x240x160xbf16>
    %53 = vector.shape_cast %52 : vector<1x240x160xbf16> to vector<240x160xbf16>
    %cst_34 = arith.constant dense<0.000000e+00> : vector<64x160xf32>
    %54 = tpu.matmul %51, %53, %cst_34 {dimension_numbers = #tpu.dot_dimension_numbers<[1], [0], [0], [1], [0, 0, 1, 1], [], []>} : vector<64x240xbf16>, vector<240x160xbf16>, vector<64x160xf32> -> vector<64x160xf32>
    %55 = arith.addf %50, %54 : vector<64x160xf32>
    %56 = vector.extract_strided_slice %38 {offsets = [24, 0], sizes = [64, 240], strides = [1, 1]} : vector<96x240xbf16> to vector<64x240xbf16>
    %c3_35 = arith.constant 3 : index
    %c0_36 = arith.constant 0 : index
    %c0_37 = arith.constant 0 : index
    %57 = vector.load %arg4[%c3_35, %c0_36, %c0_37] : memref<5x240x160xbf16, #tpu.memory_space<vmem>>, vector<1x240x160xbf16>
    %58 = vector.shape_cast %57 : vector<1x240x160xbf16> to vector<240x160xbf16>
    %cst_38 = arith.constant dense<0.000000e+00> : vector<64x160xf32>
    %59 = tpu.matmul %56, %58, %cst_38 {dimension_numbers = #tpu.dot_dimension_numbers<[1], [0], [0], [1], [0, 0, 1, 1], [], []>} : vector<64x240xbf16>, vector<240x160xbf16>, vector<64x160xf32> -> vector<64x160xf32>
    %60 = arith.addf %55, %59 : vector<64x160xf32>
    %61 = vector.extract_strided_slice %38 {offsets = [32, 0], sizes = [64, 240], strides = [1, 1]} : vector<96x240xbf16> to vector<64x240xbf16>
    %c4_39 = arith.constant 4 : index
    %c0_40 = arith.constant 0 : index
    %c0_41 = arith.constant 0 : index
    %62 = vector.load %arg4[%c4_39, %c0_40, %c0_41] : memref<5x240x160xbf16, #tpu.memory_space<vmem>>, vector<1x240x160xbf16>
    %63 = vector.shape_cast %62 : vector<1x240x160xbf16> to vector<240x160xbf16>
    %cst_42 = arith.constant dense<0.000000e+00> : vector<64x160xf32>
    %64 = tpu.matmul %61, %63, %cst_42 {dimension_numbers = #tpu.dot_dimension_numbers<[1], [0], [0], [1], [0, 0, 1, 1], [], []>} : vector<64x240xbf16>, vector<240x160xbf16>, vector<64x160xf32> -> vector<64x160xf32>
    %65 = arith.addf %60, %64 : vector<64x160xf32>
    %66 = vector.extract_strided_slice %65 {offsets = [0, 20], sizes = [64, 140], strides = [1, 1]} : vector<64x160xf32> to vector<64x140xf32>
    %67 = vector.extract_strided_slice %65 {offsets = [0, 0], sizes = [64, 20], strides = [1, 1]} : vector<64x160xf32> to vector<64x20xf32>
    %68 = tpu.concatenate %66, %67 in 1 : vector<64x140xf32>, vector<64x20xf32> -> vector<64x160xf32>
    %69 = arith.maximumf %65, %68 : vector<64x160xf32>
    %70 = vector.shape_cast %69 : vector<64x160xf32> to vector<4x2x8x160xf32>
    %cst_43 = arith.constant dense<0xFF800000> : vector<4x8x160xf32>
    %71 = vector.multi_reduction <maximumf>, %70, %cst_43 [1] : vector<4x2x8x160xf32> to vector<4x8x160xf32>
    %cst_44 = arith.constant 0.000000e+00 : f32
    %72 = vector.broadcast %cst_44 : f32 to vector<4x8x160xf32>
    %73 = arith.maximumf %71, %72 : vector<4x8x160xf32>
    %74 = vector.extract_strided_slice %73 {offsets = [0, 0, 0], sizes = [1, 8, 160], strides = [1, 1, 1]} : vector<4x8x160xf32> to vector<1x8x160xf32>
    %75 = vector.shape_cast %74 : vector<1x8x160xf32> to vector<8x160xf32>
    %76 = vector.extract_strided_slice %73 {offsets = [1, 0, 0], sizes = [1, 8, 160], strides = [1, 1, 1]} : vector<4x8x160xf32> to vector<1x8x160xf32>
    %77 = vector.shape_cast %76 : vector<1x8x160xf32> to vector<8x160xf32>
    %78 = vector.extract_strided_slice %73 {offsets = [2, 0, 0], sizes = [1, 8, 160], strides = [1, 1, 1]} : vector<4x8x160xf32> to vector<1x8x160xf32>
    %79 = vector.shape_cast %78 : vector<1x8x160xf32> to vector<8x160xf32>
    %80 = vector.extract_strided_slice %73 {offsets = [3, 0, 0], sizes = [1, 8, 160], strides = [1, 1, 1]} : vector<4x8x160xf32> to vector<1x8x160xf32>
    %81 = vector.shape_cast %80 : vector<1x8x160xf32> to vector<8x160xf32>
    %82 = tpu.concatenate %75, %77, %79, %81 in 1 : vector<8x160xf32>, vector<8x160xf32>, vector<8x160xf32>, vector<8x160xf32> -> vector<8x640xf32>
    %83 = arith.truncf %82 : vector<8x640xf32> to vector<8x640xbf16>
    %c0_45 = arith.constant 0 : index
    %c0_46 = arith.constant 0 : index
    %84 = vector.load %arg6[%c0_45, %c0_46] : memref<640x50xbf16, #tpu.memory_space<vmem>>, vector<640x50xbf16>
    %cst_47 = arith.constant dense<0.000000e+00> : vector<8x50xf32>
    %85 = tpu.matmul %83, %84, %cst_47 {dimension_numbers = #tpu.dot_dimension_numbers<[1], [0], [0], [1], [0, 0, 1, 1], [], []>} : vector<8x640xbf16>, vector<640x50xbf16>, vector<8x50xf32> -> vector<8x50xf32>
    %c0_48 = arith.constant 0 : index
    %c0_49 = arith.constant 0 : index
    %86 = vector.load %arg7[%c0_48, %c0_49] : memref<1x50xf32, #tpu.memory_space<vmem>>, vector<1x50xf32>
    %87 = vector.broadcast %86 : vector<1x50xf32> to vector<8x50xf32>
    %88 = arith.addf %85, %87 : vector<8x50xf32>
    %cst_50 = arith.constant 0.000000e+00 : f32
    %89 = vector.broadcast %cst_50 : f32 to vector<8x50xf32>
    %90 = arith.maximumf %88, %89 : vector<8x50xf32>
    %91 = arith.truncf %90 : vector<8x50xf32> to vector<8x50xbf16>
    %c0_51 = arith.constant 0 : index
    %c0_52 = arith.constant 0 : index
    %92 = vector.load %arg8[%c0_51, %c0_52] : memref<50x128xbf16, #tpu.memory_space<vmem>>, vector<50x128xbf16>
    %cst_53 = arith.constant dense<0.000000e+00> : vector<8x128xf32>
    %93 = tpu.matmul %91, %92, %cst_53 {dimension_numbers = #tpu.dot_dimension_numbers<[1], [0], [0], [1], [0, 0, 1, 1], [], []>} : vector<8x50xbf16>, vector<50x128xbf16>, vector<8x128xf32> -> vector<8x128xf32>
    %c0_54 = arith.constant 0 : index
    %c0_55 = arith.constant 0 : index
    %94 = vector.load %arg9[%c0_54, %c0_55] : memref<1x128xf32, #tpu.memory_space<vmem>>, vector<1x128xf32>
    %95 = vector.broadcast %94 : vector<1x128xf32> to vector<8x128xf32>
    %96 = arith.addf %93, %95 : vector<8x128xf32>
    %97 = tpu.iota {dimensions = array<i32: 1>} : vector<8x128xi32>
    %c10_i32 = arith.constant 10 : i32
    %98 = vector.broadcast %c10_i32 : i32 to vector<8x128xi32>
    %99 = arith.cmpi slt, %97, %98 : vector<8x128xi32>
    %cst_56 = arith.constant -1.000000e+30 : f32
    %100 = vector.broadcast %cst_56 : f32 to vector<8x128xf32>
    %101 = arith.select %99, %96, %100 : vector<8x128xi1>, vector<8x128xf32>
    %cst_57 = arith.constant dense<0xFF800000> : vector<8xf32>
    %102 = vector.multi_reduction <maximumf>, %101, %cst_57 [1] : vector<8x128xf32> to vector<8xf32>
    %103 = vector.shape_cast %102 : vector<8xf32> to vector<8x1xf32>
    %104 = vector.broadcast %103 : vector<8x1xf32> to vector<8x128xf32>
    %105 = arith.subf %101, %104 : vector<8x128xf32>
    %106 = math.exp %105 : vector<8x128xf32>
    %cst_58 = arith.constant dense<0.000000e+00> : vector<8xf32>
    %107 = vector.multi_reduction <add>, %106, %cst_58 [1] : vector<8x128xf32> to vector<8xf32>
    %108 = vector.shape_cast %107 : vector<8xf32> to vector<8x1xf32>
    %109 = math.log %108 : vector<8x1xf32>
    %110 = arith.addf %109, %103 : vector<8x1xf32>
    %111 = vector.broadcast %110 : vector<8x1xf32> to vector<8x128xf32>
    %112 = arith.subf %96, %111 : vector<8x128xf32>
    %c0_59 = arith.constant 0 : index
    %c0_60 = arith.constant 0 : index
    %113 = vector.load %arg10[%c0_59, %c0_60] : memref<8x128xf32, #tpu.memory_space<vmem>>, vector<8x128xf32>
    tpu.vector_store %arg10[%c0_59, %c0_60], %112 {strides = array<i32>} : memref<8x128xf32, #tpu.memory_space<vmem>>, vector<8x128xf32>,
    return
  }
  func.func @transform_0(%arg0: i32) -> (i32, i32, i32) {
    %c0_i32 = arith.constant 0 : i32
    %c0_i32_0 = arith.constant 0 : i32
    %c0_i32_1 = arith.constant 0 : i32
    return %c0_i32, %arg0, %c0_i32_0 : i32, i32, i32
  }
  func.func @transform_1(%arg0: i32) -> (i32, i32, i32) {
    %c0_i32 = arith.constant 0 : i32
    %c0_i32_0 = arith.constant 0 : i32
    %c0_i32_1 = arith.constant 0 : i32
    %c0_i32_2 = arith.constant 0 : i32
    return %c0_i32, %c0_i32_0, %c0_i32_1 : i32, i32, i32
  }
  func.func @transform_2(%arg0: i32) -> (i32, i32) {
    %c0_i32 = arith.constant 0 : i32
    %c0_i32_0 = arith.constant 0 : i32
    %c0_i32_1 = arith.constant 0 : i32
    return %c0_i32, %c0_i32_0 : i32, i32
  }
  func.func @transform_3(%arg0: i32) -> (i32, i32, i32) {
    %c0_i32 = arith.constant 0 : i32
    %c0_i32_0 = arith.constant 0 : i32
    %c0_i32_1 = arith.constant 0 : i32
    %c0_i32_2 = arith.constant 0 : i32
    return %c0_i32, %c0_i32_0, %c0_i32_1 : i32, i32, i32
  }
  func.func @transform_4(%arg0: i32) -> (i32, i32) {
    %c0_i32 = arith.constant 0 : i32
    %c0_i32_0 = arith.constant 0 : i32
    %c0_i32_1 = arith.constant 0 : i32
    return %c0_i32, %c0_i32_0 : i32, i32
  }
  func.func @transform_5(%arg0: i32) -> (i32, i32) {
    %c0_i32 = arith.constant 0 : i32
    %c0_i32_0 = arith.constant 0 : i32
    %c0_i32_1 = arith.constant 0 : i32
    return %c0_i32, %c0_i32_0 : i32, i32
  }
  func.func @transform_6(%arg0: i32) -> (i32, i32) {
    %c0_i32 = arith.constant 0 : i32
    %c0_i32_0 = arith.constant 0 : i32
    %c0_i32_1 = arith.constant 0 : i32
    return %c0_i32, %c0_i32_0 : i32, i32
  }
  func.func @transform_7(%arg0: i32) -> (i32, i32) {
    %c0_i32 = arith.constant 0 : i32
    %c0_i32_0 = arith.constant 0 : i32
    %c0_i32_1 = arith.constant 0 : i32
    return %c0_i32, %c0_i32_0 : i32, i32
  }
  func.func @transform_8(%arg0: i32) -> (i32, i32) {
    %c0_i32 = arith.constant 0 : i32
    %c0_i32_0 = arith.constant 0 : i32
    %c0_i32_1 = arith.constant 0 : i32
    return %c0_i32, %c0_i32_0 : i32, i32
  }
  func.func @transform_9(%arg0: i32) -> (i32, i32) {
    %c0_i32 = arith.constant 0 : i32
    %c0_i32_0 = arith.constant 0 : i32
    return %arg0, %c0_i32 : i32, i32
  }
}

</mosaic_0001>

<bundles_post_ra>
// kernel: net_forward.1
= control target key start
LH: loop header
LB: loop body
LE: loop exit
PB: predicated region body
PF: predicated region fallthrough
CT: control target
= control target key end

     0   :  { %vm181_vm0 = vcmask 1045504   ;;  %v4875_v1 = vmov 0   ;;  %vm144_vm1 = vcmask 228352   ;;  %vm1389_vm2 = vcmask 916480   ;;  %s4876_s30 = smov 118   ;;  %s4877_s18 = smov 102   ;;  %s6955_s1 = inlined_call_operand.vmem [shape: bf16[5,28,240], index: 1, kind: input, shape index: {}]   ;;  %s6956_s0 = inlined_call_operand.vmem [shape: bf16[28,8,28], index: 0, kind: input, shape index: {}]   ;;  %s6957_s2 = inlined_call_operand.vmem [shape: f32[1,240], index: 2, kind: input, shape index: {}]   ;;  %s6958_s3 = inlined_call_operand.vmem [shape: bf16[5,240,160], index: 3, kind: input, shape index: {}]   ;;  %s6959_s4 = inlined_call_operand.vmem [shape: f32[1,160], index: 4, kind: input, shape index: {}]   ;;  %s6960_s5 = inlined_call_operand.vmem [shape: bf16[640,50], index: 5, kind: input, shape index: {}]   ;;  %s6961_s7 = inlined_call_operand.vmem [shape: bf16[50,128], index: 7, kind: input, shape index: {}]   ;;  %s6962_s6 = inlined_call_operand.vmem [shape: f32[1,50], index: 6, kind: input, shape index: {}]   ;;  %s6963_s8 = inlined_call_operand.vmem [shape: f32[1,128], index: 8, kind: input, shape index: {}]   ;;  %s6964_s9 = inlined_call_operand.vmem [shape: f32[8,128], index: 9, kind: output, shape index: {}]  }
   0x1   :  { %v4545_v0 = vld [vmem:[%s6955_s1 + $0x14] ss:$8 sps:$4 sm:$0x3f]   ;;  %220 = vmatprep.mubr.bf16.mxu0 %v4875_v1  ;;  %511 = vmatprep.mubr.bf16.mxu1 %v4875_v1  ;;  %v4547_v2 = vld [vmem:[%s6955_s1 + $0x10] ss:$8 sps:$4 sm:$0x3f]  }
   0x2   :  { %3841 = vmatprep.subr.msk.bf16.mxu0 %vm181_vm0, %v4545_v0  ;;  %v4548_v3 = vld [vmem:[%s6955_s1 + $0x34] ss:$8 sps:$4 sm:$0x3f]   ;;  %v4550_v4 = vld [vmem:[%s6955_s1 + $0x30] ss:$8 sps:$4 sm:$0x3f]  }
   0x3   :  { %v183_v5 = vsel %vm181_vm0, %v4547_v2, 0  ;;  %v4551_v6 = vld [vmem:[%s6955_s1 + $0x4] ss:$8 sps:$4 sm:$0xff]   ;;  %3874 = vmatprep.subr.msk.bf16.mxu1 %vm181_vm0, %v4548_v3  ;;  %v474_v7 = vsel %vm181_vm0, %v4550_v4, 0  ;;  %v4553_v8 = vld [vmem:[%s6955_s1] ss:$8 sps:$4 sm:$0xff]  }
   0x4   :  { %201 = vmatpush1.bf16.msra.mxu0 %v183_v5  ;;  %492 = vmatpush1.bf16.msra.mxu1 %v474_v7  ;;  %v4554_v9 = vld [vmem:[%s6955_s1 + $0x24] ss:$8 sps:$4 sm:$0xff]   ;;  %v4556_v10 = vld [vmem:[%s6955_s1 + $0x20] ss:$8 sps:$4 sm:$0xff]   ;;  %v37_v21 = vld [vmem:[%s6956_s0 + $0x10] sm:$0xf] }
   0x5   :  { %202 = vmatprep.subr.bf16.mxu0 %v4551_v6  ;;  %v33_v11 = vld [vmem:[%s6956_s0] sm:$0xf]  ;;  %v34_v12 = vld [vmem:[%s6956_s0 + $0x4] sm:$0xf]  ;;  %493 = vmatprep.subr.bf16.mxu1 %v4554_v9  ;;  %v35_v16 = vld [vmem:[%s6956_s0 + $0x8] sm:$0xf] }
   0x6   :  { %v3825_v13 = vcombine.low %v33_v11, %v34_v12  ;;  %v4558_v14 = vld [vmem:[%s6955_s1 + $0x54] ss:$8 sps:$4 sm:$0x3f]   ;;  %v4560_v15 = vld [vmem:[%s6955_s1 + $0x50] ss:$8 sps:$4 sm:$0x3f]   ;;  %v3858_v18 = vcombine.low %v34_v12, %v35_v16 }
   0x7   :  { %v710_v17 = vsel %vm181_vm0, %v4560_v15, 0  ;;  %v36_v19 = vld [vmem:[%s6956_s0 + $0xc] sm:$0xf]  ;;  %v4573_v20 = vld [vmem:[%s6955_s1 + $0x40] ss:$8 sps:$4 sm:$0xff]   ;;  %vm1509_vm3 = vcmask 965632  }
   0x8   :  { %203 = vmatpush1.bf16.msra.mxu0 %v4553_v8  ;;  %494 = vmatpush1.bf16.msra.mxu1 %v4556_v10  ;;  %v4575_v22 = vld [vmem:[%s6955_s1 + $0x44] ss:$8 sps:$4 sm:$0xff]   ;;  %v4998_v23 = vcombine.low %v35_v16, %v36_v19  ;;  %v5000_v24 = vcombine.low %v36_v19, %v37_v21  ;;  %v4587_v25 = vld [vmem:[%s6955_s1 + $0x74] ss:$8 sps:$4 sm:$0x3f]   ;;  %vm1582_vm4 = vcmask 834560  }
   0x9   :  { %3896 = vmatprep.subr.msk.bf16.mxu0 %vm181_vm0, %v4558_v14  ;;  %v38_v26 = vld [vmem:[%s6956_s0 + $0x14] sm:$0xf]  ;;  %v4589_v27 = vld [vmem:[%s6955_s1 + $0x70] ss:$8 sps:$4 sm:$0x3f]   ;;  %3918 = vmatprep.subr.msk.bf16.mxu1 %vm181_vm0, %v4587_v25  ;;  %vm1989_vm5 = vcmask 1043456  }
   0xa   :  { %v39_v28 = vld [vmem:[%s6956_s0 + $0x18] sm:$0xf]  ;;  %v4590_v29 = vld [vmem:[%s6955_s1 + $0x60] ss:$8 sps:$4 sm:$0xff]   ;;  %v4592_v30 = vld [vmem:[%s6955_s1 + $0x64] ss:$8 sps:$4 sm:$0xff]   ;;  %v5035_v34 = vcombine.low %v37_v21, %v38_v26 }
   0xb   :  { %3842 = vmatmul.mubr.msk.bf16.vlgmr.msra.gmra.mxu0 %vm144_vm1, %v3825_v13  ;;  %3875 = vmatmul.mubr.msk.bf16.vlgmr.msra.gmra.mxu1 %vm144_vm1, %v3858_v18  ;;  %v946_v31 = vsel %vm181_vm0, %v4589_v27, 0  ;;  %v4593_v32 = vld [vmem:[%s6955_s1 + $0x94] ss:$8 sps:$4 sm:$0x3f]   ;;  %v5040_v36 = vcombine.low %v38_v26, %v39_v28  ;;  %v41_v38 = vld [vmem:[%s6956_s0 + $0x20] sm:$0xf] }
   0xc   :  { %728 = vmatpush1.bf16.msra.mxu0 %v710_v17  ;;  %230 = vmatprep.mubr.bf16.mxu0 %v4875_v1  ;;  %v4595_v33 = vld [vmem:[%s6955_s1 + $0x90] ss:$8 sps:$4 sm:$0x3f]   ;;  %v40_v37 = vld [vmem:[%s6956_s0 + $0x1c] sm:$0xf]  ;;  %v6965_v17 = vlaneseq  ;;  %s4879_s14 = smov 12  }
   0xd   :  { %521 = vmatprep.mubr.bf16.mxu1 %v4875_v1  ;;  %729 = vmatprep.subr.bf16.mxu0 %v4575_v22  ;;  %v5038_v35 = vsel %vm181_vm0, %v4595_v33, 0  ;;  %v5054_v39 = vcombine.low %v39_v28, %v40_v37  ;;  %v5056_v40 = vcombine.low %v40_v37, %v41_v38  ;;  %v42_v41 = vld [vmem:[%s6956_s0 + $0x24] sm:$0xf]  ;;  %v43_v42 = vld [vmem:[%s6956_s0 + $0x28] sm:$0xf]  ;;  %vm3137_vm6 = vcmask 883712  }
   0xe   :  { %964 = vmatpush1.bf16.msra.mxu1 %v946_v31  ;;  %v5070_v43 = vcombine.low %v41_v38, %v42_v41  ;;  %v5072_v44 = vcombine.low %v42_v41, %v43_v42  ;;  %v44_v45 = vld [vmem:[%s6956_s0 + $0x2c] sm:$0xf]  ;;  %v45_v46 = vld [vmem:[%s6956_s0 + $0x30] sm:$0xf]  ;;  %v46_v49 = vld [vmem:[%s6956_s0 + $0x34] sm:$0xf] }
   0xf   :  { %965 = vmatprep.subr.bf16.mxu1 %v4592_v30  ;;  %v5086_v47 = vcombine.low %v43_v42, %v44_v45  ;;  %v5088_v48 = vcombine.low %v44_v45, %v45_v46  ;;  %v47_v50 = vld [vmem:[%s6956_s0 + $0x38] sm:$0xf]  ;;  %v5102_v51 = vcombine.low %v45_v46, %v46_v49  ;;  %v48_v53 = vld [vmem:[%s6956_s0 + $0x3c] sm:$0xf]  ;;  %v57_v54 = vld [vmem:[%s6956_s0 + $0x60] sm:$0xf] }
  0x10   :  { %730 = vmatpush1.bf16.msra.mxu0 %v4573_v20  ;;  %v5104_v52 = vcombine.low %v46_v49, %v47_v50  ;;  %v5120_v55 = vld [vmem:[%s6956_s0 + $0x64] sm:$0xf]  ;;  %v49_v56 = vld [vmem:[%s6956_s0 + $0x40] sm:$0xf]  ;;  %v5129_v58 = vcombine.low %v47_v50, %v48_v53  ;;  %v5138_v60 = vld [vmem:[%s6956_s0 + $0x68] sm:$0xf] }
  0x11   :  { %3940 = vmatprep.subr.msk.bf16.mxu0 %vm181_vm0, %v4593_v32  ;;  %v5127_v57 = vcombine.low %v57_v54, %v5120_v55  ;;  %v5131_v59 = vcombine.low %v48_v53, %v49_v56  ;;  %v5143_v61 = vld [vmem:[%s6956_s0 + $0x6c] sm:$0xf]  ;;  %v50_v62 = vld [vmem:[%s6956_s0 + $0x44] sm:$0xf]  ;;  %v51_v0 = vld [vmem:[%s6956_s0 + $0x48] sm:$0xf]  ;;  %v3913_v18 = vcombine.low %v5120_v55, %v5138_v60 }
  0x12   :  { %966 = vmatpush1.bf16.msra.mxu1 %v4590_v29  ;;  %v5157_v2 = vcombine.low %v49_v56, %v50_v62  ;;  %v3866_v3 = vcombine.low %v50_v62, %v51_v0  ;;  %v52_v4 = vld [vmem:[%s6956_s0 + $0x4c] sm:$0xf]  ;;  %v53_v5 = vld [vmem:[%s6956_s0 + $0x50] sm:$0xf]  ;;  %v54_v8 = vld [vmem:[%s6956_s0 + $0x54] sm:$0xf] }
  0x13   :  { %3843 = vmatmul.mubr.msk.bf16.gmra.mxu0 %vm144_vm1, %v4998_v23  ;;  %3876 = vmatmul.mubr.msk.bf16.gmra.mxu1 %vm144_vm1, %v5000_v24  ;;  %v5170_v6 = vcombine.low %v51_v0, %v52_v4  ;;  %v3867_v7 = vcombine.low %v52_v4, %v53_v5  ;;  %v55_v9 = vld [vmem:[%s6956_s0 + $0x58] sm:$0xf]  ;;  %v5183_v10 = vcombine.low %v53_v5, %v54_v8  ;;  %v56_v12 = vld [vmem:[%s6956_s0 + $0x5c] sm:$0xf]  ;;  %v4598_v15 = vld [vmem:[%s6955_s1 + $0x84] ss:$8 sps:$4 sm:$0xff]  }
  0x14   :  { %240 = vmatprep.mubr.bf16.mxu0 %v4875_v1  ;;  %531 = vmatprep.mubr.bf16.mxu1 %v4875_v1  ;;  %v3868_v11 = vcombine.low %v54_v8, %v55_v9  ;;  %v5193_v13 = vcombine.low %v55_v9, %v56_v12  ;;  %v3869_v14 = vcombine.low %v56_v12, %v57_v54  ;;  %v4596_v16 = vld [vmem:[%s6955_s1 + $0x80] ss:$8 sps:$4 sm:$0xff]   ;;  %v5272_v19 = vshrl.u32 %v6965_v17, 7  ;;  %s4881_s11 = smov 32   ;;  %s4884_s15 = smov 96  }
  0x15   :  { %v61_v21 = vld [vmem:[%s6957_s2] sm:$0x3]  ;;  %vm3186_vm7 = vcmask 97280   ;;  %vm3212_vm8 = vcmask 261120   ;;  %vm4882_vm9 = vmmov 0   ;;  %vm3251_vm10 = vcmask 523264  }
  0x16   :  { %6970 = vst [vmem:[#allocation2_spill] sm:$0xff] %v5272_v19  ;;  %v6967_v20 = vsub.s32 0, %v5272_v19  ;;  %v6966_v22 = vsub.s32 1, %v5272_v19  ;;  %vm3261_vm11 = vcmask 785408   ;;  %vm3761_vm12 = vcmask 1040384  }
  0x17   :  { %vm3757_vm13 = vcmask 408576  }
  0x1b   :  { %3844 = vmatmul.mubr.msk.bf16.gmra.mxu0 %vm144_vm1, %v5035_v34  ;;  %3877 = vmatmul.mubr.msk.bf16.gmra.mxu1 %vm144_vm1, %v5040_v36 }
  0x1c   :  { %250 = vmatprep.mubr.bf16.mxu0 %v4875_v1  ;;  %541 = vmatprep.mubr.bf16.mxu1 %v4875_v1 }
  0x23   :  { %3845 = vmatmul.mubr.msk.bf16.gmra.mxu0 %vm144_vm1, %v5054_v39  ;;  %3878 = vmatmul.mubr.msk.bf16.gmra.mxu1 %vm144_vm1, %v5056_v40 }
  0x24   :  { %260 = vmatprep.mubr.bf16.mxu0 %v4875_v1  ;;  %551 = vmatprep.mubr.bf16.mxu1 %v4875_v1 }
  0x2b   :  { %3846 = vmatmul.mubr.msk.bf16.gmra.mxu0 %vm144_vm1, %v5070_v43  ;;  %3879 = vmatmul.mubr.msk.bf16.gmra.mxu1 %vm144_vm1, %v5072_v44 }
  0x2c   :  { %270 = vmatprep.mubr.bf16.mxu0 %v4875_v1  ;;  %561 = vmatprep.mubr.bf16.mxu1 %v4875_v1 }
  0x33   :  { %3847 = vmatmul.mubr.msk.bf16.gmra.mxu0 %vm144_vm1, %v5086_v47  ;;  %3880 = vmatmul.mubr.msk.bf16.gmra.mxu1 %vm144_vm1, %v5088_v48 }
  0x34   :  { %280 = vmatprep.mubr.bf16.mxu0 %v4875_v1  ;;  %571 = vmatprep.mubr.bf16.mxu1 %v4875_v1 }
  0x3b   :  { %3848 = vmatmul.mubr.msk.bf16.gmra.mxu0 %vm144_vm1, %v5102_v51  ;;  %3881 = vmatmul.mubr.msk.bf16.gmra.mxu1 %vm144_vm1, %v5104_v52 }
  0x3c   :  { %290 = vmatprep.mubr.bf16.mxu0 %v4875_v1  ;;  %581 = vmatprep.mubr.bf16.mxu1 %v4875_v1 }
  0x43   :  { %3849 = vmatmul.mubr.msk.bf16.gmra.mxu0 %vm144_vm1, %v5129_v58  ;;  %3882 = vmatmul.mubr.msk.bf16.gmra.mxu1 %vm144_vm1, %v5131_v59 }
  0x44   :  { %300 = vmatprep.mubr.bf16.mxu0 %v4875_v1  ;;  %591 = vmatprep.mubr.bf16.mxu1 %v4875_v1 }
  0x4b   :  { %3850 = vmatmul.mubr.msk.bf16.gmra.mxu0 %vm144_vm1, %v5157_v2  ;;  %3883 = vmatmul.mubr.msk.bf16.gmra.mxu1 %vm144_vm1, %v3866_v3 }
  0x4c   :  { %310 = vmatprep.mubr.bf16.mxu0 %v4875_v1  ;;  %601 = vmatprep.mubr.bf16.mxu1 %v4875_v1 }
  0x53   :  { %3851 = vmatmul.mubr.msk.bf16.gmra.mxu0 %vm144_vm1, %v5170_v6  ;;  %3884 = vmatmul.mubr.msk.bf16.gmra.mxu1 %vm144_vm1, %v3867_v7 }
  0x54   :  { %320 = vmatprep.mubr.bf16.mxu0 %v4875_v1  ;;  %611 = vmatprep.mubr.bf16.mxu1 %v4875_v1 }
  0x5b   :  { %3852 = vmatmul.mubr.msk.bf16.gmra.mxu0 %vm144_vm1, %v5183_v10  ;;  %3885 = vmatmul.mubr.msk.bf16.gmra.mxu1 %vm144_vm1, %v3868_v11 }
  0x5c   :  { %330 = vmatprep.mubr.bf16.mxu0 %v4875_v1  ;;  %621 = vmatprep.mubr.bf16.mxu1 %v4875_v1 }
  0x63   :  { %3853 = vmatmul.mubr.msk.bf16.gmra.mxu0 %vm144_vm1, %v5193_v13  ;;  %3886 = vmatmul.mubr.msk.bf16.gmra.mxu1 %vm144_vm1, %v3869_v14 }
  0x64   :  { %747 = vmatprep.mubr.bf16.mxu0 %v4875_v1  ;;  %983 = vmatprep.mubr.bf16.mxu1 %v4875_v1 }
  0x6b   :  { %3897 = vmatmul.mubr.msk.bf16.vlgmr.msra.gmra.mxu0 %vm144_vm1, %v4998_v23  ;;  %3919 = vmatmul.mubr.msk.bf16.vlgmr.msra.gmra.mxu1 %vm144_vm1, %v5000_v24  ;;  %v5285_v23 = vrot.slane %v61_v21, %v6967_v20  ;;  %v5289_v24 = vrot.slane %v61_v21, %v6966_v22 }
  0x6c   :  { %1200 = vmatpush1.bf16.msra.mxu0 %v5038_v35  ;;  %757 = vmatprep.mubr.bf16.mxu0 %v4875_v1 }
  0x6d   :  { %993 = vmatprep.mubr.bf16.mxu1 %v4875_v1  ;;  %1201 = vmatprep.subr.bf16.mxu0 %v4598_v15 }
  0x70   :  { %1202 = vmatpush1.bf16.msra.mxu0 %v4596_v16 }
  0x73   :  { %3898 = vmatmul.mubr.msk.bf16.gmra.mxu0 %vm144_vm1, %v5035_v34  ;;  %3920 = vmatmul.mubr.msk.bf16.gmra.mxu1 %vm144_vm1, %v5040_v36 }
  0x74   :  { %767 = vmatprep.mubr.bf16.mxu0 %v4875_v1  ;;  %1003 = vmatprep.mubr.bf16.mxu1 %v4875_v1 }
  0x7b   :  { %3899 = vmatmul.mubr.msk.bf16.gmra.mxu0 %vm144_vm1, %v5054_v39  ;;  %3921 = vmatmul.mubr.msk.bf16.gmra.mxu1 %vm144_vm1, %v5056_v40 }
  0x7c   :  { %777 = vmatprep.mubr.bf16.mxu0 %v4875_v1  ;;  %1013 = vmatprep.mubr.bf16.mxu1 %v4875_v1 }
  0x83   :  { %3900 = vmatmul.mubr.msk.bf16.gmra.mxu0 %vm144_vm1, %v5070_v43  ;;  %3922 = vmatmul.mubr.msk.bf16.gmra.mxu1 %vm144_vm1, %v5072_v44 }
  0x84   :  { %787 = vmatprep.mubr.bf16.mxu0 %v4875_v1  ;;  %1023 = vmatprep.mubr.bf16.mxu1 %v4875_v1 }
  0x8b   :  { %3901 = vmatmul.mubr.msk.bf16.gmra.mxu0 %vm144_vm1, %v5086_v47  ;;  %3923 = vmatmul.mubr.msk.bf16.gmra.mxu1 %vm144_vm1, %v5088_v48 }
  0x8c   :  { %797 = vmatprep.mubr.bf16.mxu0 %v4875_v1  ;;  %1033 = vmatprep.mubr.bf16.mxu1 %v4875_v1 }
  0x93   :  { %3902 = vmatmul.mubr.msk.bf16.gmra.mxu0 %vm144_vm1, %v5102_v51  ;;  %3924 = vmatmul.mubr.msk.bf16.gmra.mxu1 %vm144_vm1, %v5104_v52 }
  0x94   :  { %807 = vmatprep.mubr.bf16.mxu0 %v4875_v1  ;;  %1043 = vmatprep.mubr.bf16.mxu1 %v4875_v1 }
  0x9b   :  { %3903 = vmatmul.mubr.msk.bf16.gmra.mxu0 %vm144_vm1, %v5129_v58  ;;  %3925 = vmatmul.mubr.msk.bf16.gmra.mxu1 %vm144_vm1, %v5131_v59 }
  0x9c   :  { %817 = vmatprep.mubr.bf16.mxu0 %v4875_v1  ;;  %1053 = vmatprep.mubr.bf16.mxu1 %v4875_v1 }
  0xa3   :  { %3904 = vmatmul.mubr.msk.bf16.gmra.mxu0 %vm144_vm1, %v5157_v2  ;;  %3926 = vmatmul.mubr.msk.bf16.gmra.mxu1 %vm144_vm1, %v3866_v3 }
  0xa4   :  { %827 = vmatprep.mubr.bf16.mxu0 %v4875_v1  ;;  %1063 = vmatprep.mubr.bf16.mxu1 %v4875_v1 }
  0xab   :  { %3905 = vmatmul.mubr.msk.bf16.gmra.mxu0 %vm144_vm1, %v5170_v6  ;;  %3927 = vmatmul.mubr.msk.bf16.gmra.mxu1 %vm144_vm1, %v3867_v7 }
  0xac   :  { %837 = vmatprep.mubr.bf16.mxu0 %v4875_v1  ;;  %1073 = vmatprep.mubr.bf16.mxu1 %v4875_v1 }
  0xb3   :  { %3906 = vmatmul.mubr.msk.bf16.gmra.mxu0 %vm144_vm1, %v5183_v10  ;;  %3928 = vmatmul.mubr.msk.bf16.gmra.mxu1 %vm144_vm1, %v3868_v11 }
  0xb4   :  { %847 = vmatprep.mubr.bf16.mxu0 %v4875_v1  ;;  %1083 = vmatprep.mubr.bf16.mxu1 %v4875_v1 }
  0xbb   :  { %3907 = vmatmul.mubr.msk.bf16.gmra.mxu0 %vm144_vm1, %v5193_v13  ;;  %3929 = vmatmul.mubr.msk.bf16.gmra.mxu1 %vm144_vm1, %v3869_v14 }
  0xbc   :  { %857 = vmatprep.mubr.bf16.mxu0 %v4875_v1  ;;  %1093 = vmatprep.mubr.bf16.mxu1 %v4875_v1 }
  0xc3   :  { %3908 = vmatmul.mubr.msk.bf16.gmra.mxu0 %vm144_vm1, %v5127_v57  ;;  %3930 = vmatmul.mubr.msk.bf16.gmra.mxu1 %vm144_vm1, %v3913_v18 }
  0xc4   :  { %1219 = vmatprep.mubr.bf16.mxu0 %v4875_v1 }
  0xcb   :  { %v222_v25 = vpop.f32.mrf.mxu0  ;;  %3941 = vmatmul.mubr.msk.bf16.vlgmr.msra.gmra.mxu0 %vm144_vm1, %v5035_v34  ;;  %v513_v27 = vpop.f32.mrf.mxu1 }
  0xcc   :  { %v352_v26 = vadd.f32 %v5285_v23, %v222_v25  ;;  %1229 = vmatprep.mubr.bf16.mxu0 %v4875_v1 }
  0xcd   :  { %v224_v28 = vpop.f32.mrf.mxu0  ;;  %v515_v31 = vpop.f32.mrf.mxu1 }
  0xce   :  { %v353_v29 = vadd.f32 %v5289_v24, %v224_v28  ;;  %v5296_v30 = vadd.f32 %v513_v27, %v352_v26 }
  0xcf   :  { %v226_v32 = vpop.f32.mrf.mxu0  ;;  %v517_v36 = vpop.f32.mrf.mxu1 }
  0xd0   :  { %v354_v33 = vadd.f32 %v5285_v23, %v226_v32  ;;  %v5299_v35 = vadd.f32 %v515_v31, %v353_v29 }
  0xd1   :  { %v5301_v37 = vpop.f32.mrf.mxu0  ;;  %v5305_v38 = vpop.f32.mrf.mxu1 }
  0xd2   :  { %v5303_v34 = vadd.f32 %v517_v36, %v354_v33 }
  0xd3   :  { %v232_v40 = vpop.f32.mrf.mxu0  ;;  %3942 = vmatmul.mubr.msk.bf16.gmra.mxu0 %vm144_vm1, %v5054_v39  ;;  %v523_v42 = vpop.f32.mrf.mxu1 }
  0xd4   :  { %v356_v41 = vadd.f32 %v5285_v23, %v232_v40  ;;  %1239 = vmatprep.mubr.bf16.mxu0 %v4875_v1 }
  0xd5   :  { %v234_v44 = vpop.f32.mrf.mxu0  ;;  %v525_v48 = vpop.f32.mrf.mxu1 }
  0xd6   :  { %v357_v45 = vadd.f32 %v5289_v24, %v234_v44  ;;  %v5312_v46 = vadd.f32 %v523_v42, %v356_v41 }
  0xd7   :  { %v236_v49 = vpop.f32.mrf.mxu0  ;;  %v527_v53 = vpop.f32.mrf.mxu1 }
  0xd8   :  { %v358_v50 = vadd.f32 %v5285_v23, %v236_v49  ;;  %v5315_v52 = vadd.f32 %v525_v48, %v357_v45 }
  0xd9   :  { %v5317_v54 = vpop.f32.mrf.mxu0  ;;  %v5321_v55 = vpop.f32.mrf.mxu1 }
  0xda   :  { %v5319_v39 = vadd.f32 %v527_v53, %v358_v50 }
  0xdb   :  { %v242_v56 = vpop.f32.mrf.mxu0  ;;  %3943 = vmatmul.mubr.msk.bf16.gmra.mxu0 %vm144_vm1, %v5070_v43  ;;  %v533_v62 = vpop.f32.mrf.mxu1 }
  0xdc   :  { %v360_v59 = vadd.f32 %v5285_v23, %v242_v56  ;;  %1249 = vmatprep.mubr.bf16.mxu0 %v4875_v1 }
  0xdd   :  { %v244_v0 = vpop.f32.mrf.mxu0  ;;  %v535_v5 = vpop.f32.mrf.mxu1 }
  0xde   :  { %v361_v3 = vadd.f32 %v5289_v24, %v244_v0  ;;  %v5328_v4 = vadd.f32 %v533_v62, %v360_v59 }
  0xdf   :  { %v246_v7 = vpop.f32.mrf.mxu0  ;;  %v537_v11 = vpop.f32.mrf.mxu1 }
  0xe0   :  { %v362_v8 = vadd.f32 %v5285_v23, %v246_v7  ;;  %v5331_v9 = vadd.f32 %v535_v5, %v361_v3 }
  0xe1   :  { %v5333_v12 = vpop.f32.mrf.mxu0  ;;  %v5337_v14 = vpop.f32.mrf.mxu1 }
  0xe2   :  { %6971 = vst [vmem:[#allocation3_spill] sm:$0xff] %v5333_v12  ;;  %v5335_v43 = vadd.f32 %v537_v11, %v362_v8  ;;  %6972 = vst [vmem:[#allocation4_spill] sm:$0xff] %v5337_v14 }
  0xe3   :  { %v252_v15 = vpop.f32.mrf.mxu0  ;;  %3944 = vmatmul.mubr.msk.bf16.gmra.mxu0 %vm144_vm1, %v5086_v47  ;;  %v543_v18 = vpop.f32.mrf.mxu1 }
  0xe4   :  { %v364_v16 = vadd.f32 %v5285_v23, %v252_v15  ;;  %1259 = vmatprep.mubr.bf16.mxu0 %v4875_v1 }
  0xe5   :  { %v254_v21 = vpop.f32.mrf.mxu0  ;;  %v545_v27 = vpop.f32.mrf.mxu1 }
  0xe6   :  { %v365_v25 = vadd.f32 %v5289_v24, %v254_v21  ;;  %v5344_v26 = vadd.f32 %v543_v18, %v364_v16 }
  0xe7   :  { %v256_v28 = vpop.f32.mrf.mxu0  ;;  %v547_v32 = vpop.f32.mrf.mxu1 }
  0xe8   :  { %v366_v29 = vadd.f32 %v5285_v23, %v256_v28  ;;  %v5347_v31 = vadd.f32 %v545_v27, %v365_v25 }
  0xe9   :  { %v5349_v33 = vpop.f32.mrf.mxu0  ;;  %v5353_v36 = vpop.f32.mrf.mxu1 }
  0xea   :  { %6973 = vst [vmem:[#allocation5_spill] sm:$0xff] %v5349_v33  ;;  %v5351_v47 = vadd.f32 %v547_v32, %v366_v29  ;;  %6974 = vst [vmem:[#allocation6_spill] sm:$0xff] %v5353_v36 }
  0xeb   :  { %v262_v40 = vpop.f32.mrf.mxu0  ;;  %3945 = vmatmul.mubr.msk.bf16.gmra.mxu0 %vm144_vm1, %v5102_v51  ;;  %v553_v42 = vpop.f32.mrf.mxu1 }
  0xec   :  { %v368_v41 = vadd.f32 %v5285_v23, %v262_v40  ;;  %1269 = vmatprep.mubr.bf16.mxu0 %v4875_v1 }
  0xed   :  { %v264_v44 = vpop.f32.mrf.mxu0  ;;  %v555_v49 = vpop.f32.mrf.mxu1 }
  0xee   :  { %v369_v45 = vadd.f32 %v5289_v24, %v264_v44  ;;  %v5360_v48 = vadd.f32 %v553_v42, %v368_v41 }
  0xef   :  { %v266_v50 = vpop.f32.mrf.mxu0  ;;  %v557_v59 = vpop.f32.mrf.mxu1 }
  0xf0   :  { %v370_v53 = vadd.f32 %v5285_v23, %v266_v50  ;;  %v5363_v56 = vadd.f32 %v555_v49, %v369_v45 }
  0xf1   :  { %v5365_v62 = vpop.f32.mrf.mxu0  ;;  %v5369_v0 = vpop.f32.mrf.mxu1 }
  0xf2   :  { %6975 = vst [vmem:[#allocation7_spill] sm:$0xff] %v5365_v62  ;;  %v5367_v51 = vadd.f32 %v557_v59, %v370_v53  ;;  %6976 = vst [vmem:[#allocation8_spill] sm:$0xff] %v5369_v0 }
  0xf3   :  { %v272_v3 = vpop.f32.mrf.mxu0  ;;  %3946 = vmatmul.mubr.msk.bf16.gmra.mxu0 %vm144_vm1, %v5129_v58  ;;  %v563_v7 = vpop.f32.mrf.mxu1 }
  0xf4   :  { %v372_v5 = vadd.f32 %v5285_v23, %v272_v3  ;;  %1279 = vmatprep.mubr.bf16.mxu0 %v4875_v1 }
  0xf5   :  { %v274_v8 = vpop.f32.mrf.mxu0  ;;  %v565_v16 = vpop.f32.mrf.mxu1 }
  0xf6   :  { %v373_v11 = vadd.f32 %v5289_v24, %v274_v8  ;;  %v5376_v15 = vadd.f32 %v563_v7, %v372_v5 }
  0xf7   :  { %v276_v18 = vpop.f32.mrf.mxu0  ;;  %v567_v27 = vpop.f32.mrf.mxu1 }
  0xf8   :  { %v374_v21 = vadd.f32 %v5285_v23, %v276_v18  ;;  %v5379_v25 = vadd.f32 %v565_v16, %v373_v11 }
  0xf9   :  { %v5381_v28 = vpop.f32.mrf.mxu0  ;;  %v5385_v29 = vpop.f32.mrf.mxu1 }
  0xfa   :  { %v5383_v58 = vadd.f32 %v567_v27, %v374_v21 }
  0xfb   :  { %v282_v32 = vpop.f32.mrf.mxu0  ;;  %3947 = vmatmul.mubr.msk.bf16.gmra.mxu0 %vm144_vm1, %v5157_v2  ;;  %v573_v41 = vpop.f32.mrf.mxu1 }
  0xfc   :  { %v376_v40 = vadd.f32 %v5285_v23, %v282_v32  ;;  %1289 = vmatprep.mubr.bf16.mxu0 %v4875_v1 }
  0xfd   :  { %v284_v42 = vpop.f32.mrf.mxu0  ;;  %v575_v49 = vpop.f32.mrf.mxu1 }
  0xfe   :  { %v377_v44 = vadd.f32 %v5289_v24, %v284_v42  ;;  %v5392_v45 = vadd.f32 %v573_v41, %v376_v40 }
  0xff   :  { %v286_v50 = vpop.f32.mrf.mxu0  ;;  %v577_v3 = vpop.f32.mrf.mxu1 }
 0x100   :  { %v378_v53 = vadd.f32 %v5285_v23, %v286_v50  ;;  %v5395_v59 = vadd.f32 %v575_v49, %v377_v44 }
 0x101   :  { %v5397_v5 = vpop.f32.mrf.mxu0  ;;  %v5401_v7 = vpop.f32.mrf.mxu1 }
 0x102   :  { %v5399_v2 = vadd.f32 %v577_v3, %v378_v53 }
 0x103   :  { %v292_v8 = vpop.f32.mrf.mxu0  ;;  %3948 = vmatmul.mubr.msk.bf16.gmra.mxu0 %vm144_vm1, %v5170_v6  ;;  %v583_v16 = vpop.f32.mrf.mxu1 }
 0x104   :  { %v380_v11 = vadd.f32 %v5285_v23, %v292_v8  ;;  %1299 = vmatprep.mubr.bf16.mxu0 %v4875_v1 }
 0x105   :  { %v294_v18 = vpop.f32.mrf.mxu0  ;;  %v585_v32 = vpop.f32.mrf.mxu1 }
 0x106   :  { %v381_v21 = vadd.f32 %v5289_v24, %v294_v18  ;;  %v5408_v27 = vadd.f32 %v583_v16, %v380_v11 }
 0x107   :  { %v296_v40 = vpop.f32.mrf.mxu0  ;;  %v587_v44 = vpop.f32.mrf.mxu1 }
 0x108   :  { %v382_v41 = vadd.f32 %v5285_v23, %v296_v40  ;;  %v5411_v42 = vadd.f32 %v585_v32, %v381_v21 }
 0x109   :  { %v5413_v49 = vpop.f32.mrf.mxu0  ;;  %v5417_v50 = vpop.f32.mrf.mxu1 }
 0x10a   :  { %v5415_v6 = vadd.f32 %v587_v44, %v382_v41 }
 0x10b   :  { %v302_v53 = vpop.f32.mrf.mxu0  ;;  %3949 = vmatmul.mubr.msk.bf16.gmra.mxu0 %vm144_vm1, %v5183_v10  ;;  %v593_v8 = vpop.f32.mrf.mxu1 }
 0x10c   :  { %v384_v3 = vadd.f32 %v5285_v23, %v302_v53  ;;  %1309 = vmatprep.mubr.bf16.mxu0 %v4875_v1 }
 0x10d   :  { %v304_v11 = vpop.f32.mrf.mxu0  ;;  %v595_v21 = vpop.f32.mrf.mxu1 }
 0x10e   :  { %v385_v16 = vadd.f32 %v5289_v24, %v304_v11  ;;  %v5424_v18 = vadd.f32 %v593_v8, %v384_v3 }
 0x10f   :  { %v306_v32 = vpop.f32.mrf.mxu0  ;;  %v597_v44 = vpop.f32.mrf.mxu1 }
 0x110   :  { %v386_v40 = vadd.f32 %v5285_v23, %v306_v32  ;;  %v5427_v41 = vadd.f32 %v595_v21, %v385_v16 }
 0x111   :  { %v5429_v17 = vpop.f32.mrf.mxu0  ;;  %v5433_v53 = vpop.f32.mrf.mxu1 }
 0x112   :  { %6977 = vst [vmem:[#allocation9_spill] sm:$0xff] %v5429_v17  ;;  %v5431_v10 = vadd.f32 %v597_v44, %v386_v40  ;;  %6978 = vst [vmem:[#allocation10_spill] sm:$0xff] %v5433_v53 }
 0x113   :  { %v312_v22 = vpop.f32.mrf.mxu0  ;;  %3950 = vmatmul.mubr.msk.bf16.gmra.mxu0 %vm144_vm1, %v5193_v13  ;;  %v603_v8 = vpop.f32.mrf.mxu1 }
 0x114   :  { %v388_v3 = vadd.f32 %v5285_v23, %v312_v22  ;;  %1319 = vmatprep.mubr.bf16.mxu0 %v4875_v1 }
 0x115   :  { %v314_v11 = vpop.f32.mrf.mxu0  ;;  %v605_v32 = vpop.f32.mrf.mxu1 }
 0x116   :  { %v389_v16 = vadd.f32 %v5289_v24, %v314_v11  ;;  %v5440_v21 = vadd.f32 %v603_v8, %v388_v3 }
 0x117   :  { %v316_v20 = vpop.f32.mrf.mxu0  ;;  %v607_v63 = vpop.f32.mrf.mxu1 }
 0x118   :  { %v390_v40 = vadd.f32 %v5285_v23, %v316_v20  ;;  %v5443_v44 = vadd.f32 %v605_v32, %v389_v16 }
 0x119   :  { %v5445_v19 = vpop.f32.mrf.mxu0  ;;  %v5449_v22 = vpop.f32.mrf.mxu1 }
 0x11a   :  { %6979 = vst [vmem:[#allocation11_spill] sm:$0xff] %v5445_v19  ;;  %v5447_v13 = vadd.f32 %v607_v63, %v390_v40  ;;  %6980 = vst [vmem:[#allocation12_spill] sm:$0xff] %v5449_v22 }
 0x11b   :  { %v322_v53 = vpop.f32.mrf.mxu0  ;;  %3951 = vmatmul.mubr.msk.bf16.gmra.mxu0 %vm144_vm1, %v5127_v57  ;;  %v613_v8 = vpop.f32.mrf.mxu1 }
 0x11c   :  { %v392_v3 = vadd.f32 %v5285_v23, %v322_v53  ;;  %1329 = vmatprep.mubr.bf16.mxu0 %v4875_v1  ;;  %v6983_v1 = vcombine.low %v5138_v60, %v5143_v61 }
 0x11d   :  { %v324_v11 = vpop.f32.mrf.mxu0  ;;  %v615_v32 = vpop.f32.mrf.mxu1 }
 0x11e   :  { %v393_v20 = vadd.f32 %v5289_v24, %v324_v11  ;;  %v5456_v16 = vadd.f32 %v613_v8, %v392_v3 }
 0x11f   :  { %v326_v19 = vpop.f32.mrf.mxu0  ;;  %v617_v22 = vpop.f32.mrf.mxu1 }
 0x120   :  { %v394_v63 = vadd.f32 %v5285_v23, %v326_v19  ;;  %v5459_v40 = vadd.f32 %v615_v32, %v393_v20 }
 0x121   :  { %v5461_v17 = vpop.f32.mrf.mxu0  ;;  %v5465_v53 = vpop.f32.mrf.mxu1 }
 0x122   :  { %6981 = vst [vmem:[#allocation13_spill] sm:$0xff] %v5461_v17  ;;  %v5463_v57 = vadd.f32 %v617_v22, %v394_v63  ;;  %6982 = vst [vmem:[#allocation14_spill] sm:$0xff] %v5465_v53 }
 0x123   :  { %v332_v0 = vpop.f32.mrf.mxu0  ;;  %3952 = vmatmul.mubr.msk.bf16.gmra.mxu0 %vm144_vm1, %v6983_v1  ;;  %v623_v8 = vpop.f32.mrf.mxu1 }
 0x124   :  { %v396_v3 = vadd.f32 %v5285_v23, %v332_v0 }
 0x125   :  { %v334_v11 = vpop.f32.mrf.mxu0  ;;  %v625_v32 = vpop.f32.mrf.mxu1 }
 0x126   :  { %v397_v19 = vadd.f32 %v5289_v24, %v334_v11  ;;  %v5473_v20 = vadd.f32 %v623_v8, %v396_v3 }
 0x127   :  { %v336_v17 = vpop.f32.mrf.mxu0  ;;  %v627_v53 = vpop.f32.mrf.mxu1 }
 0x128   :  { %v398_v22 = vadd.f32 %v5285_v23, %v336_v17  ;;  %v5476_v63 = vadd.f32 %v625_v32, %v397_v19 }
 0x129   :  { %v5478_v62 = vpop.f32.mrf.mxu0  ;;  %v5482_v61 = vpop.f32.mrf.mxu1 }
 0x12a   :  { %v5480_v60 = vadd.f32 %v627_v53, %v398_v22 }
 0x12b   :  { %v749_v0 = vpop.f32.mrf.mxu0  ;;  %v5487_v11 = vpop.f32.mrf.mxu1 }
 0x12c   :  { %v5485_v1 = vadd.f32 %v749_v0, %v5296_v30 }
 0x12d   :  { %v751_v3 = vpop.f32.mrf.mxu0  ;;  %v5492_v17 = vpop.f32.mrf.mxu1 }
 0x12e   :  { %v5490_v8 = vadd.f32 %v751_v3, %v5299_v35 }
 0x12f   :  { %v753_v23 = vpop.f32.mrf.mxu0  ;;  %v5499_v32 = vpop.f32.mrf.mxu1 }
 0x130   :  { %v5495_v19 = vadd.f32 %v753_v23, %v5303_v34 }
 0x131   :  { %v5497_v53 = vpop.f32.mrf.mxu0  ;;  %v5504_v0 = vpop.f32.mrf.mxu1 }
 0x133   :  { %v759_v22 = vpop.f32.mrf.mxu0  ;;  %v5512_v34 = vpop.f32.mrf.mxu1 }
 0x134   :  { %v5502_v30 = vadd.f32 %v759_v22, %v5312_v46 }
 0x135   :  { %v761_v36 = vpop.f32.mrf.mxu0  ;;  %v5519_v46 = vpop.f32.mrf.mxu1 }
 0x136   :  { %6984 = vst [vmem:[#allocation15_spill] sm:$0xff] %v5502_v30  ;;  %v5507_v35 = vadd.f32 %v761_v36, %v5315_v52 }
 0x137   :  { %v763_v3 = vpop.f32.mrf.mxu0 }
 0x138   :  { %6985 = vst [vmem:[#allocation16_spill] sm:$0xff] %v5507_v35  ;;  %v5510_v33 = vadd.f32 %v763_v3, %v5319_v39  ;;  %v5527_v39 = vpop.f32.mrf.mxu1 }
 0x139   :  { %v5514_v23 = vpop.f32.mrf.mxu0 }
 0x13a   :  { %6986 = vst [vmem:[#allocation17_spill] sm:$0xff] %v5510_v33 }
 0x13b   :  { %v769_v14 = vpop.f32.mrf.mxu0 }
 0x13c   :  { %v5517_v12 = vadd.f32 %v769_v14, %v5328_v4  ;;  %v5534_v4 = vpop.f32.mrf.mxu1 }
 0x13d   :  { %v771_v22 = vpop.f32.mrf.mxu0 }
 0x13e   :  { %6987 = vst [vmem:[#allocation18_spill] sm:$0xff] %v5517_v12  ;;  %v5522_v30 = vadd.f32 %v771_v22, %v5331_v9  ;;  %v4602_v9 = vld [vmem:[%s6958_s3 + $0x70] ss:$8 sps:$4 sm:$0xff]   ;;  %v4604_v22 = vld [vmem:[%s6958_s3 + $0x74] ss:$8 sps:$4 sm:$0xff]  }
 0x13f   :  { %v773_v52 = vpop.f32.mrf.mxu0  ;;  %1848 = vmatprep.subr.bf16.mxu1 %v4604_v22 }
 0x140   :  { %v5525_v36 = vadd.f32 %v773_v52, %v5335_v43  ;;  %1849 = vmatpush1.bf16.msra.mxu1 %v4602_v9 }
 0x141   :  { %v5529_v3 = vpop.f32.mrf.mxu0 }
 0x142   :  { %6988 = vst [vmem:[#allocation19_spill] sm:$0xff] %v5525_v36  ;;  %v4605_v36 = vld [vmem:[%s6958_s3 + $0x60] ss:$8 sps:$4 sm:$0xff]  }
 0x143   :  { %v779_v33 = vpop.f32.mrf.mxu0 }
 0x144   :  { %v5532_v35 = vadd.f32 %v779_v33, %v5344_v26  ;;  %v5548_v26 = vpop.f32.mrf.mxu1 }
 0x145   :  { %v781_v14 = vpop.f32.mrf.mxu0 }
 0x146   :  { %6989 = vst [vmem:[#allocation20_spill] sm:$0xff] %v5532_v35  ;;  %v5537_v12 = vadd.f32 %v781_v14, %v5347_v31 }
 0x147   :  { %v783_v43 = vpop.f32.mrf.mxu0 }
 0x148   :  { %6990 = vst [vmem:[#allocation21_spill] sm:$0xff] %v5537_v12  ;;  %v5546_v52 = vadd.f32 %v783_v43, %v5351_v47  ;;  %v5555_v12 = vpop.f32.mrf.mxu1  ;;  %v4607_v47 = vld [vmem:[%s6958_s3 + $0x64] ss:$8 sps:$4 sm:$0xff]  }
 0x149   :  { %v5550_v33 = vpop.f32.mrf.mxu0  ;;  %1850 = vmatprep.subr.bf16.mxu1 %v4607_v47 }
 0x14a   :  { %6991 = vst [vmem:[#allocation22_spill] sm:$0xff] %v5546_v52  ;;  %1851 = vmatpush1.bf16.msra.mxu1 %v4605_v36  ;;  %v4610_v52 = vld [vmem:[%s6958_s3 + $0x54] ss:$8 sps:$4 sm:$0xff]  }
 0x14b   :  { %v789_v31 = vpop.f32.mrf.mxu0  ;;  %1852 = vmatprep.subr.bf16.mxu1 %v4610_v52 }
 0x14c   :  { %v5553_v14 = vadd.f32 %v789_v31, %v5360_v48  ;;  %v5569_v48 = vpop.f32.mrf.mxu1 }
 0x14d   :  { %v791_v35 = vpop.f32.mrf.mxu0 }
 0x14e   :  { %6992 = vst [vmem:[#allocation23_spill] sm:$0xff] %v5553_v14  ;;  %v5564_v43 = vadd.f32 %v791_v35, %v5363_v56  ;;  %v4608_v14 = vld [vmem:[%s6958_s3 + $0x50] ss:$8 sps:$4 sm:$0xff]   ;;  %v375_v35 = vadd.f32 %v5289_v24, %v5381_v28  ;;  %v5584_v36 = vpop.f32.mrf.mxu1  ;;  %v4611_v28 = vld [vmem:[%s6958_s3 + $0x40] ss:$8 sps:$4 sm:$0xff]  }
 0x14f   :  { %v793_v22 = vpop.f32.mrf.mxu0  ;;  %1853 = vmatpush1.bf16.msra.mxu1 %v4608_v14 }
 0x150   :  { %6993 = vst [vmem:[#allocation24_spill] sm:$0xff] %v5564_v43  ;;  %v5567_v9 = vadd.f32 %v793_v22, %v5367_v51  ;;  %v655_v43 = vadd.f32 %v5385_v29, %v375_v35  ;;  %v5599_v52 = vpop.f32.mrf.mxu1 }
 0x151   :  { %v5571_v31 = vpop.f32.mrf.mxu0 }
 0x152   :  { %6994 = vst [vmem:[#allocation25_spill] sm:$0xff] %v5567_v9  ;;  %6995 = vst [vmem:[#allocation26_spill] sm:$0xff] %v5571_v31 }
 0x153   :  { %v799_v56 = vpop.f32.mrf.mxu0 }
 0x154   :  { %v5582_v51 = vadd.f32 %v799_v56, %v5376_v15  ;;  %v4613_v15 = vld [vmem:[%s6958_s3 + $0x44] ss:$8 sps:$4 sm:$0xff]  }
 0x155   :  { %v801_v47 = vpop.f32.mrf.mxu0  ;;  %1854 = vmatprep.subr.bf16.mxu1 %v4613_v15 }
 0x156   :  { %v5587_v22 = vadd.f32 %v801_v47, %v5379_v25  ;;  %1855 = vmatpush1.bf16.msra.mxu1 %v4611_v28  ;;  %v4614_v47 = vld [vmem:[%s6958_s3 + $0x30] ss:$8 sps:$4 sm:$0xff]  }
 0x157   :  { %v803_v9 = vpop.f32.mrf.mxu0 }
 0x158   :  { %v5591_v31 = vadd.f32 %v803_v9, %v5383_v58  ;;  %v379_v58 = vadd.f32 %v5289_v24, %v5397_v5  ;;  %v5608_v9 = vpop.f32.mrf.mxu1 }
 0x159   :  { %v805_v14 = vpop.f32.mrf.mxu0 }
 0x15a   :  { %6996 = vst [vmem:[#allocation27_spill] sm:$0xff] %v5591_v31  ;;  %v5601_v56 = vadd.f32 %v805_v14, %v655_v43  ;;  %v4616_v43 = vld [vmem:[%s6958_s3 + $0x34] ss:$8 sps:$4 sm:$0xff]   ;;  %v659_v5 = vadd.f32 %v5401_v7, %v379_v58  ;;  %v5623_v14 = vpop.f32.mrf.mxu1  ;;  %v383_v31 = vadd.f32 %v5289_v24, %v5413_v49  ;;  %v4619_v7 = vld [vmem:[%s6958_s3 + $0x24] ss:$8 sps:$4 sm:$0xff]  }
 0x15b   :  { %v809_v25 = vpop.f32.mrf.mxu0  ;;  %1856 = vmatprep.subr.bf16.mxu1 %v4616_v43 }
 0x15c   :  { %6997 = vst [vmem:[#allocation28_spill] sm:$0xff] %v5601_v56  ;;  %v5606_v29 = vadd.f32 %v809_v25, %v5392_v45  ;;  %1857 = vmatpush1.bf16.msra.mxu1 %v4614_v47  ;;  %v663_v49 = vadd.f32 %v5417_v50, %v383_v31  ;;  %v4620_v50 = vld [vmem:[%s6958_s3 + $0x10] ss:$8 sps:$4 sm:$0xff]  }
 0x15d   :  { %v811_v35 = vpop.f32.mrf.mxu0  ;;  %1858 = vmatprep.subr.bf16.mxu1 %v4619_v7 }
 0x15e   :  { %6998 = vst [vmem:[#allocation29_spill] sm:$0xff] %v5606_v29  ;;  %v5617_v15 = vadd.f32 %v811_v35, %v5395_v59  ;;  %v5632_v35 = vpop.f32.mrf.mxu1 }
 0x15f   :  { %v813_v28 = vpop.f32.mrf.mxu0 }
 0x160   :  { %v5621_v45 = vadd.f32 %v813_v28, %v5399_v2  ;;  %v4617_v2 = vld [vmem:[%s6958_s3 + $0x20] ss:$8 sps:$4 sm:$0xff]  }
 0x161   :  { %v815_v25 = vpop.f32.mrf.mxu0  ;;  %1859 = vmatpush1.bf16.msra.mxu1 %v4617_v2 }
 0x162   :  { %v5625_v29 = vadd.f32 %v815_v25, %v659_v5 }
 0x163   :  { %v819_v56 = vpop.f32.mrf.mxu0 }
 0x164   :  { %6999 = vst [vmem:[#allocation30_spill] sm:$0xff] %v5625_v29  ;;  %v5630_v59 = vadd.f32 %v819_v56, %v5408_v27  ;;  %v5647_v56 = vpop.f32.mrf.mxu1 }
 0x165   :  { %v821_v43 = vpop.f32.mrf.mxu0 }
 0x166   :  { %7000 = vst [vmem:[#allocation31_spill] sm:$0xff] %v5630_v59  ;;  %v5641_v58 = vadd.f32 %v821_v43, %v5411_v42  ;;  %v5654_v29 = vpop.f32.mrf.mxu1  ;;  %v4623_v43 = vld [vmem:[%s6958_s3] ss:$8 sps:$4 sm:$0xff]  }
 0x167   :  { %v823_v47 = vpop.f32.mrf.mxu0 }
 0x168   :  { %v5645_v27 = vadd.f32 %v823_v47, %v5415_v6  ;;  %v4622_v6 = vld [vmem:[%s6958_s3 + $0x14] ss:$8 sps:$4 sm:$0xff]   ;;  %v5674_v47 = vpop.f32.mrf.mxu1 }
 0x169   :  { %v825_v28 = vpop.f32.mrf.mxu0  ;;  %1860 = vmatprep.subr.bf16.mxu1 %v4622_v6  ;;  %v4629_v6 = vld [vmem:[%s6958_s3 + $0xe0] ss:$8 sps:$4 sm:$0xff]  }
 0x16a   :  { %v5649_v5 = vadd.f32 %v825_v28, %v663_v49  ;;  %1861 = vmatpush1.bf16.msra.mxu1 %v4620_v50  ;;  %v4628_v28 = vld [vmem:[%s6958_s3 + $0x254] ss:$8 sps:$4 sm:$0xff]  }
 0x16b   :  { %v829_v25 = vpop.f32.mrf.mxu0  ;;  %2447 = vmatprep.subr.bf16.mxu0 %v4628_v28 }
 0x16c   :  { %v5652_v59 = vadd.f32 %v829_v25, %v5424_v18  ;;  %v4625_v18 = vld [vmem:[%s6958_s3 + $0x4] ss:$8 sps:$4 sm:$0xff]  }
 0x16d   :  { %v831_v42 = vpop.f32.mrf.mxu0  ;;  %1862 = vmatprep.subr.bf16.mxu1 %v4625_v18  ;;  %v4631_v18 = vld [vmem:[%s6958_s3 + $0xe4] ss:$8 sps:$4 sm:$0xff]  }
 0x16e   :  { %v5663_v31 = vadd.f32 %v831_v42, %v5427_v41  ;;  %v4626_v41 = vld [vmem:[%s6958_s3 + $0x250] ss:$8 sps:$4 sm:$0xff]   ;;  %1863 = vmatpush1.bf16.msra.mxu1 %v4623_v43  ;;  %v4634_v43 = vld [vmem:[%s6958_s3 + $0x244] ss:$8 sps:$4 sm:$0xff]  }
 0x16f   :  { %v833_v2 = vpop.f32.mrf.mxu0  ;;  %2448 = vmatpush1.bf16.msra.mxu0 %v4626_v41  ;;  %v4637_v41 = vld [vmem:[%s6958_s3 + $0xd4] ss:$8 sps:$4 sm:$0xff]   ;;  %1866 = vmatprep.subr.bf16.mxu1 %v4631_v18  ;;  %v4638_v18 = vld [vmem:[%s6958_s3 + $0x230] ss:$8 sps:$4 sm:$0xff]  }
 0x170   :  { %7001 = vst [vmem:[#allocation32_spill] sm:$0xff] %v5663_v31  ;;  %v5672_v7 = vadd.f32 %v833_v2, %v5431_v10  ;;  %v5687_v10 = vpop.f32.mrf.mxu1  ;;  %v4632_v2 = vld [vmem:[%s6958_s3 + $0x240] ss:$8 sps:$4 sm:$0xff]   ;;  %2449 = vmatprep.subr.bf16.mxu0 %v4634_v43  ;;  %v4661_v31 = vld [vmem:[%s6958_s3 + $0xa4] ss:$8 sps:$4 sm:$0xff]  }
 0x171   :  { %v5676_v49 = vpop.f32.mrf.mxu0 }
 0x172   :  { %7002 = vst [vmem:[#allocation33_spill] sm:$0xff] %v5672_v7  ;;  %1867 = vmatpush2.bf16.msra.mxu1 %v4629_v6  ;;  %v4643_v6 = vld [vmem:[%s6958_s3 + $0x224] ss:$8 sps:$4 sm:$0xff]  }
 0x173   :  { %v839_v25 = vpop.f32.mrf.mxu0  ;;  %2450 = vmatpush1.bf16.msra.mxu0 %v4632_v2  ;;  %1868 = vmatprep.subr.bf16.mxu1 %v4637_v41  ;;  %v4644_v41 = vld [vmem:[%s6958_s3 + $0xc0] ss:$8 sps:$4 sm:$0xff]  }
 0x174   :  { %v5685_v42 = vadd.f32 %v839_v25, %v5440_v21  ;;  %v4640_v25 = vld [vmem:[%s6958_s3 + $0x234] ss:$8 sps:$4 sm:$0xff]  }
 0x175   :  { %v841_v50 = vpop.f32.mrf.mxu0  ;;  %2451 = vmatprep.subr.bf16.mxu0 %v4640_v25  ;;  %v4649_v25 = vld [vmem:[%s6958_s3 + $0x214] ss:$8 sps:$4 sm:$0xff]  }
 0x176   :  { %7003 = vst [vmem:[#allocation34_spill] sm:$0xff] %v5685_v42  ;;  %v5699_v21 = vadd.f32 %v841_v50, %v5443_v44  ;;  %v4635_v44 = vld [vmem:[%s6958_s3 + $0xd0] ss:$8 sps:$4 sm:$0xff]   ;;  %v5716_v50 = vpop.f32.mrf.mxu1 }
 0x177   :  { %v843_v28 = vpop.f32.mrf.mxu0  ;;  %1869 = vmatpush2.bf16.msra.mxu1 %v4635_v44  ;;  %2452 = vmatpush1.bf16.msra.mxu0 %v4638_v18  ;;  %v4653_v44 = vld [vmem:[%s6958_s3 + $0xb0] ss:$8 sps:$4 sm:$0xff]  }
 0x178   :  { %7004 = vst [vmem:[#allocation35_spill] sm:$0xff] %v5699_v21  ;;  %v5711_v42 = vadd.f32 %v843_v28, %v5447_v13  ;;  %v4646_v13 = vld [vmem:[%s6958_s3 + $0xc4] ss:$8 sps:$4 sm:$0xff]   ;;  %v4641_v28 = vld [vmem:[%s6958_s3 + $0x220] ss:$8 sps:$4 sm:$0xff]   ;;  %2453 = vmatprep.subr.bf16.mxu0 %v4643_v6 }
 0x179   :  { %v5718_v21 = vpop.f32.mrf.mxu0  ;;  %1870 = vmatprep.subr.bf16.mxu1 %v4646_v13  ;;  %v4659_v6 = vld [vmem:[%s6958_s3 + $0xa0] ss:$8 sps:$4 sm:$0xff]  }
 0x17a   :  { %7005 = vst [vmem:[#allocation36_spill] sm:$0xff] %v5711_v42  ;;  %7006 = vst [vmem:[#allocation37_spill] sm:$0xff] %v5718_v21  ;;  %v4655_v42 = vld [vmem:[%s6958_s3 + $0xb4] ss:$8 sps:$4 sm:$0xff]   ;;  %v5744_v21 = vpop.f32.mrf.mxu1 }
 0x17b   :  { %v849_v43 = vpop.f32.mrf.mxu0  ;;  %1871 = vmatpush2.bf16.msra.mxu1 %v4644_v41  ;;  %2454 = vmatpush1.bf16.msra.mxu0 %v4641_v28  ;;  %v399_v41 = vadd.f32 %v5289_v24, %v5478_v62  ;;  %v355_v28 = vadd.f32 %v5289_v24, %v5301_v37  ;;  %v4658_v62 = vld [vmem:[%s6958_s3 + $0x1f4] ss:$8 sps:$4 sm:$0xff]   ;;  %v4656_v37 = vld [vmem:[%s6958_s3 + $0x1f0] ss:$8 sps:$4 sm:$0xff]  }
 0x17c   :  { %v5733_v2 = vadd.f32 %v849_v43, %v5456_v16  ;;  %1872 = vmatprep.subr.bf16.mxu1 %v4655_v42  ;;  %2455 = vmatprep.subr.bf16.mxu0 %v4649_v25 }
 0x17d   :  { %v851_v7 = vpop.f32.mrf.mxu0 }
 0x17e   :  { %7007 = vst [vmem:[#allocation38_spill] sm:$0xff] %v5733_v2  ;;  %v5747_v16 = vadd.f32 %v851_v7, %v5459_v40  ;;  %v4647_v2 = vld [vmem:[%s6958_s3 + $0x210] ss:$8 sps:$4 sm:$0xff]   ;;  %v4652_v40 = vld [vmem:[%s6958_s3 + $0x204] ss:$8 sps:$4 sm:$0xff]   ;;  %v5764_v7 = vpop.f32.mrf.mxu1 }
 0x17f   :  { %v853_v43 = vpop.f32.mrf.mxu0  ;;  %1873 = vmatpush2.bf16.msra.mxu1 %v4653_v44  ;;  %2456 = vmatpush1.bf16.msra.mxu0 %v4647_v2 }
 0x180   :  { %7008 = vst [vmem:[#allocation39_spill] sm:$0xff] %v5747_v16  ;;  %v5759_v18 = vadd.f32 %v853_v43, %v5463_v57  ;;  %v4650_v57 = vld [vmem:[%s6958_s3 + $0x200] ss:$8 sps:$4 sm:$0xff]   ;;  %1874 = vmatprep.subr.bf16.mxu1 %v4661_v31  ;;  %2457 = vmatprep.subr.bf16.mxu0 %v4652_v40 }
 0x181   :  { %v5766_v13 = vpop.f32.mrf.mxu0 }
 0x182   :  { %7009 = vst [vmem:[#allocation40_spill] sm:$0xff] %v5759_v18  ;;  %7010 = vst [vmem:[#allocation41_spill] sm:$0xff] %v5766_v13  ;;  %v5779_v18 = vpop.f32.mrf.mxu1 }
 0x183   :  { %v859_v16 = vpop.f32.mrf.mxu0  ;;  %1875 = vmatpush2.bf16.msra.mxu1 %v4659_v6  ;;  %2458 = vmatpush1.bf16.msra.mxu0 %v4650_v57  ;;  %v4662_v57 = vld [vmem:[%s6958_s3 + $0x1e0] ss:$8 sps:$4 sm:$0xff]  }
 0x184   :  { %v5777_v43 = vadd.f32 %v859_v16, %v5473_v20  ;;  %v679_v20 = vadd.f32 %v5482_v61, %v399_v41  ;;  %v5793_v2 = vpop.f32.mrf.mxu1  ;;  %2459 = vmatprep.subr.bf16.mxu0 %v4658_v62  ;;  %v4664_v61 = vld [vmem:[%s6958_s3 + $0x1e4] ss:$8 sps:$4 sm:$0xff]   ;;  %v1104_v41 = vadd.f32 %v5487_v11, %v5485_v1 }
 0x185   :  { %v861_v42 = vpop.f32.mrf.mxu0 }
 0x186   :  { %v5784_v25 = vadd.f32 %v861_v42, %v5476_v63  ;;  %v635_v63 = vadd.f32 %v5305_v38, %v355_v28  ;;  %v359_v38 = vadd.f32 %v5289_v24, %v5317_v54  ;;  %v1105_v42 = vadd.f32 %v5492_v17, %v5490_v8  ;;  %v4667_v17 = vld [vmem:[%s6958_s3 + $0x2c4] ss:$8 sps:$4 sm:$0xff]  }
 0x187   :  { %v863_v13 = vpop.f32.mrf.mxu0  ;;  %2460 = vmatpush1.bf16.msra.mxu0 %v4656_v37 }
 0x188   :  { %v5791_v16 = vadd.f32 %v863_v13, %v5480_v60  ;;  %v871_v40 = vadd.f32 %v5497_v53, %v635_v63  ;;  %v5805_v13 = vpop.f32.mrf.mxu1  ;;  %v1106_v53 = vadd.f32 %v5499_v32, %v5495_v19  ;;  %2461 = vmatprep.subr.bf16.mxu0 %v4664_v61  ;;  %v639_v1 = vadd.f32 %v5321_v55, %v359_v38  ;;  %v4665_v32 = vld [vmem:[%s6958_s3 + $0x2c0] ss:$8 sps:$4 sm:$0xff]  }
 0x189   :  { %v865_v31 = vpop.f32.mrf.mxu0 }
 0x18a   :  { %v5799_v44 = vadd.f32 %v865_v31, %v679_v20  ;;  %v1107_v62 = vadd.f32 %v5504_v0, %v871_v40  ;;  %v5819_v63 = vpop.f32.mrf.mxu1  ;;  %v875_v0 = vadd.f32 %v5514_v23, %v639_v1 }
 0x18b   :  { %v1221_v60 = vpop.f32.mrf.mxu0  ;;  %2462 = vmatpush1.bf16.msra.mxu0 %v4662_v57  ;;  %v7011_v57 = vld [vmem:[#allocation3_spill] sm:$0xff] }
 0x18c   :  { %v1340_v20 = vadd.f32 %v1221_v60, %v1104_v41  ;;  %2465 = vmatprep.subr.bf16.mxu0 %v4667_v17  ;;  %v5833_v55 = vpop.f32.mrf.mxu1  ;;  %v363_v38 = vadd.f32 %v5289_v24, %v7011_v57  ;;  %v7012_v41 = vld [vmem:[#allocation15_spill] sm:$0xff] }
 0x18d   :  { %v1223_v6 = vpop.f32.mrf.mxu0 }
 0x18e   :  { %v1341_v31 = vadd.f32 %v1223_v6, %v1105_v42  ;;  %v1108_v42 = vadd.f32 %v5512_v34, %v7012_v41  ;;  %v1111_v34 = vadd.f32 %v5534_v4, %v875_v0  ;;  %v5858_v17 = vpop.f32.mrf.mxu1  ;;  %v4679_v4 = vld [vmem:[%s6958_s3 + $0x2a4] ss:$8 sps:$4 sm:$0xff]  }
 0x18f   :  { %v1225_v28 = vpop.f32.mrf.mxu0  ;;  %2466 = vmatpush2.bf16.msra.mxu0 %v4665_v32  ;;  %v4676_v0 = vld [vmem:[%s6958_s3 + $0x84] ss:$8 sps:$4 sm:$0xff]  }
 0x190   :  { %v1342_v37 = vadd.f32 %v1225_v28, %v1106_v53  ;;  %v1390_v61 = vsel %vm1389_vm2, %v1341_v31, -inf  ;;  %v7013_v53 = vld [vmem:[#allocation16_spill] sm:$0xff]  ;;  %v7014_v28 = vld [vmem:[#allocation17_spill] sm:$0xff] }
 0x191   :  { %v1227_v54 = vpop.f32.mrf.mxu0  ;;  %v1109_v23 = vadd.f32 %v5519_v46, %v7013_v53 }
 0x192   :  { %v5822_v11 = vmax.f32 %v1340_v20, %v1342_v37  ;;  %v1343_v8 = vadd.f32 %v1227_v54, %v1107_v62  ;;  %v1110_v62 = vadd.f32 %v5527_v39, %v7014_v28  ;;  %v4673_v20 = vld [vmem:[%s6958_s3 + $0x2b4] ss:$8 sps:$4 sm:$0xff]   ;;  %v4671_v54 = vld [vmem:[%s6958_s3 + $0x2b0] ss:$8 sps:$4 sm:$0xff]   ;;  %v4674_v28 = vld [vmem:[%s6958_s3 + $0x80] ss:$8 sps:$4 sm:$0xff]  }
 0x193   :  { %v1231_v19 = vpop.f32.mrf.mxu0  ;;  %v4670_v37 = vld [vmem:[%s6958_s3 + $0x94] ss:$8 sps:$4 sm:$0xff]   ;;  %v4668_v39 = vld [vmem:[%s6958_s3 + $0x90] ss:$8 sps:$4 sm:$0xff]   ;;  %2467 = vmatprep.subr.bf16.mxu0 %v4673_v20 }
 0x194   :  { %v1391_v60 = vsel %vm1389_vm2, %v1343_v8, -inf  ;;  %v1344_v1 = vadd.f32 %v1231_v19, %v1108_v42  ;;  %1876 = vmatprep.subr.bf16.mxu1 %v4670_v37  ;;  %2468 = vmatpush2.bf16.msra.mxu0 %v4671_v54 }
 0x195   :  { %v1233_v40 = vpop.f32.mrf.mxu0  ;;  %v5835_v6 = vmax.f32 %v1390_v61, %v1391_v60  ;;  %v7015_v61 = vld [vmem:[#allocation4_spill] sm:$0xff]  ;;  %1877 = vmatpush2.bf16.msra.mxu1 %v4668_v39  ;;  %2469 = vmatprep.subr.bf16.mxu0 %v4679_v4 }
 0x196   :  { %v1345_v46 = vadd.f32 %v1233_v40, %v1109_v23  ;;  %v643_v60 = vadd.f32 %v7015_v61, %v363_v38  ;;  %v4677_v40 = vld [vmem:[%s6958_s3 + $0x2a0] ss:$8 sps:$4 sm:$0xff]   ;;  %1878 = vmatprep.subr.bf16.mxu1 %v4676_v0 }
 0x197   :  { %v1235_v31 = vpop.f32.mrf.mxu0 }
 0x198   :  { %v1346_v8 = vadd.f32 %v1235_v31, %v1110_v62  ;;  %v879_v42 = vadd.f32 %v5529_v3, %v643_v60  ;;  %v1394_v38 = vsel %vm1389_vm2, %v1345_v46, -inf  ;;  %v7016_v62 = vld [vmem:[#allocation5_spill] sm:$0xff]  ;;  %v5882_v31 = vpop.f32.mrf.mxu1  ;;  %2470 = vmatpush2.bf16.msra.mxu0 %v4677_v40  ;;  %v1113_v46 = vadd.f32 %v5555_v12, %v5522_v30  ;;  %v4685_v12 = vld [vmem:[%s6958_s3 + $0x164] ss:$8 sps:$4 sm:$0xff]  }
 0x199   :  { %v1237_v32 = vpop.f32.mrf.mxu0  ;;  %v367_v20 = vadd.f32 %v5289_v24, %v7016_v62  ;;  %v4682_v3 = vld [vmem:[%s6958_s3 + $0x294] ss:$8 sps:$4 sm:$0xff]   ;;  %1879 = vmatpush2.bf16.msra.mxu1 %v4674_v28  ;;  %v7019_v40 = vld [vmem:[#allocation6_spill] sm:$0xff] }
 0x19a   :  { %v5861_v57 = vmax.f32 %v1344_v1, %v1346_v8  ;;  %v1347_v41 = vadd.f32 %v1237_v32, %v1111_v34  ;;  %v7017_v34 = vld [vmem:[#allocation18_spill] sm:$0xff]  ;;  %v7018_v8 = vld [vmem:[#allocation19_spill] sm:$0xff]  ;;  %v4680_v32 = vld [vmem:[%s6958_s3 + $0x290] ss:$8 sps:$4 sm:$0xff]   ;;  %2471 = vmatprep.subr.bf16.mxu0 %v4682_v3  ;;  %v1115_v30 = vadd.f32 %v5584_v36, %v879_v42  ;;  %v5905_v4 = vpop.f32.mrf.mxu1  ;;  %2174 = vmatprep.subr.bf16.mxu1 %v4685_v12 }
 0x19b   :  { %v1241_v19 = vpop.f32.mrf.mxu0  ;;  %v1112_v1 = vadd.f32 %v5548_v26, %v7017_v34  ;;  %v1114_v39 = vadd.f32 %v5569_v48, %v7018_v8  ;;  %v4688_v36 = vld [vmem:[%s6958_s3 + $0x284] ss:$8 sps:$4 sm:$0xff]   ;;  %v4686_v3 = vld [vmem:[%s6958_s3 + $0x280] ss:$8 sps:$4 sm:$0xff]   ;;  %v7021_v8 = vld [vmem:[#allocation20_spill] sm:$0xff] }
 0x19c   :  { %v1395_v53 = vsel %vm1389_vm2, %v1347_v41, -inf  ;;  %v4400_v23 = vpack.i.bf16 %v5861_v57, %v5822_v11  ;;  %2472 = vmatpush2.bf16.msra.mxu0 %v4680_v32  ;;  %v7022_v32 = vld [vmem:[#allocation21_spill] sm:$0xff] }
 0x19d   :  { %v1243_v37 = vpop.f32.mrf.mxu0  ;;  %v5884_v54 = vmax.f32 %v1394_v38, %v1395_v53  ;;  %v1348_v26 = vadd.f32 %v1241_v19, %v1112_v1  ;;  %v647_v38 = vadd.f32 %v7019_v40, %v367_v20  ;;  %v5920_v20 = vpop.f32.mrf.mxu1  ;;  %2473 = vmatprep.subr.bf16.mxu0 %v4688_v36 }
 0x19e   :  { %4401 = vrot.lane.b32.xlu1 %v4400_v23, %s4876_s30  ;;  %v1349_v48 = vadd.f32 %v1243_v37, %v1113_v46  ;;  %v7020_v46 = vld [vmem:[#allocation7_spill] sm:$0xff] }
 0x19f   :  { %v1245_v61 = vpop.f32.mrf.mxu0  ;;  %v4390_v60 = vpack.i.bf16 %v5884_v54, %v5835_v6  ;;  %v883_v19 = vadd.f32 %v5550_v33, %v647_v38  ;;  %v371_v33 = vadd.f32 %v5289_v24, %v7020_v46  ;;  %v5940_v40 = vpop.f32.mrf.mxu1 }
 0x1a0   :  { %v1350_v41 = vadd.f32 %v1245_v61, %v1114_v39  ;;  %v1398_v42 = vsel %vm1389_vm2, %v1349_v48, -inf  ;;  %v1116_v39 = vadd.f32 %v5599_v52, %v7021_v8  ;;  %v1117_v61 = vadd.f32 %v5608_v9, %v7022_v32  ;;  %2474 = vmatpush2.bf16.msra.mxu0 %v4686_v3  ;;  %v4692_v52 = vld [vmem:[%s6958_s3 + $0x270] ss:$8 sps:$4 sm:$0xff]   ;;  %v7026_v32 = vld [vmem:[#allocation23_spill] sm:$0xff] }
 0x1a1   :  { %4391 = vrot.lane.b32.xlu0 %v4390_v60, %s4876_s30  ;;  %v1247_v0 = vpop.f32.mrf.mxu0  ;;  %v7023_v60 = vld [vmem:[#allocation22_spill] sm:$0xff] }
 0x1a2   :  { %v5909_v53 = vmax.f32 %v1348_v26, %v1350_v41  ;;  %v1351_v28 = vadd.f32 %v1247_v0, %v1115_v30  ;;  %v1118_v12 = vadd.f32 %v5623_v14, %v7023_v60  ;;  %v1119_v26 = vadd.f32 %v5632_v35, %v883_v19  ;;  %v7024_v14 = vld [vmem:[#allocation8_spill] sm:$0xff]  ;;  %v4698_v35 = vld [vmem:[%s6958_s3 + $0x260] ss:$8 sps:$4 sm:$0xff]  }
 0x1a3   :  { %v1251_v62 = vpop.f32.mrf.mxu0  ;;  %v651_v38 = vadd.f32 %v7024_v14, %v371_v33  ;;  %v7025_v19 = vld [vmem:[#allocation26_spill] sm:$0xff]  ;;  %v5956_v33 = vpop.f32.mrf.mxu1  ;;  %v7027_v60 = vld [vmem:[#allocation24_spill] sm:$0xff] }
 0x1a4   :  { %v1399_v37 = vsel %vm1389_vm2, %v1351_v28, -inf  ;;  %v1352_v48 = vadd.f32 %v1251_v62, %v1116_v39  ;;  %v4700_v62 = vld [vmem:[%s6958_s3 + $0x264] ss:$8 sps:$4 sm:$0xff]  }
 0x1a5   :  { %v5922_v34 = vmax.f32 %v1398_v42, %v1399_v37  ;;  %4396 = vrot.lane.b32.xlu0 %v4400_v23, %s4877_s18  ;;  %v1253_v1 = vpop.f32.mrf.mxu0  ;;  %v4694_v23 = vld [vmem:[%s6958_s3 + $0x274] ss:$8 sps:$4 sm:$0xff]   ;;  %v887_v37 = vadd.f32 %v7025_v19, %v651_v38 }
 0x1a6   :  { %v1353_v41 = vadd.f32 %v1253_v1, %v1117_v61  ;;  %2475 = vmatprep.subr.bf16.mxu0 %v4694_v23  ;;  %v1120_v61 = vadd.f32 %v5647_v56, %v7026_v32 }
 0x1a7   :  { %v1255_v30 = vpop.f32.mrf.mxu0  ;;  %2476 = vmatpush2.bf16.msra.mxu0 %v4692_v52 }
 0x1a8   :  { %v1354_v0 = vadd.f32 %v1255_v30, %v1118_v12  ;;  %v1402_v3 = vsel %vm1389_vm2, %v1353_v41, -inf  ;;  %2477 = vmatprep.subr.bf16.mxu0 %v4700_v62  ;;  %v1121_v12 = vadd.f32 %v5654_v29, %v7027_v60  ;;  %v7028_v30 = vld [vmem:[#allocation25_spill] sm:$0xff]  ;;  %v5973_v29 = vpop.f32.mrf.mxu1 }
 0x1a9   :  { %v1257_v9 = vpop.f32.mrf.mxu0  ;;  %v1122_v23 = vadd.f32 %v5674_v47, %v7028_v30  ;;  %v4706_v41 = vld [vmem:[%s6958_s3 + $0x434] ss:$8 sps:$4 sm:$0xff]  }
 0x1aa   :  { %v5943_v28 = vmax.f32 %v1352_v48, %v1354_v0  ;;  %v1355_v36 = vadd.f32 %v1257_v9, %v1119_v26  ;;  %v1123_v0 = vadd.f32 %v5687_v10, %v887_v37  ;;  %v5980_v19 = vpop.f32.mrf.mxu1  ;;  %v1124_v37 = vadd.f32 %v5716_v50, %v5582_v51 }
 0x1ab   :  { %v1261_v42 = vpop.f32.mrf.mxu0  ;;  %2478 = vmatpush2.bf16.msra.mxu0 %v4698_v35 }
 0x1ac   :  { %v1403_v1 = vsel %vm1389_vm2, %v1355_v36, -inf  ;;  %v4405_v46 = vpack.i.bf16 %v5943_v28, %v5909_v53  ;;  %v1356_v56 = vadd.f32 %v1261_v42, %v1120_v61  ;;  %3000 = vmatprep.subr.bf16.mxu0 %v4706_v41  ;;  %v7030_v61 = vld [vmem:[#allocation28_spill] sm:$0xff] }
 0x1ad   :  { %v5958_v8 = vmax.f32 %v1402_v3, %v1403_v1  ;;  %v1263_v39 = vpop.f32.mrf.mxu0  ;;  %v1125_v3 = vadd.f32 %v5744_v21, %v5587_v22  ;;  %v7029_v1 = vld [vmem:[#allocation27_spill] sm:$0xff]  ;;  %v1127_v60 = vadd.f32 %v5779_v18, %v7030_v61 }
 0x1ae   :  { %4406 = vrot.lane.b32.xlu0 %v4405_v46, %s4877_s18  ;;  %v1357_v52 = vadd.f32 %v1263_v39, %v1121_v12  ;;  %v1126_v39 = vadd.f32 %v5764_v7, %v7029_v1 }
 0x1af   :  { %v1265_v26 = vpop.f32.mrf.mxu0  ;;  %v4410_v48 = vpack.i.bf16 %v5958_v8, %v5922_v34 }
 0x1b0   :  { %v1358_v9 = vadd.f32 %v1265_v26, %v1122_v23  ;;  %v1406_v35 = vsel %vm1389_vm2, %v1357_v52, -inf  ;;  %v5993_v26 = vpop.f32.mrf.mxu1 }
 0x1b1   :  { %4411 = vrot.lane.b32.xlu1 %v4410_v48, %s4876_s30  ;;  %v1267_v47 = vpop.f32.mrf.mxu0 }
 0x1b2   :  { %v5976_v14 = vmax.f32 %v1356_v56, %v1358_v9  ;;  %v1359_v38 = vadd.f32 %v1267_v47, %v1123_v0  ;;  %v6001_v7 = vpop.f32.mrf.mxu1  ;;  %v7031_v56 = vld [vmem:[#allocation29_spill] sm:$0xff]  ;;  %v1129_v9 = vadd.f32 %v5805_v13, %v5617_v15  ;;  %v1130_v47 = vadd.f32 %v5819_v63, %v5621_v45 }
 0x1b3   :  { %v1271_v36 = vpop.f32.mrf.mxu0  ;;  %v1128_v52 = vadd.f32 %v5793_v2, %v7031_v56 }
 0x1b4   :  { %v1407_v62 = vsel %vm1389_vm2, %v1359_v38, -inf  ;;  %v1360_v12 = vadd.f32 %v1271_v36, %v1124_v37  ;;  %v1079_v1 = vpop.f32.mrf.mxu1 }
 0x1b5   :  { %v5982_v10 = vmax.f32 %v1406_v35, %v1407_v62  ;;  %4416 = vrot.lane.b32.xlu1 %v4405_v46, %s4876_s30  ;;  %v1273_v42 = vpop.f32.mrf.mxu0  ;;  %v7032_v35 = vld [vmem:[#allocation30_spill] sm:$0xff] }
 0x1b6   :  { %v1361_v30 = vadd.f32 %v1273_v42, %v1125_v3  ;;  %v1131_v62 = vadd.f32 %v5833_v55, %v7032_v35 }
 0x1b7   :  { %v1275_v32 = vpop.f32.mrf.mxu0 }
 0x1b8   :  { %v1362_v23 = vadd.f32 %v1275_v32, %v1126_v39  ;;  %v1410_v50 = vsel %vm1389_vm2, %v1361_v30, -inf  ;;  %v1081_v32 = vpop.f32.mrf.mxu1  ;;  %v7034_v30 = vld [vmem:[#allocation31_spill] sm:$0xff] }
 0x1b9   :  { %v1277_v46 = vpop.f32.mrf.mxu0 }
 0x1ba   :  { %v5995_v48 = vmax.f32 %v1360_v12, %v1362_v23  ;;  %v1363_v41 = vadd.f32 %v1277_v46, %v1127_v60  ;;  %v7033_v60 = vld [vmem:[#allocation9_spill] sm:$0xff]  ;;  %v1132_v23 = vadd.f32 %v5858_v17, %v7034_v30  ;;  %v1133_v46 = vadd.f32 %v5882_v31, %v5641_v58  ;;  %v1085_v56 = vpop.f32.mrf.mxu1 }
 0x1bb   :  { %v1281_v51 = vpop.f32.mrf.mxu0  ;;  %v387_v12 = vadd.f32 %v5289_v24, %v7033_v60 }
 0x1bc   :  { %v1411_v22 = vsel %vm1389_vm2, %v1363_v41, -inf  ;;  %v4420_v21 = vpack.i.bf16 %v5995_v48, %v5976_v14  ;;  %v1364_v42 = vadd.f32 %v1281_v51, %v1128_v52  ;;  %v1134_v41 = vadd.f32 %v5905_v4, %v5645_v27  ;;  %v1087_v4 = vpop.f32.mrf.mxu1 }
 0x1bd   :  { %v6003_v18 = vmax.f32 %v1410_v50, %v1411_v22  ;;  %v1283_v0 = vpop.f32.mrf.mxu0  ;;  %v1135_v50 = vadd.f32 %v5920_v20, %v5649_v5 }
 0x1be   :  { %4421 = vrot.lane.b32.xlu1 %v4420_v21, %s4877_s18  ;;  %v1365_v37 = vadd.f32 %v1283_v0, %v1129_v9  ;;  %v7035_v9 = vld [vmem:[#allocation10_spill] sm:$0xff]  ;;  %v1089_v30 = vpop.f32.mrf.mxu1 }
 0x1bf   :  { %v1285_v38 = vpop.f32.mrf.mxu0  ;;  %v4425_v36 = vpack.i.bf16 %v6003_v18, %v5982_v10 }
 0x1c0   :  { %v1366_v3 = vadd.f32 %v1285_v38, %v1130_v47  ;;  %v1414_v63 = vsel %vm1389_vm2, %v1365_v37, -inf  ;;  %v667_v47 = vadd.f32 %v7035_v9, %v387_v12  ;;  %v1136_v37 = vadd.f32 %v5940_v40, %v5652_v59  ;;  %v7039_v40 = vld [vmem:[#allocation12_spill] sm:$0xff] }
 0x1c1   :  { %4426 = vrot.lane.b32.xlu0 %v4425_v36, %s4876_s30  ;;  %v1287_v2 = vpop.f32.mrf.mxu0 }
 0x1c2   :  { %v6017_v15 = vmax.f32 %v1364_v42, %v1366_v3  ;;  %v1367_v13 = vadd.f32 %v1287_v2, %v1131_v62  ;;  %v903_v58 = vadd.f32 %v5676_v49, %v667_v47  ;;  %v7036_v62 = vld [vmem:[#allocation11_spill] sm:$0xff]  ;;  %v7037_v3 = vld [vmem:[#allocation32_spill] sm:$0xff]  ;;  %v7038_v2 = vld [vmem:[#allocation33_spill] sm:$0xff] }
 0x1c3   :  { %v1291_v45 = vpop.f32.mrf.mxu0  ;;  %v391_v42 = vadd.f32 %v5289_v24, %v7036_v62  ;;  %v1137_v49 = vadd.f32 %v5956_v33, %v7037_v3  ;;  %v7042_v47 = vld [vmem:[#allocation34_spill] sm:$0xff] }
 0x1c4   :  { %v1415_v39 = vsel %vm1389_vm2, %v1367_v13, -inf  ;;  %v1368_v22 = vadd.f32 %v1291_v45, %v1132_v23  ;;  %v1138_v13 = vadd.f32 %v5973_v29, %v7038_v2 }
 0x1c5   :  { %v6021_v61 = vmax.f32 %v1414_v63, %v1415_v39  ;;  %4431 = vrot.lane.b32.xlu0 %v4420_v21, %s4876_s30  ;;  %v1293_v55 = vpop.f32.mrf.mxu0  ;;  %v1139_v39 = vadd.f32 %v5980_v19, %v903_v58  ;;  %v671_v33 = vadd.f32 %v7039_v40, %v391_v42  ;;  %v1091_v19 = vpop.f32.mrf.mxu1 }
 0x1c6   :  { %v1369_v0 = vadd.f32 %v1293_v55, %v1133_v46 }
 0x1c7   :  { %v1295_v51 = vpop.f32.mrf.mxu0 }
 0x1c8   :  { %v1370_v21 = vadd.f32 %v1295_v51, %v1134_v41  ;;  %v1418_v31 = vsel %vm1389_vm2, %v1369_v0, -inf  ;;  %v7040_v41 = vld [vmem:[#allocation37_spill] sm:$0xff] }
 0x1c9   :  { %v1297_v52 = vpop.f32.mrf.mxu0  ;;  %v907_v51 = vadd.f32 %v7040_v41, %v671_v33  ;;  %v7048_v33 = vld [vmem:[#allocation39_spill] sm:$0xff] }
 0x1ca   :  { %v6035_v38 = vmax.f32 %v1368_v22, %v1370_v21  ;;  %v1371_v17 = vadd.f32 %v1297_v52, %v1135_v50  ;;  %v7041_v52 = vld [vmem:[#allocation13_spill] sm:$0xff] }
 0x1cb   :  { %v1301_v36 = vpop.f32.mrf.mxu0  ;;  %v395_v9 = vadd.f32 %v5289_v24, %v7041_v52  ;;  %v1143_v62 = vadd.f32 %v1081_v32, %v907_v51 }
 0x1cc   :  { %v1419_v27 = vsel %vm1389_vm2, %v1371_v17, -inf  ;;  %v4435_v5 = vpack.i.bf16 %v6035_v38, %v6017_v15  ;;  %v1372_v55 = vadd.f32 %v1301_v36, %v1136_v37  ;;  %v1140_v17 = vadd.f32 %v5993_v26, %v7042_v47  ;;  %v7043_v36 = vld [vmem:[#allocation35_spill] sm:$0xff] }
 0x1cd   :  { %v6042_v20 = vmax.f32 %v1418_v31, %v1419_v27  ;;  %v1303_v35 = vpop.f32.mrf.mxu0  ;;  %v1141_v58 = vadd.f32 %v6001_v7, %v7043_v36  ;;  %v7044_v31 = vld [vmem:[#allocation36_spill] sm:$0xff] }
 0x1ce   :  { %4436 = vrot.lane.b32.xlu0 %v4435_v5, %s4877_s18  ;;  %v1373_v60 = vadd.f32 %v1303_v35, %v1137_v49  ;;  %v1142_v27 = vadd.f32 %v1079_v1, %v7044_v31  ;;  %v1095_v49 = vpop.f32.mrf.mxu1 }
 0x1cf   :  { %v1305_v45 = vpop.f32.mrf.mxu0  ;;  %v4440_v63 = vpack.i.bf16 %v6042_v20, %v6021_v61 }
 0x1d0   :  { %v1374_v12 = vadd.f32 %v1305_v45, %v1138_v13  ;;  %v1422_v50 = vsel %vm1389_vm2, %v1373_v60, -inf  ;;  %v1097_v32 = vpop.f32.mrf.mxu1 }
 0x1d1   :  { %4441 = vrot.lane.b32.xlu1 %v4440_v63, %s4876_s30  ;;  %v1307_v59 = vpop.f32.mrf.mxu0 }
 0x1d2   :  { %v6058_v23 = vmax.f32 %v1372_v55, %v1374_v12  ;;  %v1375_v29 = vadd.f32 %v1307_v59, %v1139_v39  ;;  %v7046_v39 = vld [vmem:[#allocation41_spill] sm:$0xff]  ;;  %v7047_v59 = vld [vmem:[#allocation38_spill] sm:$0xff]  ;;  %v1099_v47 = vpop.f32.mrf.mxu1 }
 0x1d3   :  { %v1311_v46 = vpop.f32.mrf.mxu0  ;;  %v1144_v40 = vadd.f32 %v1085_v56, %v7047_v59 }
 0x1d4   :  { %v1423_v22 = vsel %vm1389_vm2, %v1375_v29, -inf  ;;  %v1376_v42 = vadd.f32 %v1311_v46, %v1140_v17  ;;  %v1145_v29 = vadd.f32 %v1087_v4, %v7048_v33  ;;  %v7049_v46 = vld [vmem:[#allocation40_spill] sm:$0xff]  ;;  %v1101_v31 = vpop.f32.mrf.mxu1 }
 0x1d5   :  { %v6063_v0 = vmax.f32 %v1422_v50, %v1423_v22  ;;  %4446 = vrot.lane.b32.xlu1 %v4435_v5, %s4876_s30  ;;  %v1313_v21 = vpop.f32.mrf.mxu0  ;;  %v7045_v5 = vld [vmem:[#allocation14_spill] sm:$0xff]  ;;  %v1146_v41 = vadd.f32 %v1089_v30, %v7049_v46 }
 0x1d6   :  { %v1377_v37 = vadd.f32 %v1313_v21, %v1141_v58  ;;  %v675_v13 = vadd.f32 %v7045_v5, %v395_v9 }
 0x1d7   :  { %v1315_v35 = vpop.f32.mrf.mxu0 }
 0x1d8   :  { %v1378_v3 = vadd.f32 %v1315_v35, %v1142_v27  ;;  %v911_v26 = vadd.f32 %v7046_v39, %v675_v13  ;;  %v1426_v55 = vsel %vm1389_vm2, %v1377_v37, -inf  ;;  %v1148_v35 = vadd.f32 %v1095_v49, %v5777_v43 }
 0x1d9   :  { %v1317_v2 = vpop.f32.mrf.mxu0 }
 0x1da   :  { %v6074_v45 = vmax.f32 %v1376_v42, %v1378_v3  ;;  %v1379_v24 = vadd.f32 %v1317_v2, %v1143_v62  ;;  %v1147_v22 = vadd.f32 %v1091_v19, %v911_v26  ;;  %v1149_v62 = vadd.f32 %v1097_v32, %v5784_v25 }
 0x1db   :  { %v1321_v63 = vpop.f32.mrf.mxu0  ;;  %v1150_v42 = vadd.f32 %v1099_v47, %v5791_v16  ;;  %v1151_v3 = vadd.f32 %v1101_v31, %v5799_v44 }
 0x1dc   :  { %v1427_v7 = vsel %vm1389_vm2, %v1379_v24, -inf  ;;  %v4450_v1 = vpack.i.bf16 %v6074_v45, %v6058_v23  ;;  %v1380_v21 = vadd.f32 %v1321_v63, %v1144_v40 }
 0x1dd   :  { %v6081_v60 = vmax.f32 %v1426_v55, %v1427_v7  ;;  %v1323_v12 = vpop.f32.mrf.mxu0 }
 0x1de   :  { %4451 = vrot.lane.b32.xlu1 %v4450_v1, %s4877_s18  ;;  %v1381_v52 = vadd.f32 %v1323_v12, %v1145_v29 }
 0x1df   :  { %v1325_v51 = vpop.f32.mrf.mxu0  ;;  %v4455_v50 = vpack.i.bf16 %v6081_v60, %v6063_v0 }
 0x1e0   :  { %v1382_v9 = vadd.f32 %v1325_v51, %v1146_v41  ;;  %v1430_v30 = vsel %vm1389_vm2, %v1381_v52, -inf }
 0x1e1   :  { %4456 = vrot.lane.b32.xlu0 %v4455_v50, %s4876_s30  ;;  %v1327_v17 = vpop.f32.mrf.mxu0 }
 0x1e2   :  { %v6090_v36 = vmax.f32 %v1380_v21, %v1382_v9  ;;  %v1383_v56 = vadd.f32 %v1327_v17, %v1147_v22 }
 0x1e3   :  { %v1331_v4 = vpop.f32.mrf.mxu0 }
 0x1e4   :  { %v1431_v58 = vsel %vm1389_vm2, %v1383_v56, -inf  ;;  %v1384_v2 = vadd.f32 %v1331_v4, %v1148_v35 }
 0x1e5   :  { %v6094_v27 = vmax.f32 %v1430_v30, %v1431_v58  ;;  %4461 = vrot.lane.b32.xlu0 %v4450_v1, %s4876_s30  ;;  %v1333_v19 = vpop.f32.mrf.mxu0  ;;  %v4691_v30 = vld [vmem:[%s6958_s3 + $0x154] ss:$8 sps:$4 sm:$0xff]  }
 0x1e6   :  { %v1385_v5 = vadd.f32 %v1333_v19, %v1149_v62 }
 0x1e7   :  { %v1335_v37 = vpop.f32.mrf.mxu0 }
 0x1e8   :  { %v1386_v13 = vadd.f32 %v1335_v37, %v1150_v42  ;;  %v1434_v26 = vsel %vm1389_vm2, %v1385_v5, -inf  ;;  %v4697_v42 = vld [vmem:[%s6958_s3 + $0x144] ss:$8 sps:$4 sm:$0xff]  }
 0x1e9   :  { %v1337_v24 = vpop.f32.mrf.mxu0 }
 0x1ea   :  { %v6101_v63 = vmax.f32 %v1384_v2, %v1386_v13  ;;  %v1387_v39 = vadd.f32 %v1337_v24, %v1151_v3  ;;  %v4695_v24 = vld [vmem:[%s6958_s3 + $0x140] ss:$8 sps:$4 sm:$0xff]  }
 0x1ec   :  { %v1435_v55 = vsel %vm1389_vm2, %v1387_v39, -inf  ;;  %v4465_v43 = vpack.i.bf16 %v6101_v63, %v6090_v36 }
 0x1ed   :  { %v6107_v25 = vmax.f32 %v1434_v26, %v1435_v55  ;;  %v4703_v55 = vld [vmem:[%s6958_s3 + $0x134] ss:$8 sps:$4 sm:$0xff]  }
 0x1ee   :  { %4466 = vrot.lane.b32.xlu0 %v4465_v43, %s4877_s18 }
 0x1ef   :  { %v4470_v16 = vpack.i.bf16 %v6107_v25, %v6094_v27 }
 0x1f1   :  { %4471 = vrot.lane.b32.xlu1 %v4470_v16, %s4876_s30 }
 0x1f5   :  { %4476 = vrot.lane.b32.xlu1 %v4465_v43, %s4876_s30 }
 0x210   :  { %v4402_v44 = vpop.permute.xlu1 %4401 }
 0x211   :  { %v4404_v7 = vunpack.i.h.bf16 %v4402_v44  ;;  %v4403_v1 = vunpack.i.l.bf16 %v4402_v44 }
 0x213   :  { %v4392_v49 = vpop.permute.xlu0 %4391 }
 0x214   :  { %v4394_v32 = vunpack.i.h.bf16 %v4392_v49  ;;  %v4393_v12 = vunpack.i.l.bf16 %v4392_v49  ;;  %v4701_v49 = vld [vmem:[%s6958_s3 + $0x130] ss:$8 sps:$4 sm:$0xff]  }
 0x216   :  { %v1511_v59 = vsel %vm1509_vm3, %v4404_v7, %v4394_v32  ;;  %v1510_v40 = vsel %vm1509_vm3, %v4403_v1, %v4393_v12 }
 0x217   :  { %v4397_v33 = vpop.permute.xlu0 %4396  ;;  %v1597_v29 = vmax.f32 %v5861_v57, %v1511_v59  ;;  %v1595_v46 = vmax.f32 %v5822_v11, %v1510_v40  ;;  %v4683_v11 = vld [vmem:[%s6958_s3 + $0x160] ss:$8 sps:$4 sm:$0xff]   ;;  %v4704_v40 = vld [vmem:[%s6958_s3 + $0x430] ss:$8 sps:$4 sm:$0xff]  }
 0x218   :  { %v4399_v41 = vunpack.i.h.bf16 %v4397_v33  ;;  %v4398_v51 = vunpack.i.l.bf16 %v4397_v33  ;;  %v4712_v33 = vld [vmem:[%s6958_s3 + $0x424] ss:$8 sps:$4 sm:$0xff]  }
 0x219   :  { %v1621_v9 = vmax.f32 %v1597_v29, 0.0  ;;  %v1619_v47 = vmax.f32 %v1595_v46, 0.0  ;;  %v4715_v29 = vld [vmem:[%s6958_s3 + $0x114] ss:$8 sps:$4 sm:$0xff]  }
 0x21a   :  { %v1583_v50 = vsel %vm1582_vm4, %v4393_v12, %v4398_v51  ;;  %v1584_v22 = vsel %vm1582_vm4, %v4394_v32, %v4399_v41  ;;  %v4709_v32 = vld [vmem:[%s6958_s3 + $0x124] ss:$8 sps:$4 sm:$0xff]   ;;  %v4710_v41 = vld [vmem:[%s6958_s3 + $0x420] ss:$8 sps:$4 sm:$0xff]  }
 0x21b   :  { %v1596_v21 = vmax.f32 %v5835_v6, %v1583_v50  ;;  %v1598_v52 = vmax.f32 %v5884_v54, %v1584_v22  ;;  %v6127_v57 = vpack.c.bf16 %v1621_v9, %v1619_v47  ;;  %v4689_v54 = vld [vmem:[%s6958_s3 + $0x150] ss:$8 sps:$4 sm:$0xff]   ;;  %v4718_v22 = vld [vmem:[%s6958_s3 + $0x414] ss:$8 sps:$4 sm:$0xff]  }
 0x21c   :  { %v4713_v50 = vld [vmem:[%s6958_s3 + $0x110] ss:$8 sps:$4 sm:$0xff]  }
 0x21d   :  { %v1620_v17 = vmax.f32 %v1596_v21, 0.0  ;;  %v1622_v56 = vmax.f32 %v1598_v52, 0.0 }
 0x21f   :  { %v6122_v4 = vpack.c.bf16 %v1622_v56, %v1620_v17  ;;  %v4721_v17 = vld [vmem:[%s6958_s3 + $0x104] ss:$8 sps:$4 sm:$0xff]  }
 0x220   :  { %v4407_v58 = vpop.permute.xlu0 %4406 }
 0x221   :  { %3983 = vmatprep.mubr.msk.bf16.mxu1 %vm1389_vm2, %v6122_v4  ;;  %v4409_v31 = vunpack.i.h.bf16 %v4407_v58  ;;  %v4408_v19 = vunpack.i.l.bf16 %v4407_v58 }
 0x222   :  { %1881 = vmatmul.mubr.bf16.vlgmr.msra.gmra.mxu1 %v6127_v57 }
 0x223   :  { %2175 = vmatpush1.bf16.msra.mxu1 %v4683_v11  ;;  %v4412_v6 = vpop.permute.xlu1 %4411 }
 0x224   :  { %v4414_v35 = vunpack.i.h.bf16 %v4412_v6  ;;  %v4413_v62 = vunpack.i.l.bf16 %v4412_v6  ;;  %2176 = vmatprep.subr.bf16.mxu1 %v4691_v30  ;;  %v4716_v30 = vld [vmem:[%s6958_s3 + $0x410] ss:$8 sps:$4 sm:$0xff]  }
 0x226   :  { %v1586_v37 = vsel %vm1582_vm4, %v4414_v35, %v4409_v31  ;;  %v1585_v3 = vsel %vm1582_vm4, %v4413_v62, %v4408_v19  ;;  %v4719_v31 = vld [vmem:[%s6958_s3 + $0x100] ss:$8 sps:$4 sm:$0xff]   ;;  %v4724_v19 = vld [vmem:[%s6958_s3 + $0x404] ss:$8 sps:$4 sm:$0xff]  }
 0x227   :  { %v1602_v2 = vmax.f32 %v5958_v8, %v1586_v37  ;;  %v1600_v5 = vmax.f32 %v5922_v34, %v1585_v3  ;;  %2177 = vmatpush1.bf16.msra.mxu1 %v4689_v54  ;;  %v4417_v13 = vpop.permute.xlu1 %4416 }
 0x228   :  { %v4419_v39 = vunpack.i.h.bf16 %v4417_v13  ;;  %v4418_v26 = vunpack.i.l.bf16 %v4417_v13  ;;  %2178 = vmatprep.subr.bf16.mxu1 %v4697_v42 }
 0x229   :  { %v1626_v43 = vmax.f32 %v1602_v2, 0.0  ;;  %v1624_v16 = vmax.f32 %v1600_v5, 0.0  ;;  %v4722_v2 = vld [vmem:[%s6958_s3 + $0x400] ss:$8 sps:$4 sm:$0xff]  }
 0x22a   :  { %v1512_v44 = vsel %vm1509_vm3, %v4418_v26, %v4413_v62  ;;  %v1513_v8 = vsel %vm1509_vm3, %v4419_v39, %v4414_v35  ;;  %v4725_v39 = vld [vmem:[%s6958_s3 + $0xf0] ss:$8 sps:$4 sm:$0xff]   ;;  %v4730_v26 = vld [vmem:[%s6958_s3 + $0x3f4] ss:$8 sps:$4 sm:$0xff]  }
 0x22b   :  { %2179 = vmatpush1.bf16.msra.mxu1 %v4695_v24  ;;  %v6153_v34 = vpack.c.bf16 %v1626_v43, %v1624_v16  ;;  %v1599_v7 = vmax.f32 %v5909_v53, %v1512_v44  ;;  %v1601_v1 = vmax.f32 %v5943_v28, %v1513_v8  ;;  %v4707_v28 = vld [vmem:[%s6958_s3 + $0x120] ss:$8 sps:$4 sm:$0xff]   ;;  %v4731_v44 = vld [vmem:[%s6958_s3 + $0x1d0] ss:$8 sps:$4 sm:$0xff]   ;;  %v4736_v8 = vld [vmem:[%s6958_s3 + $0x3e4] ss:$8 sps:$4 sm:$0xff]  }
 0x22c   :  { %2180 = vmatprep.subr.bf16.mxu1 %v4703_v55  ;;  %v4733_v55 = vld [vmem:[%s6958_s3 + $0x1d4] ss:$8 sps:$4 sm:$0xff]  }
 0x22d   :  { %3984 = vmatprep.mubr.msk.bf16.mxu1 %vm1389_vm2, %v6153_v34  ;;  %4111 = vmatprep.mubr.msk.bf16.mxu0 %vm1389_vm2, %v6153_v34  ;;  %v1623_v12 = vmax.f32 %v1599_v7, 0.0  ;;  %v1625_v59 = vmax.f32 %v1601_v1, 0.0  ;;  %v4734_v1 = vld [vmem:[%s6958_s3 + $0x3e0] ss:$8 sps:$4 sm:$0xff]  }
 0x22f   :  { %2181 = vmatpush1.bf16.msra.mxu1 %v4701_v49  ;;  %v6170_v53 = vpack.c.bf16 %v1625_v59, %v1623_v12  ;;  %v4739_v49 = vld [vmem:[%s6958_s3 + $0x1c4] ss:$8 sps:$4 sm:$0xff]   ;;  %v4737_v12 = vld [vmem:[%s6958_s3 + $0x1c0] ss:$8 sps:$4 sm:$0xff]   ;;  %v4742_v59 = vld [vmem:[%s6958_s3 + $0x3d4] ss:$8 sps:$4 sm:$0xff]  }
 0x230   :  { %2182 = vmatprep.subr.bf16.mxu1 %v4709_v32  ;;  %v4422_v46 = vpop.permute.xlu1 %4421 }
 0x231   :  { %1891 = vmatmul.mubr.bf16.gmra.mxu1 %v6170_v53  ;;  %2480 = vmatmul.mubr.bf16.vlgmr.msra.gmra.mxu0 %v6170_v53  ;;  %v4424_v21 = vunpack.i.h.bf16 %v4422_v46  ;;  %v4423_v52 = vunpack.i.l.bf16 %v4422_v46  ;;  %v4745_v46 = vld [vmem:[%s6958_s3 + $0x1b4] ss:$8 sps:$4 sm:$0xff]  }
 0x232   :  { %3001 = vmatpush1.bf16.msra.mxu0 %v4704_v40 }
 0x233   :  { %2183 = vmatpush1.bf16.msra.mxu1 %v4707_v28  ;;  %v4427_v51 = vpop.permute.xlu0 %4426  ;;  %3002 = vmatprep.subr.bf16.mxu0 %v4712_v33 }
 0x234   :  { %v4429_v9 = vunpack.i.h.bf16 %v4427_v51  ;;  %v4428_v47 = vunpack.i.l.bf16 %v4427_v51  ;;  %2184 = vmatprep.subr.bf16.mxu1 %v4715_v29 }
 0x236   :  { %v1588_v56 = vsel %vm1582_vm4, %v4429_v9, %v4424_v21  ;;  %v1587_v11 = vsel %vm1582_vm4, %v4428_v47, %v4423_v52  ;;  %3003 = vmatpush1.bf16.msra.mxu0 %v4710_v41 }
 0x237   :  { %v1606_v58 = vmax.f32 %v6003_v18, %v1588_v56  ;;  %v1604_v6 = vmax.f32 %v5982_v10, %v1587_v11  ;;  %2185 = vmatpush1.bf16.msra.mxu1 %v4713_v50  ;;  %v4432_v54 = vpop.permute.xlu0 %4431  ;;  %3004 = vmatprep.subr.bf16.mxu0 %v4718_v22  ;;  %v4727_v18 = vld [vmem:[%s6958_s3 + $0xf4] ss:$8 sps:$4 sm:$0xff]   ;;  %v4740_v50 = vld [vmem:[%s6958_s3 + $0x3d0] ss:$8 sps:$4 sm:$0xff]  }
 0x238   :  { %v4434_v35 = vunpack.i.h.bf16 %v4432_v54  ;;  %v4433_v62 = vunpack.i.l.bf16 %v4432_v54  ;;  %2186 = vmatprep.subr.bf16.mxu1 %v4721_v17 }
 0x239   :  { %v1630_v42 = vmax.f32 %v1606_v58, 0.0  ;;  %v1628_v10 = vmax.f32 %v1604_v6, 0.0  ;;  %v4746_v6 = vld [vmem:[%s6958_s3 + $0x3c0] ss:$8 sps:$4 sm:$0xff]  }
 0x23a   :  { %v1514_v37 = vsel %vm1509_vm3, %v4433_v62, %v4428_v47  ;;  %v1515_v3 = vsel %vm1509_vm3, %v4434_v35, %v4429_v9  ;;  %3005 = vmatpush1.bf16.msra.mxu0 %v4716_v30  ;;  %v4743_v9 = vld [vmem:[%s6958_s3 + $0x1b0] ss:$8 sps:$4 sm:$0xff]   ;;  %v4748_v47 = vld [vmem:[%s6958_s3 + $0x3c4] ss:$8 sps:$4 sm:$0xff]   ;;  %v4749_v35 = vld [vmem:[%s6958_s3 + $0x1a0] ss:$8 sps:$4 sm:$0xff]  }
 0x23b   :  { %v1603_v5 = vmax.f32 %v5976_v14, %v1514_v37  ;;  %v1605_v13 = vmax.f32 %v5995_v48, %v1515_v3  ;;  %2187 = vmatpush1.bf16.msra.mxu1 %v4719_v31  ;;  %3006 = vmatprep.subr.bf16.mxu0 %v4724_v19  ;;  %v6218_v24 = vpack.c.bf16 %v1630_v42, %v1628_v10  ;;  %v4728_v48 = vld [vmem:[%s6958_s3 + $0x3f0] ss:$8 sps:$4 sm:$0xff]   ;;  %v4754_v62 = vld [vmem:[%s6958_s3 + $0x4a4] ss:$8 sps:$4 sm:$0xff]   ;;  %v4752_v10 = vld [vmem:[%s6958_s3 + $0x4a0] ss:$8 sps:$4 sm:$0xff]  }
 0x23c   :  { %2188 = vmatprep.subr.bf16.mxu1 %v4727_v18  ;;  %v4757_v18 = vld [vmem:[%s6958_s3 + $0x194] ss:$8 sps:$4 sm:$0xff]   ;;  %v4755_v3 = vld [vmem:[%s6958_s3 + $0x190] ss:$8 sps:$4 sm:$0xff]  }
 0x23d   :  { %v1627_v14 = vmax.f32 %v1603_v5, 0.0  ;;  %v1629_v43 = vmax.f32 %v1605_v13, 0.0  ;;  %3985 = vmatprep.mubr.msk.bf16.mxu1 %vm1389_vm2, %v6218_v24  ;;  %4112 = vmatprep.mubr.msk.bf16.mxu0 %vm1389_vm2, %v6218_v24  ;;  %v4760_v5 = vld [vmem:[%s6958_s3 + $0x494] ss:$8 sps:$4 sm:$0xff]   ;;  %v4763_v13 = vld [vmem:[%s6958_s3 + $0x184] ss:$8 sps:$4 sm:$0xff]  }
 0x23e   :  { %3007 = vmatpush1.bf16.msra.mxu0 %v4722_v2  ;;  %v1993_v2 = vrot.slane %v6122_v4, 4  ;;  %v4758_v4 = vld [vmem:[%s6958_s3 + $0x490] ss:$8 sps:$4 sm:$0xff]  }
 0x23f   :  { %2189 = vmatpush1.bf16.msra.mxu1 %v4725_v39  ;;  %3008 = vmatprep.subr.bf16.mxu0 %v4730_v26  ;;  %v6236_v16 = vpack.c.bf16 %v1629_v43, %v1627_v14  ;;  %v4761_v14 = vld [vmem:[%s6958_s3 + $0x180] ss:$8 sps:$4 sm:$0xff]   ;;  %v4766_v43 = vld [vmem:[%s6958_s3 + $0x484] ss:$8 sps:$4 sm:$0xff]  }
 0x240   :  { %2192 = vmatprep.subr.bf16.mxu1 %v4733_v55  ;;  %v4437_v7 = vpop.permute.xlu0 %4436 }
 0x241   :  { %1901 = vmatmul.mubr.bf16.gmra.mxu1 %v6236_v16  ;;  %2490 = vmatmul.mubr.bf16.gmra.mxu0 %v6236_v16  ;;  %v4439_v40 = vunpack.i.h.bf16 %v4437_v7  ;;  %v4438_v28 = vunpack.i.l.bf16 %v4437_v7  ;;  %v4769_v7 = vld [vmem:[%s6958_s3 + $0x174] ss:$8 sps:$4 sm:$0xff]  }
 0x242   :  { %3009 = vmatpush1.bf16.msra.mxu0 %v4728_v48 }
 0x243   :  { %2193 = vmatpush2.bf16.msra.mxu1 %v4731_v44  ;;  %v4442_v32 = vpop.permute.xlu1 %4441  ;;  %3010 = vmatprep.subr.bf16.mxu0 %v4736_v8 }
 0x244   :  { %v4444_v33 = vunpack.i.h.bf16 %v4442_v32  ;;  %v4443_v29 = vunpack.i.l.bf16 %v4442_v32  ;;  %2194 = vmatprep.subr.bf16.mxu1 %v4739_v49 }
 0x246   :  { %v1590_v41 = vsel %vm1582_vm4, %v4444_v33, %v4439_v40  ;;  %v1589_v51 = vsel %vm1582_vm4, %v4443_v29, %v4438_v28  ;;  %3011 = vmatpush1.bf16.msra.mxu0 %v4734_v1 }
 0x247   :  { %v1610_v22 = vmax.f32 %v6042_v20, %v1590_v41  ;;  %v1608_v21 = vmax.f32 %v6021_v61, %v1589_v51  ;;  %2195 = vmatpush2.bf16.msra.mxu1 %v4737_v12  ;;  %v4447_v52 = vpop.permute.xlu1 %4446  ;;  %3012 = vmatprep.subr.bf16.mxu0 %v4742_v59  ;;  %v4751_v20 = vld [vmem:[%s6958_s3 + $0x1a4] ss:$8 sps:$4 sm:$0xff]   ;;  %v4764_v12 = vld [vmem:[%s6958_s3 + $0x480] ss:$8 sps:$4 sm:$0xff]  }
 0x248   :  { %v4449_v17 = vunpack.i.h.bf16 %v4447_v52  ;;  %v4448_v56 = vunpack.i.l.bf16 %v4447_v52  ;;  %2196 = vmatprep.subr.bf16.mxu1 %v4745_v46  ;;  %v4770_v52 = vld [vmem:[%s6958_s3 + $0x470] ss:$8 sps:$4 sm:$0xff]  }
 0x249   :  { %v1634_v11 = vmax.f32 %v1610_v22, 0.0  ;;  %v1632_v61 = vmax.f32 %v1608_v21, 0.0 }
 0x24a   :  { %v1516_v30 = vsel %vm1509_vm3, %v4448_v56, %v4443_v29  ;;  %v1517_v58 = vsel %vm1509_vm3, %v4449_v17, %v4444_v33  ;;  %3013 = vmatpush1.bf16.msra.mxu0 %v4740_v50  ;;  %v4767_v33 = vld [vmem:[%s6958_s3 + $0x170] ss:$8 sps:$4 sm:$0xff]   ;;  %v4772_v29 = vld [vmem:[%s6958_s3 + $0x474] ss:$8 sps:$4 sm:$0xff]  }
 0x24b   :  { %v1607_v54 = vmax.f32 %v6017_v15, %v1516_v30  ;;  %v1609_v31 = vmax.f32 %v6035_v38, %v1517_v58  ;;  %2197 = vmatpush2.bf16.msra.mxu1 %v4743_v9  ;;  %3014 = vmatprep.subr.bf16.mxu0 %v4748_v47  ;;  %v6284_v19 = vpack.c.bf16 %v1634_v11, %v1632_v61  ;;  %v1994_v38 = vrot.slane %v6153_v34, 4  ;;  %v4778_v11 = vld [vmem:[%s6958_s3 + $0x464] ss:$8 sps:$4 sm:$0xff]   ;;  %v4776_v58 = vld [vmem:[%s6958_s3 + $0x460] ss:$8 sps:$4 sm:$0xff]  }
 0x24c   :  { %2198 = vmatprep.subr.bf16.mxu1 %v4751_v20  ;;  %v1998_v9 = vrot.slane %v6218_v24, 4  ;;  %v1990_v47 = vrot.slane %v6127_v57, 4  ;;  %v4773_v20 = vld [vmem:[%s6958_s3 + $0x340] ss:$8 sps:$4 sm:$0xff]   ;;  %v4781_v57 = vld [vmem:[%s6958_s3 + $0x334] ss:$8 sps:$4 sm:$0xff]  }
 0x24d   :  { %v1631_v15 = vmax.f32 %v1607_v54, 0.0  ;;  %v1633_v42 = vmax.f32 %v1609_v31, 0.0  ;;  %3986 = vmatprep.mubr.msk.bf16.mxu1 %vm1389_vm2, %v6284_v19  ;;  %4113 = vmatprep.mubr.msk.bf16.mxu0 %vm1389_vm2, %v6284_v19  ;;  %v1995_v26 = vsel %vm1989_vm5, %v1993_v2, %v1994_v38  ;;  %v4779_v54 = vld [vmem:[%s6958_s3 + $0x330] ss:$8 sps:$4 sm:$0xff]   ;;  %v4784_v34 = vld [vmem:[%s6958_s3 + $0x454] ss:$8 sps:$4 sm:$0xff]  }
 0x24e   :  { %3015 = vmatpush1.bf16.msra.mxu0 %v4746_v6  ;;  %v6376_v30 = vsel %vm1989_vm5, %v1994_v38, %v1998_v9  ;;  %v4787_v31 = vld [vmem:[%s6958_s3 + $0x324] ss:$8 sps:$4 sm:$0xff]   ;;  %v4791_v2 = vld [vmem:[%s6958_s3 + $0x310] ss:$8 sps:$4 sm:$0xff]  }
 0x24f   :  { %2199 = vmatpush2.bf16.msra.mxu1 %v4749_v35  ;;  %3018 = vmatprep.subr.bf16.mxu0 %v4754_v62  ;;  %v6303_v37 = vpack.c.bf16 %v1633_v42, %v1631_v15  ;;  %v1996_v35 = vrot.slane %v6236_v16, 4  ;;  %v4782_v62 = vld [vmem:[%s6958_s3 + $0x450] ss:$8 sps:$4 sm:$0xff]   ;;  %v4785_v15 = vld [vmem:[%s6958_s3 + $0x320] ss:$8 sps:$4 sm:$0xff]  }
 0x250   :  { %2200 = vmatprep.subr.bf16.mxu1 %v4757_v18  ;;  %v4452_v39 = vpop.permute.xlu1 %4451  ;;  %v2002_v18 = vrot.slane %v6284_v19, 4  ;;  %v4790_v42 = vld [vmem:[%s6958_s3 + $0x444] ss:$8 sps:$4 sm:$0xff]  }
 0x251   :  { %1911 = vmatmul.mubr.bf16.gmra.mxu1 %v6303_v37  ;;  %2500 = vmatmul.mubr.bf16.gmra.mxu0 %v6303_v37  ;;  %v4454_v48 = vunpack.i.h.bf16 %v4452_v39  ;;  %v4453_v44 = vunpack.i.l.bf16 %v4452_v39 }
 0x252   :  { %3019 = vmatpush2.bf16.msra.mxu0 %v4752_v10  ;;  %4047 = vmatprep.mubr.msk.bf16.mxu1 %vm1389_vm2, %v1995_v26  ;;  %v6416_v10 = vsel %vm1989_vm5, %v1998_v9, %v2002_v18 }
 0x253   :  { %2201 = vmatpush2.bf16.msra.mxu1 %v4755_v3  ;;  %v4457_v55 = vpop.permute.xlu0 %4456  ;;  %3020 = vmatprep.subr.bf16.mxu0 %v4760_v5  ;;  %v4788_v3 = vld [vmem:[%s6958_s3 + $0x440] ss:$8 sps:$4 sm:$0xff]   ;;  %v4796_v5 = vld [vmem:[%s6958_s3 + $0x304] ss:$8 sps:$4 sm:$0xff]  }
 0x254   :  { %v4459_v8 = vunpack.i.h.bf16 %v4457_v55  ;;  %v4458_v49 = vunpack.i.l.bf16 %v4457_v55  ;;  %2202 = vmatprep.subr.bf16.mxu1 %v4763_v13  ;;  %v2000_v13 = vrot.slane %v6303_v37, 4 }
 0x256   :  { %v1592_v1 = vsel %vm1582_vm4, %v4459_v8, %v4454_v48  ;;  %v1591_v32 = vsel %vm1582_vm4, %v4458_v49, %v4453_v44  ;;  %3021 = vmatpush2.bf16.msra.mxu0 %v4758_v4  ;;  %v4794_v4 = vld [vmem:[%s6958_s3 + $0x300] ss:$8 sps:$4 sm:$0xff]   ;;  %v6439_v44 = vsel %vm1989_vm5, %v1996_v35, %v2000_v13 }
 0x257   :  { %v1614_v59 = vmax.f32 %v6081_v60, %v1592_v1  ;;  %v1612_v40 = vmax.f32 %v6063_v0, %v1591_v32  ;;  %2203 = vmatpush2.bf16.msra.mxu1 %v4761_v14  ;;  %v4462_v28 = vpop.permute.xlu0 %4461  ;;  %3022 = vmatprep.subr.bf16.mxu0 %v4766_v43  ;;  %v4775_v60 = vld [vmem:[%s6958_s3 + $0x344] ss:$8 sps:$4 sm:$0xff]   ;;  %v1991_v0 = vrot.slane %v6170_v53, 4  ;;  %v4799_v14 = vld [vmem:[%s6958_s3 + $0x2f4] ss:$8 sps:$4 sm:$0xff]  }
 0x258   :  { %v4464_v46 = vunpack.i.h.bf16 %v4462_v28  ;;  %v4463_v41 = vunpack.i.l.bf16 %v4462_v28  ;;  %2204 = vmatprep.subr.bf16.mxu1 %v4769_v7 }
 0x259   :  { %v1638_v51 = vmax.f32 %v1614_v59, 0.0  ;;  %v1636_v50 = vmax.f32 %v1612_v40, 0.0  ;;  %v6412_v38 = vsel %vm1989_vm5, %v1991_v0, %v1996_v35  ;;  %v4800_v40 = vld [vmem:[%s6958_s3 + $0x2e0] ss:$8 sps:$4 sm:$0xff]  }
 0x25a   :  { %v1518_v22 = vsel %vm1509_vm3, %v4463_v41, %v4458_v49  ;;  %v1519_v21 = vsel %vm1509_vm3, %v4464_v46, %v4459_v8  ;;  %3023 = vmatpush2.bf16.msra.mxu0 %v4764_v12  ;;  %v4805_v41 = vld [vmem:[%s6958_s3 + $0x2d4] ss:$8 sps:$4 sm:$0xff]  }
 0x25b   :  { %v1611_v17 = vmax.f32 %v6058_v23, %v1518_v22  ;;  %v1613_v56 = vmax.f32 %v6074_v45, %v1519_v21  ;;  %2205 = vmatpush2.bf16.msra.mxu1 %v4767_v33  ;;  %3024 = vmatprep.subr.bf16.mxu0 %v4772_v29  ;;  %v6359_v53 = vpack.c.bf16 %v1638_v51, %v1636_v50  ;;  %v4808_v50 = vld [vmem:[%s6958_s3 + $0x3b4] ss:$8 sps:$4 sm:$0xff]  }
 0x25c   :  { %2727 = vmatprep.subr.bf16.mxu1 %v4775_v60  ;;  %v1992_v45 = vsel %vm1989_vm5, %v1990_v47, %v1991_v0  ;;  %v4811_v47 = vld [vmem:[%s6958_s3 + $0x3a4] ss:$8 sps:$4 sm:$0xff]  }
 0x25d   :  { %v1635_v23 = vmax.f32 %v1611_v17, 0.0  ;;  %v1637_v61 = vmax.f32 %v1613_v56, 0.0  ;;  %4114 = vmatprep.mubr.msk.bf16.mxu0 %vm1389_vm2, %v6359_v53  ;;  %v2006_v26 = vrot.slane %v6359_v53, 4 }
 0x25e   :  { %2207 = vmatmul.mubr.bf16.vlgmr.msra.gmra.mxu1 %v1992_v45  ;;  %3025 = vmatpush2.bf16.msra.mxu0 %v4770_v52  ;;  %v4806_v52 = vld [vmem:[%s6958_s3 + $0x3b0] ss:$8 sps:$4 sm:$0xff]  }
 0x25f   :  { %4048 = vmatprep.mubr.msk.bf16.mxu1 %vm1389_vm2, %v6376_v30  ;;  %2728 = vmatpush1.bf16.msra.mxu1 %v4773_v20  ;;  %v6383_v6 = vpack.c.bf16 %v1637_v61, %v1635_v23  ;;  %v6447_v8 = vsel %vm1989_vm5, %v2002_v18, %v2006_v26  ;;  %v4815_v23 = vld [vmem:[%s6958_s3 + $0x380] ss:$8 sps:$4 sm:$0xff]   ;;  %v4820_v61 = vld [vmem:[%s6958_s3 + $0x374] ss:$8 sps:$4 sm:$0xff]   ;;  %v4818_v45 = vld [vmem:[%s6958_s3 + $0x370] ss:$8 sps:$4 sm:$0xff]  }
 0x260   :  { %3026 = vmatprep.subr.bf16.mxu0 %v4778_v11  ;;  %2729 = vmatprep.subr.bf16.mxu1 %v4781_v57  ;;  %v4467_v55 = vpop.permute.xlu0 %4466  ;;  %v4812_v11 = vld [vmem:[%s6958_s3 + $0x390] ss:$8 sps:$4 sm:$0xff]   ;;  %v4817_v57 = vld [vmem:[%s6958_s3 + $0x384] ss:$8 sps:$4 sm:$0xff]  }
 0x261   :  { %2510 = vmatmul.mubr.bf16.gmra.mxu0 %v6383_v6  ;;  %v4469_v49 = vunpack.i.h.bf16 %v4467_v55  ;;  %v4468_v7 = vunpack.i.l.bf16 %v4467_v55  ;;  %v2004_v59 = vrot.slane %v6383_v6, 4 }
 0x262   :  { %3027 = vmatpush2.bf16.msra.mxu0 %v4776_v58  ;;  %4239 = vmatprep.mubr.msk.bf16.mxu0 %vm1389_vm2, %v6218_v24  ;;  %v4793_v24 = vld [vmem:[%s6958_s3 + $0x314] ss:$8 sps:$4 sm:$0xff]   ;;  %v4821_v58 = vld [vmem:[%s6958_s3 + $0x360] ss:$8 sps:$4 sm:$0xff]  }
 0x263   :  { %2730 = vmatpush1.bf16.msra.mxu1 %v4779_v54  ;;  %3028 = vmatprep.subr.bf16.mxu0 %v4784_v34  ;;  %v4472_v39 = vpop.permute.xlu1 %4471  ;;  %v2005_v60 = vsel %vm1989_vm5, %v2000_v13, %v2004_v59  ;;  %v4826_v54 = vld [vmem:[%s6958_s3 + $0x354] ss:$8 sps:$4 sm:$0xff]   ;;  %v4824_v34 = vld [vmem:[%s6958_s3 + $0x350] ss:$8 sps:$4 sm:$0xff]  }
 0x264   :  { %2731 = vmatprep.subr.bf16.mxu1 %v4787_v31  ;;  %v4474_v43 = vunpack.i.h.bf16 %v4472_v39  ;;  %v4473_v48 = vunpack.i.l.bf16 %v4472_v39 }
 0x266   :  { %2217 = vmatmul.mubr.bf16.gmra.mxu1 %v6412_v38  ;;  %3029 = vmatpush2.bf16.msra.mxu0 %v4782_v62  ;;  %v1594_v1 = vsel %vm1582_vm4, %v4474_v43, %v4469_v49  ;;  %v1593_v32 = vsel %vm1582_vm4, %v4473_v48, %v4468_v7 }
 0x267   :  { %4049 = vmatprep.mubr.msk.bf16.mxu1 %vm1389_vm2, %v6416_v10  ;;  %2732 = vmatpush1.bf16.msra.mxu1 %v4785_v15  ;;  %v4477_v12 = vpop.permute.xlu1 %4476  ;;  %v1618_v28 = vmax.f32 %v6107_v25, %v1594_v1  ;;  %v1616_v33 = vmax.f32 %v6094_v27, %v1593_v32  ;;  %v4803_v27 = vld [vmem:[%s6958_s3 + $0x2d0] ss:$8 sps:$4 sm:$0xff]  }
 0x268   :  { %3030 = vmatprep.subr.bf16.mxu0 %v4790_v42  ;;  %2733 = vmatprep.subr.bf16.mxu1 %v4793_v24  ;;  %v4479_v29 = vunpack.i.h.bf16 %v4477_v12  ;;  %v4478_v46 = vunpack.i.l.bf16 %v4477_v12 }
 0x269   :  { %v1642_v25 = vmax.f32 %v1618_v28, 0.0  ;;  %v1640_v0 = vmax.f32 %v1616_v33, 0.0 }
 0x26a   :  { %3031 = vmatpush2.bf16.msra.mxu0 %v4788_v3  ;;  %v1521_v51 = vsel %vm1509_vm3, %v4479_v29, %v4474_v43 }
 0x26b   :  { %2734 = vmatpush1.bf16.msra.mxu1 %v4791_v2  ;;  %v1617_v21 = vmax.f32 %v6101_v63, %v1521_v51  ;;  %v1654_v9 = vpack.c.bf16 %v1642_v25, %v1640_v0  ;;  %v4814_v63 = vld [vmem:[%s6958_s3 + $0x394] ss:$8 sps:$4 sm:$0xff]  }
 0x26c   :  { %2735 = vmatprep.subr.bf16.mxu1 %v4796_v5 }
 0x26d   :  { %3033 = vmatmul.mubr.bf16.vlgmr.msra.gmra.mxu0 %v6236_v16  ;;  %v4797_v16 = vld [vmem:[%s6958_s3 + $0x2f0] ss:$8 sps:$4 sm:$0xff]   ;;  %v1641_v56 = vmax.f32 %v1617_v21, 0.0  ;;  %v2571_v31 = vrot.slane %v1654_v9, 4 }
 0x26e   :  { %2227 = vmatmul.mubr.bf16.gmra.mxu1 %v6439_v44  ;;  %4240 = vmatprep.mubr.msk.bf16.mxu0 %vm1389_vm2, %v6284_v19  ;;  %v4802_v19 = vld [vmem:[%s6958_s3 + $0x2e4] ss:$8 sps:$4 sm:$0xff]  }
 0x26f   :  { %4050 = vmatprep.mubr.msk.bf16.mxu1 %vm1389_vm2, %v6447_v8  ;;  %2736 = vmatpush1.bf16.msra.mxu1 %v4794_v4  ;;  %v2572_v35 = vsel %vm1989_vm5, %v2006_v26, %v2571_v31 }
 0x270   :  { %2737 = vmatprep.subr.bf16.mxu1 %v4799_v14 }
 0x273   :  { %2738 = vmatpush1.bf16.msra.mxu1 %v4797_v16  ;;  %v7051_v16 = vld [vmem:[#allocation2_spill] sm:$0xff] }
 0x274   :  { %2739 = vmatprep.subr.bf16.mxu1 %v4802_v19  ;;  %v7052_v19 = vsub.s32 0, %v7051_v16 }
 0x275   :  { %3043 = vmatmul.mubr.bf16.gmra.mxu0 %v6303_v37  ;;  %v1520_v37 = vsel %vm1509_vm3, %v4478_v46, %v4473_v48 }
 0x276   :  { %2237 = vmatmul.mubr.bf16.gmra.mxu1 %v2005_v60  ;;  %4241 = vmatprep.mubr.msk.bf16.mxu0 %vm1389_vm2, %v6359_v53  ;;  %v1615_v22 = vmax.f32 %v6090_v36, %v1520_v37  ;;  %v4809_v36 = vld [vmem:[%s6958_s3 + $0x3a0] ss:$8 sps:$4 sm:$0xff]  }
 0x277   :  { %2740 = vmatpush1.bf16.msra.mxu1 %v4800_v40  ;;  %4175 = vmatprep.mubr.msk.bf16.mxu1 %vm1389_vm2, %v6376_v30  ;;  %v4823_v30 = vld [vmem:[%s6958_s3 + $0x364] ss:$8 sps:$4 sm:$0xff]  }
 0x278   :  { %2741 = vmatprep.subr.bf16.mxu1 %v4805_v41  ;;  %v1639_v17 = vmax.f32 %v1615_v22, 0.0 }
 0x27a   :  { %v1653_v20 = vpack.c.bf16 %v1641_v56, %v1639_v17 }
 0x27b   :  { %2742 = vmatpush1.bf16.msra.mxu1 %v4803_v27 }
 0x27c   :  { %2745 = vmatprep.subr.bf16.mxu1 %v4808_v50  ;;  %v2569_v62 = vrot.slane %v1653_v20, 4 }
 0x27d   :  { %3053 = vmatmul.mubr.bf16.gmra.mxu0 %v6383_v6 }
 0x27e   :  { %4242 = vmatprep.mubr.msk.bf16.mxu0 %vm1389_vm2, %v1654_v9  ;;  %v2570_v18 = vsel %vm1989_vm5, %v2004_v59, %v2569_v62 }
 0x27f   :  { %2746 = vmatpush2.bf16.msra.mxu1 %v4806_v52 }
 0x280   :  { %2747 = vmatprep.subr.bf16.mxu1 %v4811_v47 }
 0x283   :  { %2748 = vmatpush2.bf16.msra.mxu1 %v4809_v36 }
 0x284   :  { %2749 = vmatprep.subr.bf16.mxu1 %v4814_v63 }
 0x285   :  { %3063 = vmatmul.mubr.bf16.gmra.mxu0 %v1653_v20 }
 0x287   :  { %2750 = vmatpush2.bf16.msra.mxu1 %v4812_v11 }
 0x288   :  { %2751 = vmatprep.subr.bf16.mxu1 %v4817_v57 }
 0x28b   :  { %2752 = vmatpush2.bf16.msra.mxu1 %v4815_v23 }
 0x28c   :  { %2753 = vmatprep.subr.bf16.mxu1 %v4820_v61 }
 0x28f   :  { %2754 = vmatpush2.bf16.msra.mxu1 %v4818_v45 }
 0x290   :  { %2755 = vmatprep.subr.bf16.mxu1 %v4823_v30 }
 0x293   :  { %2756 = vmatpush2.bf16.msra.mxu1 %v4821_v58 }
 0x294   :  { %2757 = vmatprep.subr.bf16.mxu1 %v4826_v54 }
 0x297   :  { %2758 = vmatpush2.bf16.msra.mxu1 %v4824_v34 }
 0x29a   :  { %2760 = vmatmul.mubr.bf16.vlgmr.msra.gmra.mxu1 %v6412_v38 }
 0x29b   :  { %4176 = vmatprep.mubr.msk.bf16.mxu1 %vm1389_vm2, %v6416_v10 }
 0x2a2   :  { %2770 = vmatmul.mubr.bf16.gmra.mxu1 %v6439_v44 }
 0x2a3   :  { %4177 = vmatprep.mubr.msk.bf16.mxu1 %vm1389_vm2, %v6447_v8  ;;  %v1655_v8 = vld [vmem:[%s6959_s4] sm:$0x3]  ;;  %s4878_s4 = smov 108  }
 0x2a4   :  { %v6575_v1 = vrot.slane %v1655_v8, %v7052_v19 }
 0x2aa   :  { %2780 = vmatmul.mubr.bf16.gmra.mxu1 %v2005_v60 }
 0x2ab   :  { %4178 = vmatprep.mubr.msk.bf16.mxu1 %vm1389_vm2, %v2572_v35 }
 0x2b2   :  { %2790 = vmatmul.mubr.bf16.gmra.mxu1 %v2570_v18 }
 0x2e2   :  { %v1882_v15 = vpop.f32.mrf.mxu1 }
 0x2e3   :  { %v1932_v59 = vadd.f32 %v6575_v1, %v1882_v15  ;;  %v7059_v15 = vsub.s32 1, %v7051_v16 }
 0x2e4   :  { %v6540_v42 = vpop.f32.mrf.mxu1 }
 0x2e6   :  { %v6542_v24 = vpop.f32.mrf.mxu1 }
 0x2e8   :  { %v6544_v38 = vpop.f32.mrf.mxu1 }
 0x2f1   :  { %v1892_v10 = vpop.f32.mrf.mxu1  ;;  %v2481_v13 = vpop.f32.mrf.mxu0 }
 0x2f2   :  { %v1936_v19 = vadd.f32 %v6575_v1, %v1892_v10 }
 0x2f3   :  { %v1894_v3 = vpop.f32.mrf.mxu1  ;;  %v6554_v39 = vpop.f32.mrf.mxu0 }
 0x2f5   :  { %v6546_v53 = vpop.f32.mrf.mxu1  ;;  %v6558_v4 = vpop.f32.mrf.mxu0 }
 0x2f6   :  { %7050 = vst [vmem:[#allocation3_spill] sm:$0xff] %v6558_v4 }
 0x2f7   :  { %v6548_v2 = vpop.f32.mrf.mxu1  ;;  %v6564_v43 = vpop.f32.mrf.mxu0 }
 0x301   :  { %v6550_v5 = vpop.f32.mrf.mxu1  ;;  %v2491_v48 = vpop.f32.mrf.mxu0 }
 0x303   :  { %v6552_v6 = vpop.f32.mrf.mxu1  ;;  %v2493_v49 = vpop.f32.mrf.mxu0 }
 0x305   :  { %v6556_v26 = vpop.f32.mrf.mxu1  ;;  %v2495_v32 = vpop.f32.mrf.mxu0 }
 0x307   :  { %v6560_v55 = vpop.f32.mrf.mxu1  ;;  %v6580_v33 = vpop.f32.mrf.mxu0 }
 0x311   :  { %v6562_v14 = vpop.f32.mrf.mxu1  ;;  %v6586_v41 = vpop.f32.mrf.mxu0 }
 0x313   :  { %v6566_v44 = vpop.f32.mrf.mxu1  ;;  %v6590_v27 = vpop.f32.mrf.mxu0 }
 0x315   :  { %v6571_v7 = vpop.f32.mrf.mxu1  ;;  %v6594_v0 = vpop.f32.mrf.mxu0 }
 0x317   :  { %v6577_v12 = vpop.f32.mrf.mxu1  ;;  %v6596_v51 = vpop.f32.mrf.mxu0 }
 0x31e   :  { %v2208_v40 = vpop.f32.mrf.mxu1 }
 0x31f   :  { %v2247_v28 = vadd.f32 %v2208_v40, %v1932_v59 }
 0x320   :  { %v6582_v29 = vpop.f32.mrf.mxu1 }
 0x321   :  { %v6584_v46 = vadd.f32 %v2481_v13, %v2247_v28  ;;  %v6598_v50 = vpop.f32.mrf.mxu0  ;;  %v6622_v13 = vrot.slane %v1655_v8, %v7059_v15 }
 0x322   :  { %v6588_v60 = vpop.f32.mrf.mxu1 }
 0x323   :  { %7053 = vst [vmem:[#allocation15_spill] sm:$0xff] %v6584_v46  ;;  %v6600_v21 = vpop.f32.mrf.mxu0  ;;  %v1937_v40 = vadd.f32 %v6622_v13, %v1894_v3  ;;  %v1939_v8 = vadd.f32 %v6622_v13, %v6548_v2 }
 0x324   :  { %v6592_v25 = vpop.f32.mrf.mxu1 }
 0x325   :  { %v6602_v9 = vpop.f32.mrf.mxu0 }
 0x326   :  { %v2218_v37 = vpop.f32.mrf.mxu1 }
 0x327   :  { %v6604_v17 = vpop.f32.mrf.mxu0  ;;  %v2251_v28 = vadd.f32 %v2218_v37, %v1936_v19  ;;  %v1940_v19 = vadd.f32 %v6575_v1, %v6550_v5 }
 0x328   :  { %v2220_v22 = vpop.f32.mrf.mxu1 }
 0x329   :  { %v2524_v15 = vadd.f32 %v2491_v48, %v2251_v28 }
 0x32a   :  { %v2222_v52 = vpop.f32.mrf.mxu1 }
 0x32c   :  { %v2224_v47 = vpop.f32.mrf.mxu1 }
 0x32d   :  { %v6606_v36 = vpop.f32.mrf.mxu0 }
 0x32e   :  { %v2228_v56 = vpop.f32.mrf.mxu1  ;;  %7054 = vst [vmem:[#allocation16_spill] sm:$0xff] %v6606_v36 }
 0x32f   :  { %v6608_v20 = vpop.f32.mrf.mxu0 }
 0x330   :  { %v2230_v63 = vpop.f32.mrf.mxu1  ;;  %7055 = vst [vmem:[#allocation17_spill] sm:$0xff] %v6608_v20  ;;  %v1938_v20 = vadd.f32 %v6575_v1, %v6546_v53 }
 0x331   :  { %v6610_v57 = vpop.f32.mrf.mxu0 }
 0x332   :  { %v2232_v11 = vpop.f32.mrf.mxu1  ;;  %7056 = vst [vmem:[#allocation4_spill] sm:$0xff] %v6610_v57  ;;  %v2253_v16 = vadd.f32 %v2222_v52, %v1938_v20 }
 0x333   :  { %v6612_v61 = vpop.f32.mrf.mxu0 }
 0x334   :  { %v2234_v23 = vpop.f32.mrf.mxu1  ;;  %7057 = vst [vmem:[#allocation5_spill] sm:$0xff] %v6612_v61  ;;  %v2252_v61 = vadd.f32 %v2220_v22, %v1937_v40  ;;  %v2526_v53 = vadd.f32 %v2495_v32, %v2253_v16  ;;  %v1942_v22 = vadd.f32 %v6575_v1, %v6556_v26  ;;  %v2255_v40 = vadd.f32 %v2228_v56, %v1940_v19 }
 0x335   :  { %v3044_v30 = vpop.f32.mrf.mxu0  ;;  %v1943_v32 = vadd.f32 %v6622_v13, %v6560_v55 }
 0x336   :  { %v2238_v45 = vpop.f32.mrf.mxu1  ;;  %v2525_v37 = vadd.f32 %v2493_v49, %v2252_v61  ;;  %v1941_v49 = vadd.f32 %v6622_v13, %v6552_v6  ;;  %v1944_v6 = vadd.f32 %v6575_v1, %v6562_v14 }
 0x337   :  { %v3046_v54 = vpop.f32.mrf.mxu0 }
 0x338   :  { %v2240_v58 = vpop.f32.mrf.mxu1  ;;  %v2256_v56 = vadd.f32 %v2230_v63, %v1941_v49 }
 0x339   :  { %v3048_v31 = vpop.f32.mrf.mxu0 }
 0x33a   :  { %v6614_v34 = vpop.f32.mrf.mxu1 }
 0x33b   :  { %v3050_v62 = vpop.f32.mrf.mxu0 }
 0x33c   :  { %v6616_v35 = vpop.f32.mrf.mxu1 }
 0x33d   :  { %v3054_v36 = vpop.f32.mrf.mxu0 }
 0x33f   :  { %v6636_v10 = vpop.f32.mrf.mxu0 }
 0x35a   :  { %v6618_v18 = vpop.f32.mrf.mxu1 }
 0x35b   :  { %7058 = vst [vmem:[#allocation18_spill] sm:$0xff] %v6618_v18 }
 0x35c   :  { %v6625_v59 = vpop.f32.mrf.mxu1 }
 0x35d   :  { %7060 = vst [vmem:[#allocation19_spill] sm:$0xff] %v6625_v59  ;;  %v2254_v59 = vadd.f32 %v2224_v47, %v1939_v8 }
 0x35e   :  { %v6628_v57 = vpop.f32.mrf.mxu1 }
 0x35f   :  { %7061 = vst [vmem:[#allocation6_spill] sm:$0xff] %v6628_v57  ;;  %v2527_v47 = vadd.f32 %v6580_v33, %v2254_v59  ;;  %v2528_v33 = vadd.f32 %v6586_v41, %v2255_v40  ;;  %v2259_v41 = vadd.f32 %v2238_v45, %v1944_v6 }
 0x360   :  { %v6632_v46 = vpop.f32.mrf.mxu1 }
 0x361   :  { %7062 = vst [vmem:[#allocation7_spill] sm:$0xff] %v6632_v46  ;;  %v3058_v46 = vpop.f32.mrf.mxu0 }
 0x362   :  { %v2771_v18 = vpop.f32.mrf.mxu1 }
 0x363   :  { %v2804_v3 = vadd.f32 %v2771_v18, %v2524_v15  ;;  %v2529_v15 = vadd.f32 %v6590_v27, %v2256_v56 }
 0x364   :  { %v2773_v57 = vpop.f32.mrf.mxu1 }
 0x365   :  { %v2805_v4 = vadd.f32 %v2773_v57, %v2525_v37  ;;  %v6642_v52 = vadd.f32 %v3044_v30, %v2804_v3  ;;  %v2257_v57 = vadd.f32 %v2232_v11, %v1942_v22  ;;  %v3060_v30 = vpop.f32.mrf.mxu0  ;;  %v1945_v11 = vadd.f32 %v6622_v13, %v6566_v44 }
 0x366   :  { %v2775_v2 = vpop.f32.mrf.mxu1  ;;  %v1947_v3 = vadd.f32 %v6622_v13, %v6577_v12  ;;  %v7066_v6 = vld [vmem:[#allocation6_spill] sm:$0xff] }
 0x367   :  { %v6644_v48 = vadd.f32 %v3046_v54, %v2805_v4  ;;  %v2806_v20 = vadd.f32 %v2775_v2, %v2526_v53  ;;  %v2258_v4 = vadd.f32 %v2234_v23, %v1943_v32  ;;  %v2530_v59 = vadd.f32 %v6594_v0, %v2257_v57  ;;  %v7063_v57 = vld [vmem:[#allocation3_spill] sm:$0xff] }
 0x368   :  { %v2777_v5 = vpop.f32.mrf.mxu1  ;;  %v2260_v16 = vadd.f32 %v2240_v58, %v1945_v11  ;;  %v1935_v0 = vadd.f32 %v6622_v13, %v6544_v38  ;;  %v1934_v38 = vadd.f32 %v6575_v1, %v6542_v24  ;;  %v2262_v2 = vadd.f32 %v6616_v35, %v1947_v3 }
 0x369   :  { %v2807_v61 = vadd.f32 %v2777_v5, %v2527_v47  ;;  %v4480_v26 = vpack.i.bf16 %v6644_v48, %v6642_v52  ;;  %v6653_v54 = vadd.f32 %v3048_v31, %v2806_v20  ;;  %v1946_v31 = vadd.f32 %v6575_v1, %v6571_v7 }
 0x36a   :  { %v2781_v18 = vpop.f32.mrf.mxu1  ;;  %v2531_v44 = vadd.f32 %v6596_v51, %v2258_v4  ;;  %v1933_v51 = vadd.f32 %v6622_v13, %v6540_v42  ;;  %v2250_v12 = vadd.f32 %v6592_v25, %v1935_v0  ;;  %v2249_v1 = vadd.f32 %v6588_v60, %v1934_v38  ;;  %v7065_v4 = vld [vmem:[#allocation19_spill] sm:$0xff]  ;;  %v7072_v0 = vld [vmem:[#allocation16_spill] sm:$0xff] }
 0x36b   :  { %v6655_v28 = vadd.f32 %v3050_v62, %v2807_v61  ;;  %4481 = vrot.lane.b32.xlu0 %v4480_v26, %s4878_s4  ;;  %v2808_v63 = vadd.f32 %v2781_v18, %v2528_v33  ;;  %v3064_v62 = vpop.f32.mrf.mxu0  ;;  %v2261_v37 = vadd.f32 %v6614_v34, %v1946_v31  ;;  %v4490_v45 = vpack.i.bf16 %v6653_v54, %v6642_v52  ;;  %v7064_v26 = vld [vmem:[#allocation7_spill] sm:$0xff]  ;;  %v7069_v31 = vld [vmem:[#allocation5_spill] sm:$0xff]  ;;  %v4830_v38 = vld [vmem:[%s6960_s5 + $0x30] sm:$0xff]  }
 0x36c   :  { %v2783_v55 = vpop.f32.mrf.mxu1  ;;  %v2532_v34 = vadd.f32 %v6598_v50, %v2259_v41  ;;  %v2248_v24 = vadd.f32 %v6582_v29, %v1933_v51  ;;  %v2535_v29 = vadd.f32 %v6604_v17, %v2262_v2  ;;  %v2522_v61 = vadd.f32 %v7063_v57, %v2249_v1  ;;  %v4829_v51 = vld [vmem:[%s6960_s5 + $0x70] sm:$0xff]   ;;  %v4838_v2 = vld [vmem:[%s6960_s5 + $0x138] sm:$0xff]  }
 0x36d   :  { %v4485_v23 = vpack.i.bf16 %v6655_v28, %v6653_v54  ;;  %v6678_v58 = vadd.f32 %v3054_v36, %v2808_v63  ;;  %v2809_v27 = vadd.f32 %v2783_v55, %v2529_v15  ;;  %v3066_v22 = vpop.f32.mrf.mxu0  ;;  %v2534_v50 = vadd.f32 %v6602_v9, %v2261_v37  ;;  %v7067_v63 = vld [vmem:[#allocation15_spill] sm:$0xff]  ;;  %v7071_v15 = vld [vmem:[#allocation4_spill] sm:$0xff] }
 0x36e   :  { %v2785_v8 = vpop.f32.mrf.mxu1  ;;  %v2521_v9 = vadd.f32 %v6554_v39, %v2248_v24  ;;  %v2802_v17 = vadd.f32 %v7066_v6, %v2522_v61  ;;  %v4836_v24 = vld [vmem:[%s6960_s5 + $0x18] sm:$0xff]   ;;  %v4837_v1 = vld [vmem:[%s6960_s5 + $0x50] sm:$0xff]  }
 0x36f   :  { %v2810_v14 = vadd.f32 %v2785_v8, %v2530_v59  ;;  %4486 = vrot.lane.b32.xlu1 %v4485_v23, %s4878_s4  ;;  %v6699_v13 = vadd.f32 %v6636_v10, %v2809_v27  ;;  %v3068_v47 = vpop.f32.mrf.mxu0  ;;  %v7068_v59 = vld [vmem:[#allocation18_spill] sm:$0xff]  ;;  %v7070_v8 = vld [vmem:[#allocation17_spill] sm:$0xff]  ;;  %v4880_v27 = vmov 0.0  }
 0x370   :  { %v2787_v7 = vpop.f32.mrf.mxu1  ;;  %v2801_v33 = vadd.f32 %v7065_v4, %v2521_v9  ;;  %v2800_v23 = vadd.f32 %v7068_v59, %v7067_v63  ;;  %4348 = vmatprep.subr.bf16.mxu0 %v4880_v27  ;;  %v4846_v9 = vld [vmem:[%s6960_s5 + $0xf8] sm:$0xff]   ;;  %4364 = vmatprep.mubr.msk.bf16.mxu0 %vm4882_vm9, %v4880_v27 }
 0x371   :  { %v6680_v19 = vadd.f32 %v3058_v46, %v2810_v14  ;;  %v2811_v53 = vadd.f32 %v2787_v7, %v2531_v44  ;;  %v2533_v46 = vadd.f32 %v6600_v21, %v2260_v16  ;;  %v2523_v21 = vadd.f32 %v6564_v43, %v2250_v12  ;;  %v3070_v18 = vpop.f32.mrf.mxu0  ;;  %v4831_v12 = vld [vmem:[%s6960_s5 + $0x68] sm:$0xff]   ;;  %4349 = vmatpush3.bf16.msra.mxu0 %v4838_v2 }
 0x372   :  { %v2791_v40 = vpop.f32.mrf.mxu1  ;;  %v6732_v16 = vadd.f32 %v7070_v8, %v2801_v33  ;;  %v6735_v14 = vadd.f32 %v7071_v15, %v2802_v17  ;;  %v6741_v3 = vadd.f32 %v7072_v0, %v2800_v23  ;;  %4350 = vmatprep.subr.bf16.mxu0 %v4880_v27  ;;  %v4850_v33 = vld [vmem:[%s6960_s5 + $0x118] sm:$0xff]  }
 0x373   :  { %v6689_v36 = vadd.f32 %v3060_v30, %v2811_v53  ;;  %4491 = vrot.lane.b32.xlu1 %v4490_v45, %s4879_s14  ;;  %v4500_v42 = vpack.i.bf16 %v6680_v19, %v6678_v58  ;;  %v2812_v35 = vadd.f32 %v2791_v40, %v2532_v34  ;;  %v2803_v56 = vadd.f32 %v7064_v26, %v2523_v21  ;;  %v4827_v45 = vld [vmem:[%s6960_s5 + $0x78] sm:$0xff]   ;;  %v4833_v34 = vld [vmem:[%s6960_s5 + $0x60] sm:$0xff]  }
 0x374   :  { %v2793_v25 = vpop.f32.mrf.mxu1  ;;  %v4530_v7 = vpack.i.bf16 %v6735_v14, %v6741_v3  ;;  %v4828_v53 = vld [vmem:[%s6960_s5 + $0x38] sm:$0xff]   ;;  %4290 = vmatprep.subr.bf16.mxu1 %v4827_v45  ;;  %v4834_v40 = vld [vmem:[%s6960_s5 + $0x20] sm:$0xff]  }
 0x375   :  { %v2813_v20 = vadd.f32 %v2793_v25, %v2533_v46  ;;  %4501 = vrot.lane.b32.xlu0 %v4500_v42, %s4878_s4  ;;  %v4505_v60 = vpack.i.bf16 %v6689_v36, %v6699_v13  ;;  %v6712_v30 = vadd.f32 %v3064_v62, %v2812_v35  ;;  %v6726_v41 = vadd.f32 %v7069_v31, %v2803_v56  ;;  %v4835_v46 = vld [vmem:[%s6960_s5 + $0x58] sm:$0xff]   ;;  %v4839_v25 = vld [vmem:[%s6960_s5 + $0x10] sm:$0xff]   ;;  %v4840_v35 = vld [vmem:[%s6960_s5 + $0x48] sm:$0xff]  }
 0x376   :  { %v2795_v49 = vpop.f32.mrf.mxu1  ;;  %4291 = vmatpush3.bf16.msra.mxu1 %v4828_v53 }
 0x377   :  { %v6703_v5 = vadd.f32 %v3066_v22, %v2813_v20  ;;  %v2814_v32 = vadd.f32 %v2795_v49, %v2534_v50  ;;  %4496 = vrot.lane.b32.xlu1 %v4500_v42, %s4879_s14  ;;  %v4525_v37 = vpack.i.bf16 %v6726_v41, %v6732_v16  ;;  %4292 = vmatprep.subr.bf16.mxu1 %v4829_v51  ;;  %v4832_v22 = vld [vmem:[%s6960_s5 + $0x28] sm:$0xff]   ;;  %v4841_v42 = vld [vmem:[%s6960_s5 + $0x130] sm:$0xff]  }
 0x378   :  { %v2797_v10 = vpop.f32.mrf.mxu1  ;;  %4351 = vmatpush3.bf16.msra.mxu0 %v4841_v42  ;;  %v4844_v50 = vld [vmem:[%s6960_s5 + $0x128] sm:$0xff]  }
 0x379   :  { %v2815_v43 = vadd.f32 %v2797_v10, %v2535_v29  ;;  %4506 = vrot.lane.b32.xlu0 %v4505_v60, %s4878_s4  ;;  %v6717_v55 = vadd.f32 %v3068_v47, %v2814_v32  ;;  %v4510_v39 = vpack.i.bf16 %v6703_v5, %v6712_v30  ;;  %4352 = vmatprep.subr.bf16.mxu0 %v4880_v27  ;;  %v4842_v20 = vld [vmem:[%s6960_s5 + $0x8] sm:$0xff]   ;;  %v4843_v47 = vld [vmem:[%s6960_s5 + $0x40] sm:$0xff]  }
 0x37a   :  { %4293 = vmatpush3.bf16.msra.mxu1 %v4830_v38  ;;  %v4845_v29 = vld [vmem:[%s6960_s5] sm:$0xff]  }
 0x37b   :  { %v6719_v11 = vadd.f32 %v3070_v18, %v2815_v43  ;;  %v4520_v44 = vpack.i.bf16 %v6717_v55, %v6712_v30  ;;  %4294 = vmatprep.subr.bf16.mxu1 %v4831_v12  ;;  %v4847_v10 = vld [vmem:[%s6960_s5 + $0x120] sm:$0xff]  }
 0x37c   :  { %4353 = vmatpush3.bf16.msra.mxu0 %v4844_v50 }
 0x37d   :  { %4511 = vrot.lane.b32.xlu0 %v4510_v39, %s4878_s4  ;;  %v4515_v62 = vpack.i.bf16 %v6719_v11, %v6717_v55  ;;  %4354 = vmatprep.subr.bf16.mxu0 %v4880_v27 }
 0x37e   :  { %4295 = vmatpush3.bf16.msra.mxu1 %v4832_v22 }
 0x37f   :  { %4516 = vrot.lane.b32.xlu1 %v4515_v62, %s4878_s4  ;;  %4296 = vmatprep.subr.bf16.mxu1 %v4833_v34 }
 0x380   :  { %4355 = vmatpush3.bf16.msra.mxu0 %v4847_v10 }
 0x381   :  { %4521 = vrot.lane.b32.xlu0 %v4520_v44, %s4879_s14  ;;  %4356 = vmatprep.subr.bf16.mxu0 %v4880_v27 }
 0x382   :  { %4297 = vmatpush3.bf16.msra.mxu1 %v4834_v40 }
 0x383   :  { %4526 = vrot.lane.b32.xlu1 %v4525_v37, %s4878_s4  ;;  %4298 = vmatprep.subr.bf16.mxu1 %v4835_v46 }
 0x384   :  { %4357 = vmatpush3.bf16.msra.mxu0 %v4850_v33 }
 0x385   :  { %4531 = vrot.lane.b32.xlu0 %v4530_v7, %s4879_s14  ;;  %4358 = vmatprep.subr.bf16.mxu0 %v4880_v27  ;;  %s4883_s14 = smov 64  }
 0x386   :  { %4299 = vmatpush3.bf16.msra.mxu1 %v4836_v24 }
 0x387   :  { %4536 = vrot.lane.b32.xlu1 %v4530_v7, %s4878_s4  ;;  %4300 = vmatprep.subr.bf16.mxu1 %v4837_v1 }
 0x38a   :  { %4301 = vmatpush3.bf16.msra.mxu1 %v4839_v25 }
 0x38b   :  { %4302 = vmatprep.subr.bf16.mxu1 %v4840_v35 }
 0x38e   :  { %4303 = vmatpush3.bf16.msra.mxu1 %v4842_v20 }
 0x38f   :  { %4304 = vmatprep.subr.bf16.mxu1 %v4843_v47 }
 0x392   :  { %4305 = vmatpush3.bf16.msra.mxu1 %v4845_v29 }
 0x393   :  { %4312 = vmatprep.subr.bf16.mxu1 %v4846_v9 }
 0x3dd   :  { %v4482_v21 = vpop.permute.xlu0 %4481 }
 0x3de   :  { %v4484_v49 = vunpack.i.h.bf16 %v4482_v21  ;;  %v4483_v32 = vunpack.i.l.bf16 %v4482_v21 }
 0x3e0   :  { %v3140_v57 = vsel %vm3137_vm6, %v4483_v32, %v4484_v49 }
 0x3e1   :  { %v4487_v60 = vpop.permute.xlu1 %4486  ;;  %v3199_v18 = vmax.f32 %v6642_v52, %v3140_v57  ;;  %v4853_v52 = vld [vmem:[%s6960_s5 + $0x110] sm:$0xff]  }
 0x3e2   :  { %v4489_v61 = vunpack.i.h.bf16 %v4487_v60  ;;  %v4488_v26 = vunpack.i.l.bf16 %v4487_v60  ;;  %4359 = vmatpush3.bf16.msra.mxu0 %v4853_v52 }
 0x3e3   :  { %4360 = vmatprep.subr.bf16.mxu0 %v4880_v27 }
 0x3e4   :  { %v3141_v56 = vsel %vm3137_vm6, %v4488_v26, %v4489_v61 }
 0x3e5   :  { %v4492_v43 = vpop.permute.xlu1 %4491  ;;  %v3201_v4 = vmax.f32 %v6653_v54, %v3141_v56 }
 0x3e6   :  { %v4494_v6 = vunpack.i.h.bf16 %v4492_v43  ;;  %v4493_v17 = vunpack.i.l.bf16 %v4492_v43 }
 0x3e7   :  { %v4502_v39 = vpop.permute.xlu0 %4501  ;;  %v3216_v63 = vmax.f32 %v3199_v18, %v3201_v4 }
 0x3e8   :  { %v3189_v59 = vsel %vm3186_vm7, %v4484_v49, %v4493_v17  ;;  %v3190_v23 = vsel %vm3186_vm7, %v4489_v61, %v4494_v6  ;;  %v4504_v15 = vunpack.i.h.bf16 %v4502_v39  ;;  %v4503_v44 = vunpack.i.l.bf16 %v4502_v39 }
 0x3e9   :  { %v3200_v54 = vmax.f32 %v6644_v48, %v3189_v59  ;;  %v3202_v31 = vmax.f32 %v6655_v28, %v3190_v23  ;;  %v4497_v62 = vpop.permute.xlu1 %4496  ;;  %v3230_v8 = vmax.f32 %v3216_v63, 0.0  ;;  %v4856_v28 = vld [vmem:[%s6960_s5 + $0x108] sm:$0xff]  }
 0x3ea   :  { %v4499_v0 = vunpack.i.h.bf16 %v4497_v62  ;;  %v4498_v53 = vunpack.i.l.bf16 %v4497_v62  ;;  %4361 = vmatpush3.bf16.msra.mxu0 %v4856_v28 }
 0x3eb   :  { %v4507_v37 = vpop.permute.xlu0 %4506  ;;  %3238 = vrot.lane.b32.xlu0 %v3230_v8, %s4881_s11  ;;  %v3217_v7 = vsel %vm3212_vm8, %v3200_v54, -inf  ;;  %v3218_v45 = vsel %vm3212_vm8, %v3202_v31, -inf  ;;  %4362 = vmatprep.subr.bf16.mxu0 %v4880_v27 }
 0x3ec   :  { %v4509_v51 = vunpack.i.h.bf16 %v4507_v37  ;;  %v4508_v38 = vunpack.i.l.bf16 %v4507_v37  ;;  %v3219_v48 = vmax.f32 %v3217_v7, %v3218_v45 }
 0x3ee   :  { %v3143_v12 = vsel %vm3137_vm6, %v4504_v15, %v4509_v51  ;;  %v3142_v22 = vsel %vm3137_vm6, %v4503_v44, %v4508_v38  ;;  %v3191_v34 = vsel %vm3186_vm7, %v4508_v38, %v4498_v53  ;;  %v3192_v40 = vsel %vm3186_vm7, %v4509_v51, %v4499_v0 }
 0x3ef   :  { %v3205_v2 = vmax.f32 %v6680_v19, %v3143_v12  ;;  %v3203_v46 = vmax.f32 %v6678_v58, %v3142_v22  ;;  %v3204_v42 = vmax.f32 %v6699_v13, %v3191_v34  ;;  %v3206_v24 = vmax.f32 %v6689_v36, %v3192_v40  ;;  %v4512_v1 = vpop.permute.xlu0 %4511  ;;  %v4859_v58 = vld [vmem:[%s6960_s5 + $0x100] sm:$0xff]  }
 0x3f0   :  { %v4514_v25 = vunpack.i.h.bf16 %v4512_v1  ;;  %v4513_v50 = vunpack.i.l.bf16 %v4512_v1  ;;  %v3231_v35 = vmax.f32 %v3219_v48, 0.0  ;;  %4363 = vmatpush3.bf16.msra.mxu0 %v4859_v58  ;;  %v4854_v1 = vld [vmem:[%s6960_s5 + $0xa8] sm:$0xff]  }
 0x3f1   :  { %v4517_v20 = vpop.permute.xlu1 %4516  ;;  %v3220_v47 = vmax.f32 %v3203_v46, %v3205_v2  ;;  %v3221_v21 = vsel %vm3212_vm8, %v3204_v42, -inf  ;;  %v3222_v49 = vsel %vm3212_vm8, %v3206_v24, -inf  ;;  %v4848_v46 = vld [vmem:[%s6960_s5 + $0xb8] sm:$0xff]   ;;  %v4852_v24 = vld [vmem:[%s6960_s5 + $0xe8] sm:$0xff]  }
 0x3f2   :  { %v3144_v19 = vsel %vm3137_vm6, %v4513_v50, %v4514_v25  ;;  %3240 = vrot.lane.b32.xlu0 %v3231_v35, %s4881_s11  ;;  %v4519_v36 = vunpack.i.h.bf16 %v4517_v20  ;;  %v4518_v13 = vunpack.i.l.bf16 %v4517_v20  ;;  %v3223_v32 = vmax.f32 %v3221_v21, %v3222_v49  ;;  %v4857_v35 = vld [vmem:[%s6960_s5 + $0xa0] sm:$0xff]   ;;  %v4858_v21 = vld [vmem:[%s6960_s5 + $0xd8] sm:$0xff]  }
 0x3f3   :  { %v4522_v29 = vpop.permute.xlu0 %4521  ;;  %v3232_v60 = vmax.f32 %v3220_v47, 0.0  ;;  %v3207_v26 = vmax.f32 %v6712_v30, %v3144_v19 }
 0x3f4   :  { %v3145_v9 = vsel %vm3137_vm6, %v4518_v13, %v4519_v36  ;;  %v4524_v10 = vunpack.i.h.bf16 %v4522_v29  ;;  %v4523_v57 = vunpack.i.l.bf16 %v4522_v29  ;;  %v3233_v61 = vmax.f32 %v3223_v32, 0.0  ;;  %v4861_v32 = vld [vmem:[%s6960_s5 + $0xd0] sm:$0xff]  }
 0x3f5   :  { %v3209_v56 = vmax.f32 %v6717_v55, %v3145_v9  ;;  %v4527_v23 = vpop.permute.xlu1 %4526 }
 0x3f6   :  { %v3193_v43 = vsel %vm3186_vm7, %v4514_v25, %v4523_v57  ;;  %v3194_v18 = vsel %vm3186_vm7, %v4519_v36, %v4524_v10  ;;  %v4540_v6 = vpack.i.bf16 %v3233_v61, %v3232_v60  ;;  %v4528_v62 = vunpack.i.l.bf16 %v4527_v23  ;;  %v4855_v25 = vld [vmem:[%s6960_s5 + $0xe0] sm:$0xff]   ;;  %v4860_v36 = vld [vmem:[%s6960_s5 + $0x98] sm:$0xff]   ;;  %v4862_v57 = vld [vmem:[%s6960_s5 + $0x90] sm:$0xff]  }
 0x3f7   :  { %v3208_v4 = vmax.f32 %v6703_v5, %v3193_v43  ;;  %v3210_v33 = vmax.f32 %v6719_v11, %v3194_v18  ;;  %v3224_v17 = vmax.f32 %v3207_v26, %v3209_v56  ;;  %v4532_v52 = vpop.permute.xlu0 %4531  ;;  %v4529_v11 = vunpack.i.h.bf16 %v4527_v23  ;;  %v4863_v61 = vld [vmem:[%s6960_s5 + $0xc8] sm:$0xff]   ;;  %v4865_v56 = vld [vmem:[%s6960_s5 + $0xc0] sm:$0xff]  }
 0x3f8   :  { %4541 = vrot.lane.b32.xlu1 %v4540_v6, %s4883_s14  ;;  %v4534_v54 = vunpack.i.h.bf16 %v4532_v52  ;;  %v4533_v5 = vunpack.i.l.bf16 %v4532_v52  ;;  %v4864_v26 = vld [vmem:[%s6960_s5 + $0x88] sm:$0xff]   ;;  %v4866_v43 = vld [vmem:[%s6960_s5 + $0x80] sm:$0xff]   ;;  %v4867_v6 = vld [vmem:[%s6961_s7 + $0x18] ss:$0 sps:$4 sm:$0x11]  }
 0x3f9   :  { %v3234_v39 = vmax.f32 %v3224_v17, 0.0  ;;  %v3225_v63 = vsel %vm3212_vm8, %v3208_v4, -inf  ;;  %v3226_v59 = vsel %vm3212_vm8, %v3210_v33, -inf  ;;  %v4537_v31 = vpop.permute.xlu1 %4536  ;;  %v3763_v17 = vsel %vm3761_vm12, %v4867_v6, 0 }
 0x3fa   :  { %v3227_v30 = vmax.f32 %v3225_v63, %v3226_v59  ;;  %v4539_v8 = vunpack.i.h.bf16 %v4537_v31  ;;  %v4538_v15 = vunpack.i.l.bf16 %v4537_v31  ;;  %v3187_v44 = vsel %vm3186_vm7, %v4528_v62, %v4533_v5  ;;  %v4869_v63 = vld [vmem:[%s6961_s7 + $0x8] sm:$0xff]   ;;  %v4870_v59 = vld [vmem:[%s6961_s7] sm:$0xff]  }
 0x3fb   :  { %v3188_v0 = vsel %vm3186_vm7, %v4529_v11, %v4534_v54  ;;  %v3196_v37 = vmax.f32 %v6732_v16, %v3187_v44 }
 0x3fc   :  { %3257 = vrot.lane.b32.xlu1 %v3234_v39, %s4884_s15  ;;  %v3235_v55 = vmax.f32 %v3227_v30, 0.0  ;;  %v3198_v7 = vmax.f32 %v6726_v41, %v3188_v0  ;;  %v3138_v45 = vsel %vm3137_vm6, %v4538_v15, %v4528_v62  ;;  %v3139_v53 = vsel %vm3137_vm6, %v4539_v8, %v4529_v11  ;;  %v4868_v39 = vld [vmem:[%s6961_s7 + $0x10] sm:$0xff]   ;;  %v4243_v8 = vld [vmem:[%s6962_s6] ss:$0 sm:$0xff] }
 0x3fd   :  { %v3195_v51 = vmax.f32 %v6741_v3, %v3138_v45  ;;  %v3197_v38 = vmax.f32 %v6735_v14, %v3139_v53  ;;  %v3213_v48 = vsel %vm3212_vm8, %v3196_v37, -inf  ;;  %v4849_v14 = vld [vmem:[%s6960_s5 + $0xf0] sm:$0xff]  }
 0x3fe   :  { %3259 = vrot.lane.b32.xlu0 %v3235_v55, %s4884_s15  ;;  %v3214_v28 = vsel %vm3212_vm8, %v3198_v7, -inf  ;;  %v4851_v3 = vld [vmem:[%s6960_s5 + $0xb0] sm:$0xff]  }
 0x3ff   :  { %v3211_v12 = vmax.f32 %v3195_v51, %v3197_v38  ;;  %v3215_v22 = vmax.f32 %v3213_v48, %v3214_v28  ;;  %v7073_v48 = vlaneseq }
 0x401   :  { %v3228_v34 = vmax.f32 %v3211_v12, 0.0  ;;  %v3229_v40 = vmax.f32 %v3215_v22, 0.0  ;;  %v3806_v28 = vand.u32 127, %v7073_v48  ;;  %v4284_v12 = vld [vmem:[%s6963_s8] ss:$0 sm:$0xff] }
 0x403   :  { %v3268_v42 = vpack.c.bf16 %v3228_v34, %v3228_v34  ;;  %vm3807_vm14 = vcmp.lt.s32.totalorder %v3806_v28, 10 }
 0x45d   :  { %v3239_v2 = vpop.permute.xlu0 %3238 }
 0x45e   :  { %v3265_v16 = vsel %vm3212_vm8, %v3229_v40, %v3239_v2 }
 0x45f   :  { %v3269_v41 = vpack.c.bf16 %v3265_v16, %v3265_v16 }
 0x461   :  { %3632 = vmatprep.mubr.bf16.mxu1 %v3269_v41 }
 0x462   :  { %3633 = vmatmul.mubr.bf16.vlgmr.msra.gmra.mxu1 %v3268_v42 }
 0x463   :  { %4313 = vmatpush3.bf16.msra.mxu1 %v4848_v46 }
 0x464   :  { %4314 = vmatprep.subr.bf16.mxu1 %v4849_v14  ;;  %v3241_v49 = vpop.permute.xlu0 %3240 }
 0x465   :  { %v3242_v18 = vsel %vm3212_vm8, %v3239_v2, %v3241_v49 }
 0x467   :  { %4315 = vmatpush3.bf16.msra.mxu1 %v4851_v3 }
 0x468   :  { %4316 = vmatprep.subr.bf16.mxu1 %v4852_v24 }
 0x46a   :  { %v4542_v50 = vpop.permute.xlu1 %4541 }
 0x46b   :  { %4317 = vmatpush3.bf16.msra.mxu1 %v4854_v1  ;;  %v4544_v20 = vunpack.i.h.bf16 %v4542_v50  ;;  %v4543_v47 = vunpack.i.l.bf16 %v4542_v50 }
 0x46c   :  { %4318 = vmatprep.subr.bf16.mxu1 %v4855_v25 }
 0x46d   :  { %v3252_v58 = vsel %vm3251_vm10, %v4543_v47, %v4544_v20  ;;  %v3266_v4 = vsel %vm3251_vm10, %v3242_v18, %v4543_v47 }
 0x46e   :  { %v3258_v19 = vpop.permute.xlu1 %3257  ;;  %v3270_v33 = vpack.c.bf16 %v3266_v4, %v3266_v4 }
 0x46f   :  { %4319 = vmatpush3.bf16.msra.mxu1 %v4857_v35  ;;  %v3267_v13 = vsel %vm3261_vm11, %v3252_v58, %v3258_v19 }
 0x470   :  { %4320 = vmatprep.subr.bf16.mxu1 %v4858_v21  ;;  %v3271_v29 = vpack.c.bf16 %v3267_v13, %v3267_v13  ;;  %v3260_v60 = vpop.permute.xlu0 %3259 }
 0x471   :  { %v3262_v9 = vsel %vm3261_vm11, %v3258_v19, %v3260_v60 }
 0x472   :  { %v3272_v10 = vpack.c.bf16 %v3262_v9, %v3262_v9  ;;  %3672 = vmatprep.mubr.bf16.mxu1 %v3271_v29 }
 0x473   :  { %4321 = vmatpush3.bf16.msra.mxu1 %v4860_v36 }
 0x474   :  { %4322 = vmatprep.subr.bf16.mxu1 %v4861_v32  ;;  %4365 = vmatmul.mubr.bf16.vlgmr.msra.gmra.mxu0 %v3272_v10 }
 0x477   :  { %4323 = vmatpush3.bf16.msra.mxu1 %v4862_v57 }
 0x478   :  { %4324 = vmatprep.subr.bf16.mxu1 %v4863_v61 }
 0x47b   :  { %4325 = vmatpush3.bf16.msra.mxu1 %v4864_v26 }
 0x47c   :  { %4326 = vmatprep.subr.bf16.mxu1 %v4865_v56 }
 0x47f   :  { %4327 = vmatpush3.bf16.msra.mxu1 %v4866_v43 }
 0x480   :  { %4368 = vmatprep.subr.bf16.mxu1 %v4880_v27 }
 0x482   :  { %3673 = vmatmul.mubr.bf16.vlgmr.msra.gmra.mxu1 %v3270_v33 }
 0x483   :  { %4376 = vmatprep.mubr.msk.bf16.mxu1 %vm4882_vm9, %v4880_v27  ;;  %4369 = vmatpush3.bf16.msra.mxu1 %v3763_v17 }
 0x484   :  { %4370 = vmatprep.subr.bf16.mxu1 %v4880_v27 }
 0x487   :  { %4371 = vmatpush3.bf16.msra.mxu1 %v4868_v39 }
 0x488   :  { %4372 = vmatprep.subr.bf16.mxu1 %v4880_v27 }
 0x48b   :  { %4373 = vmatpush3.bf16.msra.mxu1 %v4869_v63 }
 0x48c   :  { %4374 = vmatprep.subr.bf16.mxu1 %v4880_v27 }
 0x48f   :  { %4375 = vmatpush3.bf16.msra.mxu1 %v4870_v59 }
 0x522   :  { %v4306_v30 = vpop.f32.mrf.mxu1 }
 0x524   :  { %v4307_v55 = vpop.f32.mrf.mxu1 }
 0x525   :  { %v4308_v62 = vadd.f32 %v4307_v55, %v4306_v30 }
 0x526   :  { %v4309_v23 = vpop.f32.mrf.mxu1 }
 0x527   :  { %v3635_v44 = vadd.f32 %v4308_v62, %v4243_v8 }
 0x528   :  { %v4310_v52 = vpop.f32.mrf.mxu1 }
 0x534   :  { %v3714_v54 = vpop.f32.mrf.mxu0 }
 0x536   :  { %v4366_v5 = vpop.f32.mrf.mxu0 }
 0x538   :  { %v3717_v31 = vpop.f32.mrf.mxu0 }
 0x53a   :  { %v4367_v11 = vpop.f32.mrf.mxu0 }
 0x542   :  { %v4328_v15 = vpop.f32.mrf.mxu1 }
 0x544   :  { %v4329_v27 = vpop.f32.mrf.mxu1 }
 0x545   :  { %v4330_v0 = vadd.f32 %v4329_v27, %v4328_v15 }
 0x546   :  { %v4331_v37 = vpop.f32.mrf.mxu1 }
 0x547   :  { %v3675_v7 = vadd.f32 %v4330_v0, %v3635_v44 }
 0x548   :  { %v4332_v45 = vpop.f32.mrf.mxu1 }
 0x549   :  { %v3715_v53 = vadd.f32 %v3714_v54, %v3675_v7 }
 0x54b   :  { %v3720_v51 = vmax.f32 %v3715_v53, 0.0 }
 0x54d   :  { %v3721_v38 = vpack.c.bf16 %v3720_v51, %v3720_v51 }
 0x54f   :  { %4377 = vmatmul.mubr.msk.bf16.vlgmr.msra.gmra.mxu1 %vm3757_vm13, %v3721_v38 }
 0x60f   :  { %v3799_v22 = vpop.f32.mrf.mxu1 }
 0x610   :  { %v3800_v34 = vadd.f32 %v4284_v12, %v3799_v22 }
 0x611   :  { %v4378_v40 = vpop.f32.mrf.mxu1 }
 0x612   :  { %v3808_v2 = vsel %vm3807_vm14, %v3800_v34, -1e+30 }
 0x613   :  { %3809 = vmax.xlane.f32.xlu1 %v3808_v2  ;;  %v3802_v16 = vpop.f32.mrf.mxu1 }
 0x615   :  { %v4379_v41 = vpop.f32.mrf.mxu1 }
 0x69c   :  { %v3810_v46 = vpop.xlane.xlu1 %3809 }
 0x69d   :  { %v3811_v42 = vsub.f32 %v3808_v2, %v3810_v46 }
 0x69f   :  { %v3812_v14 = vmul.f32 1.442695, %v3811_v42 }
 0x6a1   :  { %4871 = vpow2.f32 %v3812_v14 }
 0x6ae   :  { %v4872_v3 = vpop.eup %4871 }
 0x6af   :  { %3814 = vadd.xlane.f32.xlu0 %v4872_v3 }
 0x738   :  { %v3815_v24 = vpop.xlane.xlu0 %3814 }
 0x739   :  { %4873 = vlog2.f32 %v3815_v24 }
 0x746   :  { %v4874_v1 = vpop.eup %4873 }
 0x747   :  { %v3817_v25 = vmul.f32 0.6931472, %v4874_v1 }
 0x749   :  { %v3818_v50 = vadd.f32 %v3817_v25, %v3810_v46 }
 0x74b   :  { %v3819_v35 = vsub.f32 %v3800_v34, %v3818_v50 }
 0x74d   :  { %3820 = vst [vmem:[%s6964_s9] sm:$0xff] %v3819_v35 }

</bundles_post_ra>
